<compile_context>
chip_gen: v5e
topology: v5e:2x2
jax: 0.10.0
libtpu: 0.0.40
codegen_flags: <defaults>
</compile_context>

<pallas_src>
import functools
import math

import numpy as np
import jax
import jax.numpy as jnp
from jax.experimental import pallas as pl
from jax.experimental.pallas import tpu as pltpu

LN_EPS = 1e-5  # PyTorch nn.LayerNorm default


def _gelu_tanh(x):
    # tanh approximation of GELU. PyTorch nn.GELU default is erf-based; the tanh form
    # matches to ~1e-3 and lowers cleanly to the TPU EUP.
    # TODO(synk): exact erf-based GELU if/when erf lowers in Mosaic.
    c = 0.7978845608028654  # sqrt(2/pi)
    return 0.5 * x * (1.0 + jnp.tanh(c * (x + 0.044715 * x * x * x)))


def _layer_norm(z, g, b):
    mu = jnp.mean(z, axis=-1, keepdims=True)
    zc = z - mu
    var = jnp.mean(zc * zc, axis=-1, keepdims=True)
    return zc * jax.lax.rsqrt(var + LN_EPS) * g + b


# ----------------------------------------------------------------------------
# 2D sin/cos positional embedding (MAE-style), computed once on host.
# ----------------------------------------------------------------------------
def _sincos_1d(embed_dim, pos):
    omega = np.arange(embed_dim // 2, dtype=np.float64) / (embed_dim / 2.0)
    omega = 1.0 / (10000.0 ** omega)
    out = np.einsum("m,d->md", pos.reshape(-1).astype(np.float64), omega)
    return np.concatenate([np.sin(out), np.cos(out)], axis=1)


def get_2d_sincos_pos_embed(embed_dim, grid_size):
    gh, gw = grid_size
    grid_w, grid_h = np.meshgrid(np.arange(gw, dtype=np.float64),
                                 np.arange(gh, dtype=np.float64))
    emb_h = _sincos_1d(embed_dim // 2, grid_h)
    emb_w = _sincos_1d(embed_dim // 2, grid_w)
    return np.concatenate([emb_h, emb_w], axis=1).astype(np.float32)  # (gh*gw, D)


# ----------------------------------------------------------------------------
# Fused encoder kernel
# ----------------------------------------------------------------------------
def _encoder_kernel(*args, n_blocks, n_heads, seq):
    n_params = 5 + 12 * n_blocks
    x_ref = args[0]
    prm = args[1:1 + n_params]
    out_ref = args[1 + n_params]
    attn_ref = args[2 + n_params]    # VMEM scratch (BT*S, D): per-head attention assembly
    flat_ref = args[3 + n_params]    # VMEM scratch (BT, S*D): flattened activations

    w_pe, b_pe, pos = prm[0], prm[1], prm[2]
    w_out, b_out = prm[-2], prm[-1]

    rows, _ = x_ref.shape            # rows = BT * seq
    D = w_pe.shape[1]
    bt = rows // seq
    dh = D // n_heads
    scale = 1.0 / math.sqrt(dh)

    # --- patch embedding + positional embedding -----------------------------
    x = x_ref[...].astype(jnp.float32)                                   # (BT*S, P)
    h = jnp.dot(x, w_pe[...], preferred_element_type=jnp.float32)
    h = h + b_pe[...] + pos[...]                                         # (BT*S, D)

    # --- transformer blocks ---------------------------------------------------
    for blk in range(n_blocks):
        (g1, be1, w_qkv, b_qkv, w_pr, b_pr,
         g2, be2, w_f1, b_f1, w_f2, b_f2) = prm[3 + 12 * blk: 3 + 12 * (blk + 1)]

        # multi-head self-attention (pre-LN, qkv_bias=True)
        hn = _layer_norm(h, g1[...], be1[...])
        qkv = jnp.dot(hn, w_qkv[...], preferred_element_type=jnp.float32) + b_qkv[...]
        for b in range(bt):                      # static unroll: BT samples
            r0 = b * seq
            for hd in range(n_heads):            # static unroll: heads
                c0 = hd * dh
                q = qkv[r0:r0 + seq, c0:c0 + dh]
                k = qkv[r0:r0 + seq, D + c0:D + c0 + dh]
                v = qkv[r0:r0 + seq, 2 * D + c0:2 * D + c0 + dh]
                sc = jax.lax.dot_general(            # q @ k^T  (seq, seq)
                    q, k, (((1,), (1,)), ((), ())),
                    preferred_element_type=jnp.float32) * scale
                sc = sc - jnp.max(sc, axis=-1, keepdims=True)
                e = jnp.exp(sc)
                pattn = e / jnp.sum(e, axis=-1, keepdims=True)
                o = jnp.dot(pattn, v, preferred_element_type=jnp.float32)
                attn_ref[r0:r0 + seq, c0:c0 + dh] = o
        att = jnp.dot(attn_ref[...], w_pr[...],
                      preferred_element_type=jnp.float32) + b_pr[...]
        h = h + att

        # MLP (pre-LN, GELU, hidden = 4*D)
        hn = _layer_norm(h, g2[...], be2[...])
        z = jnp.dot(hn, w_f1[...], preferred_element_type=jnp.float32) + b_f1[...]
        z = _gelu_tanh(z)
        z = jnp.dot(z, w_f2[...], preferred_element_type=jnp.float32) + b_f2[...]
        h = h + z

    # --- flatten (b, s, d) -> (b, s*d) via scratch, then final linear head ----
    for b in range(bt):
        for s in range(seq):
            flat_ref[b:b + 1, s * D:(s + 1) * D] = h[b * seq + s:b * seq + s + 1, :]
    out = jnp.dot(flat_ref[...], w_out[...],
                  preferred_element_type=jnp.float32) + b_out[...]
    out_ref[...] = out.astype(out_ref.dtype)


# ----------------------------------------------------------------------------
# Wrapper
# ----------------------------------------------------------------------------
def transformer_encoder_forward(x, params, *, day, n_heads=2):
    """x: (B, n) float array -> (B, m). Fused Pallas forward (recent=None path)."""
    B, n = x.shape
    w_pe = params["w_pe"]
    P, D = w_pe.shape
    assert n == day * P, "n must equal day * (n // day)"
    S = day
    m = params["w_out"].shape[1]
    n_blocks = len(params["blocks"])

    # batch tiling: whole batch in one grid step when small, else 8-sample tiles
    if B <= 32:
        BT, Bp = B, B
    else:
        BT = 8
        Bp = ((B + BT - 1) // BT) * BT

    x2 = x.reshape(B * S, P)                     # free row-major reshape, no copy
    if Bp != B:
        x2 = jnp.concatenate(
            [x2, jnp.zeros(((Bp - B) * S, P), x2.dtype)], axis=0)

    # positional embedding pre-tiled to one batch-tile worth of rows
    pos_block = jnp.tile(params["pos"].astype(jnp.float32), (BT, 1))     # (BT*S, D)

    flat_params = [params["w_pe"], params["b_pe"], pos_block]
    for blk in params["blocks"]:
        flat_params += [blk["ln1_g"], blk["ln1_b"], blk["w_qkv"], blk["b_qkv"],
                        blk["w_proj"], blk["b_proj"], blk["ln2_g"], blk["ln2_b"],
                        blk["w_fc1"], blk["b_fc1"], blk["w_fc2"], blk["b_fc2"]]
    flat_params += [params["w_out"], params["b_out"]]

    def const_spec(a):
        nd = a.ndim
        return pl.BlockSpec(a.shape, lambda i, _nd=nd: (0,) * _nd)

    in_specs = [pl.BlockSpec((BT * S, P), lambda i: (i, 0))]
    in_specs += [const_spec(a) for a in flat_params]

    kernel = functools.partial(_encoder_kernel, n_blocks=n_blocks,
                               n_heads=n_heads, seq=S)

    out = pl.pallas_call(
        kernel,
        out_shape=jax.ShapeDtypeStruct((Bp, m), jnp.float32),
        grid_spec=pltpu.PrefetchScalarGridSpec(
            num_scalar_prefetch=0,
            grid=(Bp // BT,),
            in_specs=in_specs,
            out_specs=pl.BlockSpec((BT, m), lambda i: (i, 0)),
            scratch_shapes=[
                pltpu.VMEM((BT * S, D), jnp.float32),   # attention head assembly
                pltpu.VMEM((BT, S * D), jnp.float32),   # flattened (b, s*d) activations
            ],
        ),
        compiler_params=pltpu.CompilerParams(
            dimension_semantics=("parallel",),          # independent batch tiles
        ),
    )(x2, *flat_params)

    return out[:B]


# ----------------------------------------------------------------------------
# Parameter construction (xavier-uniform weights; small random biases/LN params
# so the correctness check actually exercises every term)
# ----------------------------------------------------------------------------
def init_params(key, n, m, dim=(128, 128), day=5, n_heads=2, mlp_ratio=4):
    D = dim[0]
    P = n // day
    n_blocks = len(dim)
    Dm = D * mlp_ratio
    keys = iter(jax.random.split(key, 64))

    def xavier(fi, fo):
        lim = math.sqrt(6.0 / (fi + fo))
        return jax.random.uniform(next(keys), (fi, fo), jnp.float32, -lim, lim)

    def small(shape):
        return 0.1 * jax.random.normal(next(keys), shape, jnp.float32)

    params = {
        "w_pe": xavier(P, D),
        "b_pe": small((1, D)),
        "pos": jnp.asarray(get_2d_sincos_pos_embed(D, (day, 1))),   # (day, D), fixed
        "blocks": [],
        "w_out": xavier(day * D, m),
        "b_out": small((1, m)),
    }
    for _ in range(n_blocks):
        params["blocks"].append({
            "ln1_g": 1.0 + small((1, D)),
            "ln1_b": small((1, D)),
            "w_qkv": xavier(D, 3 * D),
            "b_qkv": small((1, 3 * D)),
            "w_proj": xavier(D, D),
            "b_proj": small((1, D)),
            "ln2_g": 1.0 + small((1, D)),
            "ln2_b": small((1, D)),
            "w_fc1": xavier(D, Dm),
            "b_fc1": small((1, Dm)),
            "w_fc2": xavier(Dm, D),
            "b_fc2": small((1, D)),
        })
    return params


# ----------------------------------------------------------------------------
# Pure-JAX reference (same math, same GELU approximation / LN eps)
# ----------------------------------------------------------------------------
def transformer_encoder_ref(x, params, *, day, n_heads=2):
    B, _ = x.shape
    P, D = params["w_pe"].shape
    S = day
    dh = D // n_heads
    hp = jax.lax.Precision.HIGHEST

    h = x.reshape(B, S, P)
    h = jnp.einsum("bsp,pd->bsd", h, params["w_pe"], precision=hp) + params["b_pe"]
    h = h + params["pos"][None, :, :]
    for blk in params["blocks"]:
        hn = _layer_norm(h, blk["ln1_g"], blk["ln1_b"])
        qkv = jnp.einsum("bsd,de->bse", hn, blk["w_qkv"], precision=hp) + blk["b_qkv"]
        q = qkv[..., :D].reshape(B, S, n_heads, dh)
        k = qkv[..., D:2 * D].reshape(B, S, n_heads, dh)
        v = qkv[..., 2 * D:].reshape(B, S, n_heads, dh)
        att = jnp.einsum("bqhd,bkhd->bhqk", q, k, precision=hp) / math.sqrt(dh)
        att = jax.nn.softmax(att, axis=-1)
        o = jnp.einsum("bhqk,bkhd->bqhd", att, v, precision=hp).reshape(B, S, D)
        h = h + jnp.einsum("bsd,de->bse", o, blk["w_proj"], precision=hp) + blk["b_proj"]
        hn = _layer_norm(h, blk["ln2_g"], blk["ln2_b"])
        z = jnp.einsum("bsd,de->bse", hn, blk["w_fc1"], precision=hp) + blk["b_fc1"]
        z = _gelu_tanh(z)
        z = jnp.einsum("bsd,de->bse", z, blk["w_fc2"], precision=hp) + blk["b_fc2"]
        h = h + z
    flat = h.reshape(B, S * D)
    return jnp.einsum("bf,fm->bm", flat, params["w_out"], precision=hp) + params["b_out"]


if __name__ == "__main__":
    key = jax.random.PRNGKey(0)

    # Small shapes consistent with the module:
    #   day=5 "patches", patch dim n//day=8 (n=40), embed dim dim[0]=128,
    #   len(dim)=2 transformer blocks, 2 heads, output m=32, batch=2.
    B, day, P, m = 2, 5, 8, 32
    n = day * P
    dim = (128, 128)
    n_heads = 2

    kp, kx = jax.random.split(key)
    params = init_params(kp, n, m, dim=dim, day=day, n_heads=n_heads)
    x = jax.random.normal(kx, (B, n), dtype=jnp.float32)

    out = transformer_encoder_forward(x, params, day=day, n_heads=n_heads)
    out = jax.block_until_ready(out)

    ref = jax.block_until_ready(
        transformer_encoder_ref(x, params, day=day, n_heads=n_heads))

    assert out.shape == (B, m)
    assert jnp.allclose(out, ref, rtol=2e-2, atol=2e-2), float(
        jnp.max(jnp.abs(out - ref)))

    print("KERNEL_OK")
</pallas_src>

<mosaic_0001>
module attributes {stable_mosaic.version = 11 : i64} {
  func.func @_encoder_kernel(%arg0: i32, %arg1: memref<10x8xf32, #tpu.memory_space<vmem>>, %arg2: memref<8x128xf32, #tpu.memory_space<vmem>>, %arg3: memref<1x128xf32, #tpu.memory_space<vmem>>, %arg4: memref<10x128xf32, #tpu.memory_space<vmem>>, %arg5: memref<1x128xf32, #tpu.memory_space<vmem>>, %arg6: memref<1x128xf32, #tpu.memory_space<vmem>>, %arg7: memref<128x384xf32, #tpu.memory_space<vmem>>, %arg8: memref<1x384xf32, #tpu.memory_space<vmem>>, %arg9: memref<128x128xf32, #tpu.memory_space<vmem>>, %arg10: memref<1x128xf32, #tpu.memory_space<vmem>>, %arg11: memref<1x128xf32, #tpu.memory_space<vmem>>, %arg12: memref<1x128xf32, #tpu.memory_space<vmem>>, %arg13: memref<128x512xf32, #tpu.memory_space<vmem>>, %arg14: memref<1x512xf32, #tpu.memory_space<vmem>>, %arg15: memref<512x128xf32, #tpu.memory_space<vmem>>, %arg16: memref<1x128xf32, #tpu.memory_space<vmem>>, %arg17: memref<1x128xf32, #tpu.memory_space<vmem>>, %arg18: memref<1x128xf32, #tpu.memory_space<vmem>>, %arg19: memref<128x384xf32, #tpu.memory_space<vmem>>, %arg20: memref<1x384xf32, #tpu.memory_space<vmem>>, %arg21: memref<128x128xf32, #tpu.memory_space<vmem>>, %arg22: memref<1x128xf32, #tpu.memory_space<vmem>>, %arg23: memref<1x128xf32, #tpu.memory_space<vmem>>, %arg24: memref<1x128xf32, #tpu.memory_space<vmem>>, %arg25: memref<128x512xf32, #tpu.memory_space<vmem>>, %arg26: memref<1x512xf32, #tpu.memory_space<vmem>>, %arg27: memref<512x128xf32, #tpu.memory_space<vmem>>, %arg28: memref<1x128xf32, #tpu.memory_space<vmem>>, %arg29: memref<640x32xf32, #tpu.memory_space<vmem>>, %arg30: memref<1x32xf32, #tpu.memory_space<vmem>>, %arg31: memref<2x32xf32, #tpu.memory_space<vmem>>, %arg32: memref<10x128xf32, #tpu.memory_space<vmem>>, %arg33: memref<2x640xf32, #tpu.memory_space<vmem>>) attributes {dimension_semantics = [#tpu.dimension_semantics<parallel>], iteration_bounds = array<i64: 1>, scalar_prefetch = 0 : i64, scratch_operands = 2 : i64, tpu.core_type = #tpu.core_type<tc>, window_params = [{transform_indices = @transform_0, window_bounds = array<i64: 10, 8>}, {pipeline_mode = #tpu.pipeline_mode<synchronous>, transform_indices = @transform_1, window_bounds = array<i64: 8, 128>}, {pipeline_mode = #tpu.pipeline_mode<synchronous>, transform_indices = @transform_2, window_bounds = array<i64: 1, 128>}, {pipeline_mode = #tpu.pipeline_mode<synchronous>, transform_indices = @transform_3, window_bounds = array<i64: 10, 128>}, {pipeline_mode = #tpu.pipeline_mode<synchronous>, transform_indices = @transform_4, window_bounds = array<i64: 1, 128>}, {pipeline_mode = #tpu.pipeline_mode<synchronous>, transform_indices = @transform_5, window_bounds = array<i64: 1, 128>}, {pipeline_mode = #tpu.pipeline_mode<synchronous>, transform_indices = @transform_6, window_bounds = array<i64: 128, 384>}, {pipeline_mode = #tpu.pipeline_mode<synchronous>, transform_indices = @transform_7, window_bounds = array<i64: 1, 384>}, {pipeline_mode = #tpu.pipeline_mode<synchronous>, transform_indices = @transform_8, window_bounds = array<i64: 128, 128>}, {pipeline_mode = #tpu.pipeline_mode<synchronous>, transform_indices = @transform_9, window_bounds = array<i64: 1, 128>}, {pipeline_mode = #tpu.pipeline_mode<synchronous>, transform_indices = @transform_10, window_bounds = array<i64: 1, 128>}, {pipeline_mode = #tpu.pipeline_mode<synchronous>, transform_indices = @transform_11, window_bounds = array<i64: 1, 128>}, {pipeline_mode = #tpu.pipeline_mode<synchronous>, transform_indices = @transform_12, window_bounds = array<i64: 128, 512>}, {pipeline_mode = #tpu.pipeline_mode<synchronous>, transform_indices = @transform_13, window_bounds = array<i64: 1, 512>}, {pipeline_mode = #tpu.pipeline_mode<synchronous>, transform_indices = @transform_14, window_bounds = array<i64: 512, 128>}, {pipeline_mode = #tpu.pipeline_mode<synchronous>, transform_indices = @transform_15, window_bounds = array<i64: 1, 128>}, {pipeline_mode = #tpu.pipeline_mode<synchronous>, transform_indices = @transform_16, window_bounds = array<i64: 1, 128>}, {pipeline_mode = #tpu.pipeline_mode<synchronous>, transform_indices = @transform_17, window_bounds = array<i64: 1, 128>}, {pipeline_mode = #tpu.pipeline_mode<synchronous>, transform_indices = @transform_18, window_bounds = array<i64: 128, 384>}, {pipeline_mode = #tpu.pipeline_mode<synchronous>, transform_indices = @transform_19, window_bounds = array<i64: 1, 384>}, {pipeline_mode = #tpu.pipeline_mode<synchronous>, transform_indices = @transform_20, window_bounds = array<i64: 128, 128>}, {pipeline_mode = #tpu.pipeline_mode<synchronous>, transform_indices = @transform_21, window_bounds = array<i64: 1, 128>}, {pipeline_mode = #tpu.pipeline_mode<synchronous>, transform_indices = @transform_22, window_bounds = array<i64: 1, 128>}, {pipeline_mode = #tpu.pipeline_mode<synchronous>, transform_indices = @transform_23, window_bounds = array<i64: 1, 128>}, {pipeline_mode = #tpu.pipeline_mode<synchronous>, transform_indices = @transform_24, window_bounds = array<i64: 128, 512>}, {pipeline_mode = #tpu.pipeline_mode<synchronous>, transform_indices = @transform_25, window_bounds = array<i64: 1, 512>}, {pipeline_mode = #tpu.pipeline_mode<synchronous>, transform_indices = @transform_26, window_bounds = array<i64: 512, 128>}, {pipeline_mode = #tpu.pipeline_mode<synchronous>, transform_indices = @transform_27, window_bounds = array<i64: 1, 128>}, {pipeline_mode = #tpu.pipeline_mode<synchronous>, transform_indices = @transform_28, window_bounds = array<i64: 640, 32>}, {pipeline_mode = #tpu.pipeline_mode<synchronous>, transform_indices = @transform_29, window_bounds = array<i64: 1, 32>}, {transform_indices = @transform_30, window_bounds = array<i64: 2, 32>}]} {
    %c0 = arith.constant 0 : index
    %c0_0 = arith.constant 0 : index
    %0 = vector.load %arg1[%c0, %c0_0] : memref<10x8xf32, #tpu.memory_space<vmem>>, vector<10x8xf32>
    %c0_1 = arith.constant 0 : index
    %c0_2 = arith.constant 0 : index
    %1 = vector.load %arg2[%c0_1, %c0_2] : memref<8x128xf32, #tpu.memory_space<vmem>>, vector<8x128xf32>
    %cst = arith.constant dense<0.000000e+00> : vector<10x128xf32>
    %2 = tpu.matmul %0, %1, %cst {dimension_numbers = #tpu.dot_dimension_numbers<[1], [0], [0], [1], [0, 0, 1, 1], [], []>} : vector<10x8xf32>, vector<8x128xf32>, vector<10x128xf32> -> vector<10x128xf32>
    %c0_3 = arith.constant 0 : index
    %c0_4 = arith.constant 0 : index
    %3 = vector.load %arg3[%c0_3, %c0_4] : memref<1x128xf32, #tpu.memory_space<vmem>>, vector<1x128xf32>
    %4 = vector.broadcast %3 : vector<1x128xf32> to vector<10x128xf32>
    %5 = arith.addf %2, %4 : vector<10x128xf32>
    %c0_5 = arith.constant 0 : index
    %c0_6 = arith.constant 0 : index
    %6 = vector.load %arg4[%c0_5, %c0_6] : memref<10x128xf32, #tpu.memory_space<vmem>>, vector<10x128xf32>
    %7 = arith.addf %5, %6 : vector<10x128xf32>
    %c0_7 = arith.constant 0 : index
    %c0_8 = arith.constant 0 : index
    %8 = vector.load %arg5[%c0_7, %c0_8] : memref<1x128xf32, #tpu.memory_space<vmem>>, vector<1x128xf32>
    %c0_9 = arith.constant 0 : index
    %c0_10 = arith.constant 0 : index
    %9 = vector.load %arg6[%c0_9, %c0_10] : memref<1x128xf32, #tpu.memory_space<vmem>>, vector<1x128xf32>
    %cst_11 = arith.constant dense<0.000000e+00> : vector<10xf32>
    %10 = vector.multi_reduction <add>, %7, %cst_11 [1] : vector<10x128xf32> to vector<10xf32>
    %11 = vector.shape_cast %10 : vector<10xf32> to vector<10x1xf32>
    %cst_12 = arith.constant 1.280000e+02 : f32
    %12 = vector.broadcast %cst_12 : f32 to vector<10x1xf32>
    %13 = arith.divf %11, %12 : vector<10x1xf32>
    %14 = vector.broadcast %13 : vector<10x1xf32> to vector<10x128xf32>
    %15 = arith.subf %7, %14 : vector<10x128xf32>
    %16 = arith.mulf %15, %15 : vector<10x128xf32>
    %cst_13 = arith.constant dense<0.000000e+00> : vector<10xf32>
    %17 = vector.multi_reduction <add>, %16, %cst_13 [1] : vector<10x128xf32> to vector<10xf32>
    %18 = vector.shape_cast %17 : vector<10xf32> to vector<10x1xf32>
    %cst_14 = arith.constant 1.280000e+02 : f32
    %19 = vector.broadcast %cst_14 : f32 to vector<10x1xf32>
    %20 = arith.divf %18, %19 : vector<10x1xf32>
    %cst_15 = arith.constant 9.99999974E-6 : f32
    %21 = vector.broadcast %cst_15 : f32 to vector<10x1xf32>
    %22 = arith.addf %20, %21 : vector<10x1xf32>
    %23 = math.rsqrt %22 : vector<10x1xf32>
    %24 = vector.broadcast %23 : vector<10x1xf32> to vector<10x128xf32>
    %25 = arith.mulf %15, %24 : vector<10x128xf32>
    %26 = vector.broadcast %8 : vector<1x128xf32> to vector<10x128xf32>
    %27 = arith.mulf %25, %26 : vector<10x128xf32>
    %28 = vector.broadcast %9 : vector<1x128xf32> to vector<10x128xf32>
    %29 = arith.addf %27, %28 : vector<10x128xf32>
    %c0_16 = arith.constant 0 : index
    %c0_17 = arith.constant 0 : index
    %30 = vector.load %arg7[%c0_16, %c0_17] : memref<128x384xf32, #tpu.memory_space<vmem>>, vector<128x384xf32>
    %cst_18 = arith.constant dense<0.000000e+00> : vector<10x384xf32>
    %31 = tpu.matmul %29, %30, %cst_18 {dimension_numbers = #tpu.dot_dimension_numbers<[1], [0], [0], [1], [0, 0, 1, 1], [], []>} : vector<10x128xf32>, vector<128x384xf32>, vector<10x384xf32> -> vector<10x384xf32>
    %c0_19 = arith.constant 0 : index
    %c0_20 = arith.constant 0 : index
    %32 = vector.load %arg8[%c0_19, %c0_20] : memref<1x384xf32, #tpu.memory_space<vmem>>, vector<1x384xf32>
    %33 = vector.broadcast %32 : vector<1x384xf32> to vector<10x384xf32>
    %34 = arith.addf %31, %33 : vector<10x384xf32>
    %35 = vector.extract_strided_slice %34 {offsets = [0, 0], sizes = [5, 64], strides = [1, 1]} : vector<10x384xf32> to vector<5x64xf32>
    %36 = vector.extract_strided_slice %34 {offsets = [0, 128], sizes = [5, 64], strides = [1, 1]} : vector<10x384xf32> to vector<5x64xf32>
    %37 = vector.extract_strided_slice %34 {offsets = [0, 256], sizes = [5, 64], strides = [1, 1]} : vector<10x384xf32> to vector<5x64xf32>
    %cst_21 = arith.constant dense<0.000000e+00> : vector<5x5xf32>
    %38 = tpu.matmul %35, %36, %cst_21 {dimension_numbers = #tpu.dot_dimension_numbers<[1], [1], [0], [0], [0, 0, 1, 0], [], []>} : vector<5x64xf32>, vector<5x64xf32>, vector<5x5xf32> -> vector<5x5xf32>
    %cst_22 = arith.constant 1.250000e-01 : f32
    %39 = vector.broadcast %cst_22 : f32 to vector<5x5xf32>
    %40 = arith.mulf %38, %39 : vector<5x5xf32>
    %cst_23 = arith.constant dense<0xFF800000> : vector<5xf32>
    %41 = vector.multi_reduction <maximumf>, %40, %cst_23 [1] : vector<5x5xf32> to vector<5xf32>
    %42 = vector.shape_cast %41 : vector<5xf32> to vector<5x1xf32>
    %43 = vector.broadcast %42 : vector<5x1xf32> to vector<5x5xf32>
    %44 = arith.subf %40, %43 : vector<5x5xf32>
    %45 = math.exp %44 : vector<5x5xf32>
    %cst_24 = arith.constant dense<0.000000e+00> : vector<5xf32>
    %46 = vector.multi_reduction <add>, %45, %cst_24 [1] : vector<5x5xf32> to vector<5xf32>
    %47 = vector.shape_cast %46 : vector<5xf32> to vector<5x1xf32>
    %48 = vector.broadcast %47 : vector<5x1xf32> to vector<5x5xf32>
    %49 = arith.divf %45, %48 : vector<5x5xf32>
    %cst_25 = arith.constant dense<0.000000e+00> : vector<5x64xf32>
    %50 = tpu.matmul %49, %37, %cst_25 {dimension_numbers = #tpu.dot_dimension_numbers<[1], [0], [0], [1], [0, 0, 1, 1], [], []>} : vector<5x5xf32>, vector<5x64xf32>, vector<5x64xf32> -> vector<5x64xf32>
    %c0_26 = arith.constant 0 : index
    %c0_27 = arith.constant 0 : index
    %51 = vector.load %arg32[%c0_26, %c0_27] : memref<10x128xf32, #tpu.memory_space<vmem>>, vector<5x64xf32>
    tpu.vector_store %arg32[%c0_26, %c0_27], %50 {strides = array<i32>} : memref<10x128xf32, #tpu.memory_space<vmem>>, vector<5x64xf32>,
    %52 = vector.extract_strided_slice %34 {offsets = [0, 64], sizes = [5, 64], strides = [1, 1]} : vector<10x384xf32> to vector<5x64xf32>
    %53 = vector.extract_strided_slice %34 {offsets = [0, 192], sizes = [5, 64], strides = [1, 1]} : vector<10x384xf32> to vector<5x64xf32>
    %54 = vector.extract_strided_slice %34 {offsets = [0, 320], sizes = [5, 64], strides = [1, 1]} : vector<10x384xf32> to vector<5x64xf32>
    %cst_28 = arith.constant dense<0.000000e+00> : vector<5x5xf32>
    %55 = tpu.matmul %52, %53, %cst_28 {dimension_numbers = #tpu.dot_dimension_numbers<[1], [1], [0], [0], [0, 0, 1, 0], [], []>} : vector<5x64xf32>, vector<5x64xf32>, vector<5x5xf32> -> vector<5x5xf32>
    %cst_29 = arith.constant 1.250000e-01 : f32
    %56 = vector.broadcast %cst_29 : f32 to vector<5x5xf32>
    %57 = arith.mulf %55, %56 : vector<5x5xf32>
    %cst_30 = arith.constant dense<0xFF800000> : vector<5xf32>
    %58 = vector.multi_reduction <maximumf>, %57, %cst_30 [1] : vector<5x5xf32> to vector<5xf32>
    %59 = vector.shape_cast %58 : vector<5xf32> to vector<5x1xf32>
    %60 = vector.broadcast %59 : vector<5x1xf32> to vector<5x5xf32>
    %61 = arith.subf %57, %60 : vector<5x5xf32>
    %62 = math.exp %61 : vector<5x5xf32>
    %cst_31 = arith.constant dense<0.000000e+00> : vector<5xf32>
    %63 = vector.multi_reduction <add>, %62, %cst_31 [1] : vector<5x5xf32> to vector<5xf32>
    %64 = vector.shape_cast %63 : vector<5xf32> to vector<5x1xf32>
    %65 = vector.broadcast %64 : vector<5x1xf32> to vector<5x5xf32>
    %66 = arith.divf %62, %65 : vector<5x5xf32>
    %cst_32 = arith.constant dense<0.000000e+00> : vector<5x64xf32>
    %67 = tpu.matmul %66, %54, %cst_32 {dimension_numbers = #tpu.dot_dimension_numbers<[1], [0], [0], [1], [0, 0, 1, 1], [], []>} : vector<5x5xf32>, vector<5x64xf32>, vector<5x64xf32> -> vector<5x64xf32>
    %c0_33 = arith.constant 0 : index
    %c64 = arith.constant 64 : index
    %68 = vector.load %arg32[%c0_33, %c64] : memref<10x128xf32, #tpu.memory_space<vmem>>, vector<5x64xf32>
    tpu.vector_store %arg32[%c0_33, %c64], %67 {strides = array<i32>} : memref<10x128xf32, #tpu.memory_space<vmem>>, vector<5x64xf32>,
    %69 = vector.extract_strided_slice %34 {offsets = [5, 0], sizes = [5, 64], strides = [1, 1]} : vector<10x384xf32> to vector<5x64xf32>
    %70 = vector.extract_strided_slice %34 {offsets = [5, 128], sizes = [5, 64], strides = [1, 1]} : vector<10x384xf32> to vector<5x64xf32>
    %71 = vector.extract_strided_slice %34 {offsets = [5, 256], sizes = [5, 64], strides = [1, 1]} : vector<10x384xf32> to vector<5x64xf32>
    %cst_34 = arith.constant dense<0.000000e+00> : vector<5x5xf32>
    %72 = tpu.matmul %69, %70, %cst_34 {dimension_numbers = #tpu.dot_dimension_numbers<[1], [1], [0], [0], [0, 0, 1, 0], [], []>} : vector<5x64xf32>, vector<5x64xf32>, vector<5x5xf32> -> vector<5x5xf32>
    %cst_35 = arith.constant 1.250000e-01 : f32
    %73 = vector.broadcast %cst_35 : f32 to vector<5x5xf32>
    %74 = arith.mulf %72, %73 : vector<5x5xf32>
    %cst_36 = arith.constant dense<0xFF800000> : vector<5xf32>
    %75 = vector.multi_reduction <maximumf>, %74, %cst_36 [1] : vector<5x5xf32> to vector<5xf32>
    %76 = vector.shape_cast %75 : vector<5xf32> to vector<5x1xf32>
    %77 = vector.broadcast %76 : vector<5x1xf32> to vector<5x5xf32>
    %78 = arith.subf %74, %77 : vector<5x5xf32>
    %79 = math.exp %78 : vector<5x5xf32>
    %cst_37 = arith.constant dense<0.000000e+00> : vector<5xf32>
    %80 = vector.multi_reduction <add>, %79, %cst_37 [1] : vector<5x5xf32> to vector<5xf32>
    %81 = vector.shape_cast %80 : vector<5xf32> to vector<5x1xf32>
    %82 = vector.broadcast %81 : vector<5x1xf32> to vector<5x5xf32>
    %83 = arith.divf %79, %82 : vector<5x5xf32>
    %cst_38 = arith.constant dense<0.000000e+00> : vector<5x64xf32>
    %84 = tpu.matmul %83, %71, %cst_38 {dimension_numbers = #tpu.dot_dimension_numbers<[1], [0], [0], [1], [0, 0, 1, 1], [], []>} : vector<5x5xf32>, vector<5x64xf32>, vector<5x64xf32> -> vector<5x64xf32>
    %c5 = arith.constant 5 : index
    %c0_39 = arith.constant 0 : index
    %85 = vector.load %arg32[%c5, %c0_39] : memref<10x128xf32, #tpu.memory_space<vmem>>, vector<5x64xf32>
    tpu.vector_store %arg32[%c5, %c0_39], %84 {strides = array<i32>} : memref<10x128xf32, #tpu.memory_space<vmem>>, vector<5x64xf32>,
    %86 = vector.extract_strided_slice %34 {offsets = [5, 64], sizes = [5, 64], strides = [1, 1]} : vector<10x384xf32> to vector<5x64xf32>
    %87 = vector.extract_strided_slice %34 {offsets = [5, 192], sizes = [5, 64], strides = [1, 1]} : vector<10x384xf32> to vector<5x64xf32>
    %88 = vector.extract_strided_slice %34 {offsets = [5, 320], sizes = [5, 64], strides = [1, 1]} : vector<10x384xf32> to vector<5x64xf32>
    %cst_40 = arith.constant dense<0.000000e+00> : vector<5x5xf32>
    %89 = tpu.matmul %86, %87, %cst_40 {dimension_numbers = #tpu.dot_dimension_numbers<[1], [1], [0], [0], [0, 0, 1, 0], [], []>} : vector<5x64xf32>, vector<5x64xf32>, vector<5x5xf32> -> vector<5x5xf32>
    %cst_41 = arith.constant 1.250000e-01 : f32
    %90 = vector.broadcast %cst_41 : f32 to vector<5x5xf32>
    %91 = arith.mulf %89, %90 : vector<5x5xf32>
    %cst_42 = arith.constant dense<0xFF800000> : vector<5xf32>
    %92 = vector.multi_reduction <maximumf>, %91, %cst_42 [1] : vector<5x5xf32> to vector<5xf32>
    %93 = vector.shape_cast %92 : vector<5xf32> to vector<5x1xf32>
    %94 = vector.broadcast %93 : vector<5x1xf32> to vector<5x5xf32>
    %95 = arith.subf %91, %94 : vector<5x5xf32>
    %96 = math.exp %95 : vector<5x5xf32>
    %cst_43 = arith.constant dense<0.000000e+00> : vector<5xf32>
    %97 = vector.multi_reduction <add>, %96, %cst_43 [1] : vector<5x5xf32> to vector<5xf32>
    %98 = vector.shape_cast %97 : vector<5xf32> to vector<5x1xf32>
    %99 = vector.broadcast %98 : vector<5x1xf32> to vector<5x5xf32>
    %100 = arith.divf %96, %99 : vector<5x5xf32>
    %cst_44 = arith.constant dense<0.000000e+00> : vector<5x64xf32>
    %101 = tpu.matmul %100, %88, %cst_44 {dimension_numbers = #tpu.dot_dimension_numbers<[1], [0], [0], [1], [0, 0, 1, 1], [], []>} : vector<5x5xf32>, vector<5x64xf32>, vector<5x64xf32> -> vector<5x64xf32>
    %c5_45 = arith.constant 5 : index
    %c64_46 = arith.constant 64 : index
    %102 = vector.load %arg32[%c5_45, %c64_46] : memref<10x128xf32, #tpu.memory_space<vmem>>, vector<5x64xf32>
    tpu.vector_store %arg32[%c5_45, %c64_46], %101 {strides = array<i32>} : memref<10x128xf32, #tpu.memory_space<vmem>>, vector<5x64xf32>,
    %c0_47 = arith.constant 0 : index
    %c0_48 = arith.constant 0 : index
    %103 = vector.load %arg32[%c0_47, %c0_48] : memref<10x128xf32, #tpu.memory_space<vmem>>, vector<10x128xf32>
    %c0_49 = arith.constant 0 : index
    %c0_50 = arith.constant 0 : index
    %104 = vector.load %arg9[%c0_49, %c0_50] : memref<128x128xf32, #tpu.memory_space<vmem>>, vector<128x128xf32>
    %cst_51 = arith.constant dense<0.000000e+00> : vector<10x128xf32>
    %105 = tpu.matmul %103, %104, %cst_51 {dimension_numbers = #tpu.dot_dimension_numbers<[1], [0], [0], [1], [0, 0, 1, 1], [], []>} : vector<10x128xf32>, vector<128x128xf32>, vector<10x128xf32> -> vector<10x128xf32>
    %c0_52 = arith.constant 0 : index
    %c0_53 = arith.constant 0 : index
    %106 = vector.load %arg10[%c0_52, %c0_53] : memref<1x128xf32, #tpu.memory_space<vmem>>, vector<1x128xf32>
    %107 = vector.broadcast %106 : vector<1x128xf32> to vector<10x128xf32>
    %108 = arith.addf %105, %107 : vector<10x128xf32>
    %109 = arith.addf %7, %108 : vector<10x128xf32>
    %c0_54 = arith.constant 0 : index
    %c0_55 = arith.constant 0 : index
    %110 = vector.load %arg11[%c0_54, %c0_55] : memref<1x128xf32, #tpu.memory_space<vmem>>, vector<1x128xf32>
    %c0_56 = arith.constant 0 : index
    %c0_57 = arith.constant 0 : index
    %111 = vector.load %arg12[%c0_56, %c0_57] : memref<1x128xf32, #tpu.memory_space<vmem>>, vector<1x128xf32>
    %cst_58 = arith.constant dense<0.000000e+00> : vector<10xf32>
    %112 = vector.multi_reduction <add>, %109, %cst_58 [1] : vector<10x128xf32> to vector<10xf32>
    %113 = vector.shape_cast %112 : vector<10xf32> to vector<10x1xf32>
    %cst_59 = arith.constant 1.280000e+02 : f32
    %114 = vector.broadcast %cst_59 : f32 to vector<10x1xf32>
    %115 = arith.divf %113, %114 : vector<10x1xf32>
    %116 = vector.broadcast %115 : vector<10x1xf32> to vector<10x128xf32>
    %117 = arith.subf %109, %116 : vector<10x128xf32>
    %118 = arith.mulf %117, %117 : vector<10x128xf32>
    %cst_60 = arith.constant dense<0.000000e+00> : vector<10xf32>
    %119 = vector.multi_reduction <add>, %118, %cst_60 [1] : vector<10x128xf32> to vector<10xf32>
    %120 = vector.shape_cast %119 : vector<10xf32> to vector<10x1xf32>
    %cst_61 = arith.constant 1.280000e+02 : f32
    %121 = vector.broadcast %cst_61 : f32 to vector<10x1xf32>
    %122 = arith.divf %120, %121 : vector<10x1xf32>
    %cst_62 = arith.constant 9.99999974E-6 : f32
    %123 = vector.broadcast %cst_62 : f32 to vector<10x1xf32>
    %124 = arith.addf %122, %123 : vector<10x1xf32>
    %125 = math.rsqrt %124 : vector<10x1xf32>
    %126 = vector.broadcast %125 : vector<10x1xf32> to vector<10x128xf32>
    %127 = arith.mulf %117, %126 : vector<10x128xf32>
    %128 = vector.broadcast %110 : vector<1x128xf32> to vector<10x128xf32>
    %129 = arith.mulf %127, %128 : vector<10x128xf32>
    %130 = vector.broadcast %111 : vector<1x128xf32> to vector<10x128xf32>
    %131 = arith.addf %129, %130 : vector<10x128xf32>
    %c0_63 = arith.constant 0 : index
    %c0_64 = arith.constant 0 : index
    %132 = vector.load %arg13[%c0_63, %c0_64] : memref<128x512xf32, #tpu.memory_space<vmem>>, vector<128x512xf32>
    %cst_65 = arith.constant dense<0.000000e+00> : vector<10x512xf32>
    %133 = tpu.matmul %131, %132, %cst_65 {dimension_numbers = #tpu.dot_dimension_numbers<[1], [0], [0], [1], [0, 0, 1, 1], [], []>} : vector<10x128xf32>, vector<128x512xf32>, vector<10x512xf32> -> vector<10x512xf32>
    %c0_66 = arith.constant 0 : index
    %c0_67 = arith.constant 0 : index
    %134 = vector.load %arg14[%c0_66, %c0_67] : memref<1x512xf32, #tpu.memory_space<vmem>>, vector<1x512xf32>
    %135 = vector.broadcast %134 : vector<1x512xf32> to vector<10x512xf32>
    %136 = arith.addf %133, %135 : vector<10x512xf32>
    %cst_68 = arith.constant 5.000000e-01 : f32
    %137 = vector.broadcast %cst_68 : f32 to vector<10x512xf32>
    %138 = arith.mulf %137, %136 : vector<10x512xf32>
    %cst_69 = arith.constant 4.471500e-02 : f32
    %139 = vector.broadcast %cst_69 : f32 to vector<10x512xf32>
    %140 = arith.mulf %139, %136 : vector<10x512xf32>
    %141 = arith.mulf %140, %136 : vector<10x512xf32>
    %142 = arith.mulf %141, %136 : vector<10x512xf32>
    %143 = arith.addf %136, %142 : vector<10x512xf32>
    %cst_70 = arith.constant 0.797884583 : f32
    %144 = vector.broadcast %cst_70 : f32 to vector<10x512xf32>
    %145 = arith.mulf %144, %143 : vector<10x512xf32>
    %146 = math.tanh %145 : vector<10x512xf32>
    %cst_71 = arith.constant 1.000000e+00 : f32
    %147 = vector.broadcast %cst_71 : f32 to vector<10x512xf32>
    %148 = arith.addf %147, %146 : vector<10x512xf32>
    %149 = arith.mulf %138, %148 : vector<10x512xf32>
    %c0_72 = arith.constant 0 : index
    %c0_73 = arith.constant 0 : index
    %150 = vector.load %arg15[%c0_72, %c0_73] : memref<512x128xf32, #tpu.memory_space<vmem>>, vector<512x128xf32>
    %cst_74 = arith.constant dense<0.000000e+00> : vector<10x128xf32>
    %151 = tpu.matmul %149, %150, %cst_74 {dimension_numbers = #tpu.dot_dimension_numbers<[1], [0], [0], [1], [0, 0, 1, 1], [], []>} : vector<10x512xf32>, vector<512x128xf32>, vector<10x128xf32> -> vector<10x128xf32>
    %c0_75 = arith.constant 0 : index
    %c0_76 = arith.constant 0 : index
    %152 = vector.load %arg16[%c0_75, %c0_76] : memref<1x128xf32, #tpu.memory_space<vmem>>, vector<1x128xf32>
    %153 = vector.broadcast %152 : vector<1x128xf32> to vector<10x128xf32>
    %154 = arith.addf %151, %153 : vector<10x128xf32>
    %155 = arith.addf %109, %154 : vector<10x128xf32>
    %c0_77 = arith.constant 0 : index
    %c0_78 = arith.constant 0 : index
    %156 = vector.load %arg17[%c0_77, %c0_78] : memref<1x128xf32, #tpu.memory_space<vmem>>, vector<1x128xf32>
    %c0_79 = arith.constant 0 : index
    %c0_80 = arith.constant 0 : index
    %157 = vector.load %arg18[%c0_79, %c0_80] : memref<1x128xf32, #tpu.memory_space<vmem>>, vector<1x128xf32>
    %cst_81 = arith.constant dense<0.000000e+00> : vector<10xf32>
    %158 = vector.multi_reduction <add>, %155, %cst_81 [1] : vector<10x128xf32> to vector<10xf32>
    %159 = vector.shape_cast %158 : vector<10xf32> to vector<10x1xf32>
    %cst_82 = arith.constant 1.280000e+02 : f32
    %160 = vector.broadcast %cst_82 : f32 to vector<10x1xf32>
    %161 = arith.divf %159, %160 : vector<10x1xf32>
    %162 = vector.broadcast %161 : vector<10x1xf32> to vector<10x128xf32>
    %163 = arith.subf %155, %162 : vector<10x128xf32>
    %164 = arith.mulf %163, %163 : vector<10x128xf32>
    %cst_83 = arith.constant dense<0.000000e+00> : vector<10xf32>
    %165 = vector.multi_reduction <add>, %164, %cst_83 [1] : vector<10x128xf32> to vector<10xf32>
    %166 = vector.shape_cast %165 : vector<10xf32> to vector<10x1xf32>
    %cst_84 = arith.constant 1.280000e+02 : f32
    %167 = vector.broadcast %cst_84 : f32 to vector<10x1xf32>
    %168 = arith.divf %166, %167 : vector<10x1xf32>
    %cst_85 = arith.constant 9.99999974E-6 : f32
    %169 = vector.broadcast %cst_85 : f32 to vector<10x1xf32>
    %170 = arith.addf %168, %169 : vector<10x1xf32>
    %171 = math.rsqrt %170 : vector<10x1xf32>
    %172 = vector.broadcast %171 : vector<10x1xf32> to vector<10x128xf32>
    %173 = arith.mulf %163, %172 : vector<10x128xf32>
    %174 = vector.broadcast %156 : vector<1x128xf32> to vector<10x128xf32>
    %175 = arith.mulf %173, %174 : vector<10x128xf32>
    %176 = vector.broadcast %157 : vector<1x128xf32> to vector<10x128xf32>
    %177 = arith.addf %175, %176 : vector<10x128xf32>
    %c0_86 = arith.constant 0 : index
    %c0_87 = arith.constant 0 : index
    %178 = vector.load %arg19[%c0_86, %c0_87] : memref<128x384xf32, #tpu.memory_space<vmem>>, vector<128x384xf32>
    %cst_88 = arith.constant dense<0.000000e+00> : vector<10x384xf32>
    %179 = tpu.matmul %177, %178, %cst_88 {dimension_numbers = #tpu.dot_dimension_numbers<[1], [0], [0], [1], [0, 0, 1, 1], [], []>} : vector<10x128xf32>, vector<128x384xf32>, vector<10x384xf32> -> vector<10x384xf32>
    %c0_89 = arith.constant 0 : index
    %c0_90 = arith.constant 0 : index
    %180 = vector.load %arg20[%c0_89, %c0_90] : memref<1x384xf32, #tpu.memory_space<vmem>>, vector<1x384xf32>
    %181 = vector.broadcast %180 : vector<1x384xf32> to vector<10x384xf32>
    %182 = arith.addf %179, %181 : vector<10x384xf32>
    %183 = vector.extract_strided_slice %182 {offsets = [0, 0], sizes = [5, 64], strides = [1, 1]} : vector<10x384xf32> to vector<5x64xf32>
    %184 = vector.extract_strided_slice %182 {offsets = [0, 128], sizes = [5, 64], strides = [1, 1]} : vector<10x384xf32> to vector<5x64xf32>
    %185 = vector.extract_strided_slice %182 {offsets = [0, 256], sizes = [5, 64], strides = [1, 1]} : vector<10x384xf32> to vector<5x64xf32>
    %cst_91 = arith.constant dense<0.000000e+00> : vector<5x5xf32>
    %186 = tpu.matmul %183, %184, %cst_91 {dimension_numbers = #tpu.dot_dimension_numbers<[1], [1], [0], [0], [0, 0, 1, 0], [], []>} : vector<5x64xf32>, vector<5x64xf32>, vector<5x5xf32> -> vector<5x5xf32>
    %cst_92 = arith.constant 1.250000e-01 : f32
    %187 = vector.broadcast %cst_92 : f32 to vector<5x5xf32>
    %188 = arith.mulf %186, %187 : vector<5x5xf32>
    %cst_93 = arith.constant dense<0xFF800000> : vector<5xf32>
    %189 = vector.multi_reduction <maximumf>, %188, %cst_93 [1] : vector<5x5xf32> to vector<5xf32>
    %190 = vector.shape_cast %189 : vector<5xf32> to vector<5x1xf32>
    %191 = vector.broadcast %190 : vector<5x1xf32> to vector<5x5xf32>
    %192 = arith.subf %188, %191 : vector<5x5xf32>
    %193 = math.exp %192 : vector<5x5xf32>
    %cst_94 = arith.constant dense<0.000000e+00> : vector<5xf32>
    %194 = vector.multi_reduction <add>, %193, %cst_94 [1] : vector<5x5xf32> to vector<5xf32>
    %195 = vector.shape_cast %194 : vector<5xf32> to vector<5x1xf32>
    %196 = vector.broadcast %195 : vector<5x1xf32> to vector<5x5xf32>
    %197 = arith.divf %193, %196 : vector<5x5xf32>
    %cst_95 = arith.constant dense<0.000000e+00> : vector<5x64xf32>
    %198 = tpu.matmul %197, %185, %cst_95 {dimension_numbers = #tpu.dot_dimension_numbers<[1], [0], [0], [1], [0, 0, 1, 1], [], []>} : vector<5x5xf32>, vector<5x64xf32>, vector<5x64xf32> -> vector<5x64xf32>
    %c0_96 = arith.constant 0 : index
    %c0_97 = arith.constant 0 : index
    %199 = vector.load %arg32[%c0_96, %c0_97] : memref<10x128xf32, #tpu.memory_space<vmem>>, vector<5x64xf32>
    tpu.vector_store %arg32[%c0_96, %c0_97], %198 {strides = array<i32>} : memref<10x128xf32, #tpu.memory_space<vmem>>, vector<5x64xf32>,
    %200 = vector.extract_strided_slice %182 {offsets = [0, 64], sizes = [5, 64], strides = [1, 1]} : vector<10x384xf32> to vector<5x64xf32>
    %201 = vector.extract_strided_slice %182 {offsets = [0, 192], sizes = [5, 64], strides = [1, 1]} : vector<10x384xf32> to vector<5x64xf32>
    %202 = vector.extract_strided_slice %182 {offsets = [0, 320], sizes = [5, 64], strides = [1, 1]} : vector<10x384xf32> to vector<5x64xf32>
    %cst_98 = arith.constant dense<0.000000e+00> : vector<5x5xf32>
    %203 = tpu.matmul %200, %201, %cst_98 {dimension_numbers = #tpu.dot_dimension_numbers<[1], [1], [0], [0], [0, 0, 1, 0], [], []>} : vector<5x64xf32>, vector<5x64xf32>, vector<5x5xf32> -> vector<5x5xf32>
    %cst_99 = arith.constant 1.250000e-01 : f32
    %204 = vector.broadcast %cst_99 : f32 to vector<5x5xf32>
    %205 = arith.mulf %203, %204 : vector<5x5xf32>
    %cst_100 = arith.constant dense<0xFF800000> : vector<5xf32>
    %206 = vector.multi_reduction <maximumf>, %205, %cst_100 [1] : vector<5x5xf32> to vector<5xf32>
    %207 = vector.shape_cast %206 : vector<5xf32> to vector<5x1xf32>
    %208 = vector.broadcast %207 : vector<5x1xf32> to vector<5x5xf32>
    %209 = arith.subf %205, %208 : vector<5x5xf32>
    %210 = math.exp %209 : vector<5x5xf32>
    %cst_101 = arith.constant dense<0.000000e+00> : vector<5xf32>
    %211 = vector.multi_reduction <add>, %210, %cst_101 [1] : vector<5x5xf32> to vector<5xf32>
    %212 = vector.shape_cast %211 : vector<5xf32> to vector<5x1xf32>
    %213 = vector.broadcast %212 : vector<5x1xf32> to vector<5x5xf32>
    %214 = arith.divf %210, %213 : vector<5x5xf32>
    %cst_102 = arith.constant dense<0.000000e+00> : vector<5x64xf32>
    %215 = tpu.matmul %214, %202, %cst_102 {dimension_numbers = #tpu.dot_dimension_numbers<[1], [0], [0], [1], [0, 0, 1, 1], [], []>} : vector<5x5xf32>, vector<5x64xf32>, vector<5x64xf32> -> vector<5x64xf32>
    %c0_103 = arith.constant 0 : index
    %c64_104 = arith.constant 64 : index
    %216 = vector.load %arg32[%c0_103, %c64_104] : memref<10x128xf32, #tpu.memory_space<vmem>>, vector<5x64xf32>
    tpu.vector_store %arg32[%c0_103, %c64_104], %215 {strides = array<i32>} : memref<10x128xf32, #tpu.memory_space<vmem>>, vector<5x64xf32>,
    %217 = vector.extract_strided_slice %182 {offsets = [5, 0], sizes = [5, 64], strides = [1, 1]} : vector<10x384xf32> to vector<5x64xf32>
    %218 = vector.extract_strided_slice %182 {offsets = [5, 128], sizes = [5, 64], strides = [1, 1]} : vector<10x384xf32> to vector<5x64xf32>
    %219 = vector.extract_strided_slice %182 {offsets = [5, 256], sizes = [5, 64], strides = [1, 1]} : vector<10x384xf32> to vector<5x64xf32>
    %cst_105 = arith.constant dense<0.000000e+00> : vector<5x5xf32>
    %220 = tpu.matmul %217, %218, %cst_105 {dimension_numbers = #tpu.dot_dimension_numbers<[1], [1], [0], [0], [0, 0, 1, 0], [], []>} : vector<5x64xf32>, vector<5x64xf32>, vector<5x5xf32> -> vector<5x5xf32>
    %cst_106 = arith.constant 1.250000e-01 : f32
    %221 = vector.broadcast %cst_106 : f32 to vector<5x5xf32>
    %222 = arith.mulf %220, %221 : vector<5x5xf32>
    %cst_107 = arith.constant dense<0xFF800000> : vector<5xf32>
    %223 = vector.multi_reduction <maximumf>, %222, %cst_107 [1] : vector<5x5xf32> to vector<5xf32>
    %224 = vector.shape_cast %223 : vector<5xf32> to vector<5x1xf32>
    %225 = vector.broadcast %224 : vector<5x1xf32> to vector<5x5xf32>
    %226 = arith.subf %222, %225 : vector<5x5xf32>
    %227 = math.exp %226 : vector<5x5xf32>
    %cst_108 = arith.constant dense<0.000000e+00> : vector<5xf32>
    %228 = vector.multi_reduction <add>, %227, %cst_108 [1] : vector<5x5xf32> to vector<5xf32>
    %229 = vector.shape_cast %228 : vector<5xf32> to vector<5x1xf32>
    %230 = vector.broadcast %229 : vector<5x1xf32> to vector<5x5xf32>
    %231 = arith.divf %227, %230 : vector<5x5xf32>
    %cst_109 = arith.constant dense<0.000000e+00> : vector<5x64xf32>
    %232 = tpu.matmul %231, %219, %cst_109 {dimension_numbers = #tpu.dot_dimension_numbers<[1], [0], [0], [1], [0, 0, 1, 1], [], []>} : vector<5x5xf32>, vector<5x64xf32>, vector<5x64xf32> -> vector<5x64xf32>
    %c5_110 = arith.constant 5 : index
    %c0_111 = arith.constant 0 : index
    %233 = vector.load %arg32[%c5_110, %c0_111] : memref<10x128xf32, #tpu.memory_space<vmem>>, vector<5x64xf32>
    tpu.vector_store %arg32[%c5_110, %c0_111], %232 {strides = array<i32>} : memref<10x128xf32, #tpu.memory_space<vmem>>, vector<5x64xf32>,
    %234 = vector.extract_strided_slice %182 {offsets = [5, 64], sizes = [5, 64], strides = [1, 1]} : vector<10x384xf32> to vector<5x64xf32>
    %235 = vector.extract_strided_slice %182 {offsets = [5, 192], sizes = [5, 64], strides = [1, 1]} : vector<10x384xf32> to vector<5x64xf32>
    %236 = vector.extract_strided_slice %182 {offsets = [5, 320], sizes = [5, 64], strides = [1, 1]} : vector<10x384xf32> to vector<5x64xf32>
    %cst_112 = arith.constant dense<0.000000e+00> : vector<5x5xf32>
    %237 = tpu.matmul %234, %235, %cst_112 {dimension_numbers = #tpu.dot_dimension_numbers<[1], [1], [0], [0], [0, 0, 1, 0], [], []>} : vector<5x64xf32>, vector<5x64xf32>, vector<5x5xf32> -> vector<5x5xf32>
    %cst_113 = arith.constant 1.250000e-01 : f32
    %238 = vector.broadcast %cst_113 : f32 to vector<5x5xf32>
    %239 = arith.mulf %237, %238 : vector<5x5xf32>
    %cst_114 = arith.constant dense<0xFF800000> : vector<5xf32>
    %240 = vector.multi_reduction <maximumf>, %239, %cst_114 [1] : vector<5x5xf32> to vector<5xf32>
    %241 = vector.shape_cast %240 : vector<5xf32> to vector<5x1xf32>
    %242 = vector.broadcast %241 : vector<5x1xf32> to vector<5x5xf32>
    %243 = arith.subf %239, %242 : vector<5x5xf32>
    %244 = math.exp %243 : vector<5x5xf32>
    %cst_115 = arith.constant dense<0.000000e+00> : vector<5xf32>
    %245 = vector.multi_reduction <add>, %244, %cst_115 [1] : vector<5x5xf32> to vector<5xf32>
    %246 = vector.shape_cast %245 : vector<5xf32> to vector<5x1xf32>
    %247 = vector.broadcast %246 : vector<5x1xf32> to vector<5x5xf32>
    %248 = arith.divf %244, %247 : vector<5x5xf32>
    %cst_116 = arith.constant dense<0.000000e+00> : vector<5x64xf32>
    %249 = tpu.matmul %248, %236, %cst_116 {dimension_numbers = #tpu.dot_dimension_numbers<[1], [0], [0], [1], [0, 0, 1, 1], [], []>} : vector<5x5xf32>, vector<5x64xf32>, vector<5x64xf32> -> vector<5x64xf32>
    %c5_117 = arith.constant 5 : index
    %c64_118 = arith.constant 64 : index
    %250 = vector.load %arg32[%c5_117, %c64_118] : memref<10x128xf32, #tpu.memory_space<vmem>>, vector<5x64xf32>
    tpu.vector_store %arg32[%c5_117, %c64_118], %249 {strides = array<i32>} : memref<10x128xf32, #tpu.memory_space<vmem>>, vector<5x64xf32>,
    %c0_119 = arith.constant 0 : index
    %c0_120 = arith.constant 0 : index
    %251 = vector.load %arg32[%c0_119, %c0_120] : memref<10x128xf32, #tpu.memory_space<vmem>>, vector<10x128xf32>
    %c0_121 = arith.constant 0 : index
    %c0_122 = arith.constant 0 : index
    %252 = vector.load %arg21[%c0_121, %c0_122] : memref<128x128xf32, #tpu.memory_space<vmem>>, vector<128x128xf32>
    %cst_123 = arith.constant dense<0.000000e+00> : vector<10x128xf32>
    %253 = tpu.matmul %251, %252, %cst_123 {dimension_numbers = #tpu.dot_dimension_numbers<[1], [0], [0], [1], [0, 0, 1, 1], [], []>} : vector<10x128xf32>, vector<128x128xf32>, vector<10x128xf32> -> vector<10x128xf32>
    %c0_124 = arith.constant 0 : index
    %c0_125 = arith.constant 0 : index
    %254 = vector.load %arg22[%c0_124, %c0_125] : memref<1x128xf32, #tpu.memory_space<vmem>>, vector<1x128xf32>
    %255 = vector.broadcast %254 : vector<1x128xf32> to vector<10x128xf32>
    %256 = arith.addf %253, %255 : vector<10x128xf32>
    %257 = arith.addf %155, %256 : vector<10x128xf32>
    %c0_126 = arith.constant 0 : index
    %c0_127 = arith.constant 0 : index
    %258 = vector.load %arg23[%c0_126, %c0_127] : memref<1x128xf32, #tpu.memory_space<vmem>>, vector<1x128xf32>
    %c0_128 = arith.constant 0 : index
    %c0_129 = arith.constant 0 : index
    %259 = vector.load %arg24[%c0_128, %c0_129] : memref<1x128xf32, #tpu.memory_space<vmem>>, vector<1x128xf32>
    %cst_130 = arith.constant dense<0.000000e+00> : vector<10xf32>
    %260 = vector.multi_reduction <add>, %257, %cst_130 [1] : vector<10x128xf32> to vector<10xf32>
    %261 = vector.shape_cast %260 : vector<10xf32> to vector<10x1xf32>
    %cst_131 = arith.constant 1.280000e+02 : f32
    %262 = vector.broadcast %cst_131 : f32 to vector<10x1xf32>
    %263 = arith.divf %261, %262 : vector<10x1xf32>
    %264 = vector.broadcast %263 : vector<10x1xf32> to vector<10x128xf32>
    %265 = arith.subf %257, %264 : vector<10x128xf32>
    %266 = arith.mulf %265, %265 : vector<10x128xf32>
    %cst_132 = arith.constant dense<0.000000e+00> : vector<10xf32>
    %267 = vector.multi_reduction <add>, %266, %cst_132 [1] : vector<10x128xf32> to vector<10xf32>
    %268 = vector.shape_cast %267 : vector<10xf32> to vector<10x1xf32>
    %cst_133 = arith.constant 1.280000e+02 : f32
    %269 = vector.broadcast %cst_133 : f32 to vector<10x1xf32>
    %270 = arith.divf %268, %269 : vector<10x1xf32>
    %cst_134 = arith.constant 9.99999974E-6 : f32
    %271 = vector.broadcast %cst_134 : f32 to vector<10x1xf32>
    %272 = arith.addf %270, %271 : vector<10x1xf32>
    %273 = math.rsqrt %272 : vector<10x1xf32>
    %274 = vector.broadcast %273 : vector<10x1xf32> to vector<10x128xf32>
    %275 = arith.mulf %265, %274 : vector<10x128xf32>
    %276 = vector.broadcast %258 : vector<1x128xf32> to vector<10x128xf32>
    %277 = arith.mulf %275, %276 : vector<10x128xf32>
    %278 = vector.broadcast %259 : vector<1x128xf32> to vector<10x128xf32>
    %279 = arith.addf %277, %278 : vector<10x128xf32>
    %c0_135 = arith.constant 0 : index
    %c0_136 = arith.constant 0 : index
    %280 = vector.load %arg25[%c0_135, %c0_136] : memref<128x512xf32, #tpu.memory_space<vmem>>, vector<128x512xf32>
    %cst_137 = arith.constant dense<0.000000e+00> : vector<10x512xf32>
    %281 = tpu.matmul %279, %280, %cst_137 {dimension_numbers = #tpu.dot_dimension_numbers<[1], [0], [0], [1], [0, 0, 1, 1], [], []>} : vector<10x128xf32>, vector<128x512xf32>, vector<10x512xf32> -> vector<10x512xf32>
    %c0_138 = arith.constant 0 : index
    %c0_139 = arith.constant 0 : index
    %282 = vector.load %arg26[%c0_138, %c0_139] : memref<1x512xf32, #tpu.memory_space<vmem>>, vector<1x512xf32>
    %283 = vector.broadcast %282 : vector<1x512xf32> to vector<10x512xf32>
    %284 = arith.addf %281, %283 : vector<10x512xf32>
    %cst_140 = arith.constant 5.000000e-01 : f32
    %285 = vector.broadcast %cst_140 : f32 to vector<10x512xf32>
    %286 = arith.mulf %285, %284 : vector<10x512xf32>
    %cst_141 = arith.constant 4.471500e-02 : f32
    %287 = vector.broadcast %cst_141 : f32 to vector<10x512xf32>
    %288 = arith.mulf %287, %284 : vector<10x512xf32>
    %289 = arith.mulf %288, %284 : vector<10x512xf32>
    %290 = arith.mulf %289, %284 : vector<10x512xf32>
    %291 = arith.addf %284, %290 : vector<10x512xf32>
    %cst_142 = arith.constant 0.797884583 : f32
    %292 = vector.broadcast %cst_142 : f32 to vector<10x512xf32>
    %293 = arith.mulf %292, %291 : vector<10x512xf32>
    %294 = math.tanh %293 : vector<10x512xf32>
    %cst_143 = arith.constant 1.000000e+00 : f32
    %295 = vector.broadcast %cst_143 : f32 to vector<10x512xf32>
    %296 = arith.addf %295, %294 : vector<10x512xf32>
    %297 = arith.mulf %286, %296 : vector<10x512xf32>
    %c0_144 = arith.constant 0 : index
    %c0_145 = arith.constant 0 : index
    %298 = vector.load %arg27[%c0_144, %c0_145] : memref<512x128xf32, #tpu.memory_space<vmem>>, vector<512x128xf32>
    %cst_146 = arith.constant dense<0.000000e+00> : vector<10x128xf32>
    %299 = tpu.matmul %297, %298, %cst_146 {dimension_numbers = #tpu.dot_dimension_numbers<[1], [0], [0], [1], [0, 0, 1, 1], [], []>} : vector<10x512xf32>, vector<512x128xf32>, vector<10x128xf32> -> vector<10x128xf32>
    %c0_147 = arith.constant 0 : index
    %c0_148 = arith.constant 0 : index
    %300 = vector.load %arg28[%c0_147, %c0_148] : memref<1x128xf32, #tpu.memory_space<vmem>>, vector<1x128xf32>
    %301 = vector.broadcast %300 : vector<1x128xf32> to vector<10x128xf32>
    %302 = arith.addf %299, %301 : vector<10x128xf32>
    %303 = arith.addf %257, %302 : vector<10x128xf32>
    %304 = vector.extract_strided_slice %303 {offsets = [0, 0], sizes = [1, 128], strides = [1, 1]} : vector<10x128xf32> to vector<1x128xf32>
    %c0_149 = arith.constant 0 : index
    %c0_150 = arith.constant 0 : index
    %305 = vector.load %arg33[%c0_149, %c0_150] : memref<2x640xf32, #tpu.memory_space<vmem>>, vector<1x128xf32>
    tpu.vector_store %arg33[%c0_149, %c0_150], %304 {strides = array<i32>} : memref<2x640xf32, #tpu.memory_space<vmem>>, vector<1x128xf32>,
    %306 = vector.extract_strided_slice %303 {offsets = [1, 0], sizes = [1, 128], strides = [1, 1]} : vector<10x128xf32> to vector<1x128xf32>
    %c0_151 = arith.constant 0 : index
    %c128 = arith.constant 128 : index
    %307 = vector.load %arg33[%c0_151, %c128] : memref<2x640xf32, #tpu.memory_space<vmem>>, vector<1x128xf32>
    tpu.vector_store %arg33[%c0_151, %c128], %306 {strides = array<i32>} : memref<2x640xf32, #tpu.memory_space<vmem>>, vector<1x128xf32>,
    %308 = vector.extract_strided_slice %303 {offsets = [2, 0], sizes = [1, 128], strides = [1, 1]} : vector<10x128xf32> to vector<1x128xf32>
    %c0_152 = arith.constant 0 : index
    %c256 = arith.constant 256 : index
    %309 = vector.load %arg33[%c0_152, %c256] : memref<2x640xf32, #tpu.memory_space<vmem>>, vector<1x128xf32>
    tpu.vector_store %arg33[%c0_152, %c256], %308 {strides = array<i32>} : memref<2x640xf32, #tpu.memory_space<vmem>>, vector<1x128xf32>,
    %310 = vector.extract_strided_slice %303 {offsets = [3, 0], sizes = [1, 128], strides = [1, 1]} : vector<10x128xf32> to vector<1x128xf32>
    %c0_153 = arith.constant 0 : index
    %c384 = arith.constant 384 : index
    %311 = vector.load %arg33[%c0_153, %c384] : memref<2x640xf32, #tpu.memory_space<vmem>>, vector<1x128xf32>
    tpu.vector_store %arg33[%c0_153, %c384], %310 {strides = array<i32>} : memref<2x640xf32, #tpu.memory_space<vmem>>, vector<1x128xf32>,
    %312 = vector.extract_strided_slice %303 {offsets = [4, 0], sizes = [1, 128], strides = [1, 1]} : vector<10x128xf32> to vector<1x128xf32>
    %c0_154 = arith.constant 0 : index
    %c512 = arith.constant 512 : index
    %313 = vector.load %arg33[%c0_154, %c512] : memref<2x640xf32, #tpu.memory_space<vmem>>, vector<1x128xf32>
    tpu.vector_store %arg33[%c0_154, %c512], %312 {strides = array<i32>} : memref<2x640xf32, #tpu.memory_space<vmem>>, vector<1x128xf32>,
    %314 = vector.extract_strided_slice %303 {offsets = [5, 0], sizes = [1, 128], strides = [1, 1]} : vector<10x128xf32> to vector<1x128xf32>
    %c1 = arith.constant 1 : index
    %c0_155 = arith.constant 0 : index
    %315 = vector.load %arg33[%c1, %c0_155] : memref<2x640xf32, #tpu.memory_space<vmem>>, vector<1x128xf32>
    tpu.vector_store %arg33[%c1, %c0_155], %314 {strides = array<i32>} : memref<2x640xf32, #tpu.memory_space<vmem>>, vector<1x128xf32>,
    %316 = vector.extract_strided_slice %303 {offsets = [6, 0], sizes = [1, 128], strides = [1, 1]} : vector<10x128xf32> to vector<1x128xf32>
    %c1_156 = arith.constant 1 : index
    %c128_157 = arith.constant 128 : index
    %317 = vector.load %arg33[%c1_156, %c128_157] : memref<2x640xf32, #tpu.memory_space<vmem>>, vector<1x128xf32>
    tpu.vector_store %arg33[%c1_156, %c128_157], %316 {strides = array<i32>} : memref<2x640xf32, #tpu.memory_space<vmem>>, vector<1x128xf32>,
    %318 = vector.extract_strided_slice %303 {offsets = [7, 0], sizes = [1, 128], strides = [1, 1]} : vector<10x128xf32> to vector<1x128xf32>
    %c1_158 = arith.constant 1 : index
    %c256_159 = arith.constant 256 : index
    %319 = vector.load %arg33[%c1_158, %c256_159] : memref<2x640xf32, #tpu.memory_space<vmem>>, vector<1x128xf32>
    tpu.vector_store %arg33[%c1_158, %c256_159], %318 {strides = array<i32>} : memref<2x640xf32, #tpu.memory_space<vmem>>, vector<1x128xf32>,
    %320 = vector.extract_strided_slice %303 {offsets = [8, 0], sizes = [1, 128], strides = [1, 1]} : vector<10x128xf32> to vector<1x128xf32>
    %c1_160 = arith.constant 1 : index
    %c384_161 = arith.constant 384 : index
    %321 = vector.load %arg33[%c1_160, %c384_161] : memref<2x640xf32, #tpu.memory_space<vmem>>, vector<1x128xf32>
    tpu.vector_store %arg33[%c1_160, %c384_161], %320 {strides = array<i32>} : memref<2x640xf32, #tpu.memory_space<vmem>>, vector<1x128xf32>,
    %322 = vector.extract_strided_slice %303 {offsets = [9, 0], sizes = [1, 128], strides = [1, 1]} : vector<10x128xf32> to vector<1x128xf32>
    %c1_162 = arith.constant 1 : index
    %c512_163 = arith.constant 512 : index
    %323 = vector.load %arg33[%c1_162, %c512_163] : memref<2x640xf32, #tpu.memory_space<vmem>>, vector<1x128xf32>
    tpu.vector_store %arg33[%c1_162, %c512_163], %322 {strides = array<i32>} : memref<2x640xf32, #tpu.memory_space<vmem>>, vector<1x128xf32>,
    %c0_164 = arith.constant 0 : index
    %c0_165 = arith.constant 0 : index
    %324 = vector.load %arg33[%c0_164, %c0_165] : memref<2x640xf32, #tpu.memory_space<vmem>>, vector<2x640xf32>
    %c0_166 = arith.constant 0 : index
    %c0_167 = arith.constant 0 : index
    %325 = vector.load %arg29[%c0_166, %c0_167] : memref<640x32xf32, #tpu.memory_space<vmem>>, vector<640x32xf32>
    %cst_168 = arith.constant dense<0.000000e+00> : vector<2x32xf32>
    %326 = tpu.matmul %324, %325, %cst_168 {dimension_numbers = #tpu.dot_dimension_numbers<[1], [0], [0], [1], [0, 0, 1, 1], [], []>} : vector<2x640xf32>, vector<640x32xf32>, vector<2x32xf32> -> vector<2x32xf32>
    %c0_169 = arith.constant 0 : index
    %c0_170 = arith.constant 0 : index
    %327 = vector.load %arg30[%c0_169, %c0_170] : memref<1x32xf32, #tpu.memory_space<vmem>>, vector<1x32xf32>
    %328 = vector.broadcast %327 : vector<1x32xf32> to vector<2x32xf32>
    %329 = arith.addf %326, %328 : vector<2x32xf32>
    %c0_171 = arith.constant 0 : index
    %c0_172 = arith.constant 0 : index
    %330 = vector.load %arg31[%c0_171, %c0_172] : memref<2x32xf32, #tpu.memory_space<vmem>>, vector<2x32xf32>
    tpu.vector_store %arg31[%c0_171, %c0_172], %329 {strides = array<i32>} : memref<2x32xf32, #tpu.memory_space<vmem>>, vector<2x32xf32>,
    return
  }
  func.func @transform_0(%arg0: i32) -> (i32, i32) {
    %c0_i32 = arith.constant 0 : i32
    %c0_i32_0 = arith.constant 0 : i32
    return %arg0, %c0_i32 : i32, i32
  }
  func.func @transform_1(%arg0: i32) -> (i32, i32) {
    %c0_i32 = arith.constant 0 : i32
    %c0_i32_0 = arith.constant 0 : i32
    %c0_i32_1 = arith.constant 0 : i32
    return %c0_i32, %c0_i32_0 : i32, i32
  }
  func.func @transform_2(%arg0: i32) -> (i32, i32) {
    %c0_i32 = arith.constant 0 : i32
    %c0_i32_0 = arith.constant 0 : i32
    %c0_i32_1 = arith.constant 0 : i32
    return %c0_i32, %c0_i32_0 : i32, i32
  }
  func.func @transform_3(%arg0: i32) -> (i32, i32) {
    %c0_i32 = arith.constant 0 : i32
    %c0_i32_0 = arith.constant 0 : i32
    %c0_i32_1 = arith.constant 0 : i32
    return %c0_i32, %c0_i32_0 : i32, i32
  }
  func.func @transform_4(%arg0: i32) -> (i32, i32) {
    %c0_i32 = arith.constant 0 : i32
    %c0_i32_0 = arith.constant 0 : i32
    %c0_i32_1 = arith.constant 0 : i32
    return %c0_i32, %c0_i32_0 : i32, i32
  }
  func.func @transform_5(%arg0: i32) -> (i32, i32) {
    %c0_i32 = arith.constant 0 : i32
    %c0_i32_0 = arith.constant 0 : i32
    %c0_i32_1 = arith.constant 0 : i32
    return %c0_i32, %c0_i32_0 : i32, i32
  }
  func.func @transform_6(%arg0: i32) -> (i32, i32) {
    %c0_i32 = arith.constant 0 : i32
    %c0_i32_0 = arith.constant 0 : i32
    %c0_i32_1 = arith.constant 0 : i32
    return %c0_i32, %c0_i32_0 : i32, i32
  }
  func.func @transform_7(%arg0: i32) -> (i32, i32) {
    %c0_i32 = arith.constant 0 : i32
    %c0_i32_0 = arith.constant 0 : i32
    %c0_i32_1 = arith.constant 0 : i32
    return %c0_i32, %c0_i32_0 : i32, i32
  }
  func.func @transform_8(%arg0: i32) -> (i32, i32) {
    %c0_i32 = arith.constant 0 : i32
    %c0_i32_0 = arith.constant 0 : i32
    %c0_i32_1 = arith.constant 0 : i32
    return %c0_i32, %c0_i32_0 : i32, i32
  }
  func.func @transform_9(%arg0: i32) -> (i32, i32) {
    %c0_i32 = arith.constant 0 : i32
    %c0_i32_0 = arith.constant 0 : i32
    %c0_i32_1 = arith.constant 0 : i32
    return %c0_i32, %c0_i32_0 : i32, i32
  }
  func.func @transform_10(%arg0: i32) -> (i32, i32) {
    %c0_i32 = arith.constant 0 : i32
    %c0_i32_0 = arith.constant 0 : i32
    %c0_i32_1 = arith.constant 0 : i32
    return %c0_i32, %c0_i32_0 : i32, i32
  }
  func.func @transform_11(%arg0: i32) -> (i32, i32) {
    %c0_i32 = arith.constant 0 : i32
    %c0_i32_0 = arith.constant 0 : i32
    %c0_i32_1 = arith.constant 0 : i32
    return %c0_i32, %c0_i32_0 : i32, i32
  }
  func.func @transform_12(%arg0: i32) -> (i32, i32) {
    %c0_i32 = arith.constant 0 : i32
    %c0_i32_0 = arith.constant 0 : i32
    %c0_i32_1 = arith.constant 0 : i32
    return %c0_i32, %c0_i32_0 : i32, i32
  }
  func.func @transform_13(%arg0: i32) -> (i32, i32) {
    %c0_i32 = arith.constant 0 : i32
    %c0_i32_0 = arith.constant 0 : i32
    %c0_i32_1 = arith.constant 0 : i32
    return %c0_i32, %c0_i32_0 : i32, i32
  }
  func.func @transform_14(%arg0: i32) -> (i32, i32) {
    %c0_i32 = arith.constant 0 : i32
    %c0_i32_0 = arith.constant 0 : i32
    %c0_i32_1 = arith.constant 0 : i32
    return %c0_i32, %c0_i32_0 : i32, i32
  }
  func.func @transform_15(%arg0: i32) -> (i32, i32) {
    %c0_i32 = arith.constant 0 : i32
    %c0_i32_0 = arith.constant 0 : i32
    %c0_i32_1 = arith.constant 0 : i32
    return %c0_i32, %c0_i32_0 : i32, i32
  }
  func.func @transform_16(%arg0: i32) -> (i32, i32) {
    %c0_i32 = arith.constant 0 : i32
    %c0_i32_0 = arith.constant 0 : i32
    %c0_i32_1 = arith.constant 0 : i32
    return %c0_i32, %c0_i32_0 : i32, i32
  }
  func.func @transform_17(%arg0: i32) -> (i32, i32) {
    %c0_i32 = arith.constant 0 : i32
    %c0_i32_0 = arith.constant 0 : i32
    %c0_i32_1 = arith.constant 0 : i32
    return %c0_i32, %c0_i32_0 : i32, i32
  }
  func.func @transform_18(%arg0: i32) -> (i32, i32) {
    %c0_i32 = arith.constant 0 : i32
    %c0_i32_0 = arith.constant 0 : i32
    %c0_i32_1 = arith.constant 0 : i32
    return %c0_i32, %c0_i32_0 : i32, i32
  }
  func.func @transform_19(%arg0: i32) -> (i32, i32) {
    %c0_i32 = arith.constant 0 : i32
    %c0_i32_0 = arith.constant 0 : i32
    %c0_i32_1 = arith.constant 0 : i32
    return %c0_i32, %c0_i32_0 : i32, i32
  }
  func.func @transform_20(%arg0: i32) -> (i32, i32) {
    %c0_i32 = arith.constant 0 : i32
    %c0_i32_0 = arith.constant 0 : i32
    %c0_i32_1 = arith.constant 0 : i32
    return %c0_i32, %c0_i32_0 : i32, i32
  }
  func.func @transform_21(%arg0: i32) -> (i32, i32) {
    %c0_i32 = arith.constant 0 : i32
    %c0_i32_0 = arith.constant 0 : i32
    %c0_i32_1 = arith.constant 0 : i32
    return %c0_i32, %c0_i32_0 : i32, i32
  }
  func.func @transform_22(%arg0: i32) -> (i32, i32) {
    %c0_i32 = arith.constant 0 : i32
    %c0_i32_0 = arith.constant 0 : i32
    %c0_i32_1 = arith.constant 0 : i32
    return %c0_i32, %c0_i32_0 : i32, i32
  }
  func.func @transform_23(%arg0: i32) -> (i32, i32) {
    %c0_i32 = arith.constant 0 : i32
    %c0_i32_0 = arith.constant 0 : i32
    %c0_i32_1 = arith.constant 0 : i32
    return %c0_i32, %c0_i32_0 : i32, i32
  }
  func.func @transform_24(%arg0: i32) -> (i32, i32) {
    %c0_i32 = arith.constant 0 : i32
    %c0_i32_0 = arith.constant 0 : i32
    %c0_i32_1 = arith.constant 0 : i32
    return %c0_i32, %c0_i32_0 : i32, i32
  }
  func.func @transform_25(%arg0: i32) -> (i32, i32) {
    %c0_i32 = arith.constant 0 : i32
    %c0_i32_0 = arith.constant 0 : i32
    %c0_i32_1 = arith.constant 0 : i32
    return %c0_i32, %c0_i32_0 : i32, i32
  }
  func.func @transform_26(%arg0: i32) -> (i32, i32) {
    %c0_i32 = arith.constant 0 : i32
    %c0_i32_0 = arith.constant 0 : i32
    %c0_i32_1 = arith.constant 0 : i32
    return %c0_i32, %c0_i32_0 : i32, i32
  }
  func.func @transform_27(%arg0: i32) -> (i32, i32) {
    %c0_i32 = arith.constant 0 : i32
    %c0_i32_0 = arith.constant 0 : i32
    %c0_i32_1 = arith.constant 0 : i32
    return %c0_i32, %c0_i32_0 : i32, i32
  }
  func.func @transform_28(%arg0: i32) -> (i32, i32) {
    %c0_i32 = arith.constant 0 : i32
    %c0_i32_0 = arith.constant 0 : i32
    %c0_i32_1 = arith.constant 0 : i32
    return %c0_i32, %c0_i32_0 : i32, i32
  }
  func.func @transform_29(%arg0: i32) -> (i32, i32) {
    %c0_i32 = arith.constant 0 : i32
    %c0_i32_0 = arith.constant 0 : i32
    %c0_i32_1 = arith.constant 0 : i32
    return %c0_i32, %c0_i32_0 : i32, i32
  }
  func.func @transform_30(%arg0: i32) -> (i32, i32) {
    %c0_i32 = arith.constant 0 : i32
    %c0_i32_0 = arith.constant 0 : i32
    return %arg0, %c0_i32 : i32, i32
  }
}

</mosaic_0001>

<bundles_post_ra>
// kernel: tpu_custom_call.1
= control target key start
LH: loop header
LB: loop body
LE: loop exit
PB: predicated region body
PF: predicated region fallthrough
CT: control target
= control target key end

     0   :  { %s2922_s6 = smov 1   ;;  %s2923_s10 = smov 2   ;;  %s3600_s0 = inlined_call_operand.smem [shape: u32[31], index: -1, kind: input, shape index: {}] }
   0x1   :  { %s2974_s5 = sld [smem:[%s3600_s0]]   ;;  %s2924_s14 = smov 3  }
   0x2   :  { %s2979_s9 = sld [smem:[%s3600_s0 + %s2922_s6]]   ;;  %s2925_s18 = smov 4  }
   0x3   :  { %s2984_s13 = sld [smem:[%s3600_s0 + %s2923_s10]]   ;;  %s2926_s22 = smov 5  }
   0x4   :  { %s2989_s17 = sld [smem:[%s3600_s0 + %s2924_s14]]   ;;  %s2927_s26 = smov 6  }
   0x5   :  { %s2994_s21 = sld [smem:[%s3600_s0 + %s2925_s18]]   ;;  %s2928_s30 = smov 7  }
   0x6   :  { %s2999_s25 = sld [smem:[%s3600_s0 + %s2926_s22]]   ;;  %s2929_s4 = smov 8  }
   0x7   :  { %s3004_s29 = sld [smem:[%s3600_s0 + %s2927_s26]]   ;;  %s2930_s10 = smov 9  }
   0x8   :  { %s3009_s3 = sld [smem:[%s3600_s0 + %s2928_s30]]   ;;  %s2931_s15 = smov 10  }
   0x9   :  { %s3014_s8 = sld [smem:[%s3600_s0 + %s2929_s4]]   ;;  %s2932_s20 = smov 11  }
   0xa   :  { %s3019_s14 = sld [smem:[%s3600_s0 + %s2930_s10]]   ;;  %s2933_s26 = smov 12  }
   0xb   :  { %s3024_s19 = sld [smem:[%s3600_s0 + %s2931_s15]]   ;;  %s2934_s1 = smov 13  }
   0xc   :  { %s3029_s24 = sld [smem:[%s3600_s0 + %s2932_s20]]   ;;  %s2935_s7 = smov 14  }
   0xd   :  { %s3034_s30 = sld [smem:[%s3600_s0 + %s2933_s26]]   ;;  %s2936_s15 = smov 15  }
   0xe   :  { %s3039_s6 = sld [smem:[%s3600_s0 + %s2934_s1]]   ;;  %s2937_s22 = smov 16  }
   0xf   :  { %s3044_s12 = sld [smem:[%s3600_s0 + %s2935_s7]]   ;;  %s2938_s28 = smov 17  }
  0x10   :  { %s3049_s20 = sld [smem:[%s3600_s0 + %s2936_s15]]   ;;  %s2939_s7 = smov 18  }
  0x11   :  { %3603 = sst [smem:[#allocation18_spill]] %s3024_s19  ;;  %s2940_s15 = smov 19  }
  0x12   :  { %3604 = sst [smem:[#allocation19_spill]] %s3029_s24 }
  0x13   :  { %3605 = sst [smem:[#allocation20_spill]] %s3034_s30 }
  0x14   :  { %3606 = sst [smem:[#allocation21_spill]] %s3039_s6 }
  0x15   :  { %s3054_s27 = sld [smem:[%s3600_s0 + %s2937_s22]]   ;;  %s2941_s22 = smov 20  }
  0x16   :  { %3607 = sst [smem:[#allocation22_spill]] %s3049_s20 }
  0x17   :  { %s3059_s4 = sld [smem:[%s3600_s0 + %s2938_s28]]   ;;  %s2942_s28 = smov 21  }
  0x18   :  { %s3064_s6 = sld [smem:[%s3600_s0 + %s2939_s7]]   ;;  %s2943_s7 = smov 22  }
  0x19   :  { %s3069_s20 = sld [smem:[%s3600_s0 + %s2940_s15]]   ;;  %s2944_s15 = smov 23  }
  0x1a   :  { %s3084_s24 = sld [smem:[%s3600_s0 + %s2943_s7]]   ;;  %s2947_s7 = smov 26  }
  0x1b   :  { %3608 = sst [smem:[#allocation23_spill]] %s3054_s27 }
  0x1c   :  { %s3074_s27 = sld [smem:[%s3600_s0 + %s2941_s22]]   ;;  %s2945_s22 = smov 24  }
  0x1d   :  { %3609 = sst [smem:[#allocation24_spill]] %s3059_s4 }
  0x1e   :  { %s3079_s4 = sld [smem:[%s3600_s0 + %s2942_s28]]   ;;  %s2946_s28 = smov 25  }
  0x1f   :  { %3610 = sst [smem:[#allocation25_spill]] %s3069_s20 }
  0x20   :  { %3613 = sst [smem:[#allocation28_spill]] %s3084_s24 }
  0x21   :  { %s3089_s20 = sld [smem:[%s3600_s0 + %s2944_s15]]   ;;  %s2948_s15 = smov 27  }
  0x22   :  { %3611 = sst [smem:[#allocation26_spill]] %s3074_s27 }
  0x23   :  { %s3094_s27 = sld [smem:[%s3600_s0 + %s2945_s22]]   ;;  %s2949_s22 = smov 28  }
  0x24   :  { %3612 = sst [smem:[#allocation27_spill]] %s3079_s4 }
  0x25   :  { %s3099_s4 = sld [smem:[%s3600_s0 + %s2946_s28]]   ;;  %s2950_s28 = smov 29  }
  0x26   :  { %s3104_s24 = sld [smem:[%s3600_s0 + %s2947_s7]]   ;;  %s2951_s7 = smov 30  }
  0x27   :  { %3614 = sst [smem:[#allocation29_spill]] %s3089_s20 }
  0x28   :  { %s3109_s20 = sld [smem:[%s3600_s0 + %s2948_s15]]  }
  0x29   :  { %s3114_s19 = sld [smem:[%s3600_s0 + %s2949_s22]]  }
  0x2a   :  { %s3124_s30 = sld [smem:[%s3600_s0 + %s2951_s7]]  }
  0x2b   :  { %3615 = sst [smem:[#allocation30_spill]] %s3099_s4 }
  0x2c   :  { %s3119_s4 = sld [smem:[%s3600_s0 + %s2950_s28]]  }
  0x2d   :  { %66 = vsyncpa [#allocation5], 0 }
  0x2e   :  { %67 = vsyncpa [#allocation8], 0 }
  0x2f   :  { %68 = vsyncpa [#allocation11], 0  ;;  %s113_s15 = sshll.u32 %s3044_s12, 4  ;;  %s114_s15 = int_to_ptr.hbm [resolvable:$true] %s113_s15 }
  0x30   :  { %69 = vsyncpa [#allocation6], 0  ;;  %s2952_s16 = smov [#allocation7]   ;;  %s155_s22 = sshll.u32 %s3094_s27, 4  ;;  %s156_s22 = int_to_ptr.hbm [resolvable:$true] %s155_s22 }
  0x31   :  { %s115_s18 = sshll.u32 %s2952_s16, 4  ;;  %s2770_s23 = sshra.s32 %s114_s15, 4  ;;  %s116_s18 = int_to_ptr.vmem [resolvable:$true] %s115_s18  ;;  %s2771_s23 = int_to_ptr.hbm [resolvable:$true] %s2770_s23 }
  0x32   :  { %s2772_s26 = scalar_lea.hbm %s2771_s23, 512  ;;  %s2774_s0 = scalar_lea.hbm %s3044_s12, 512 }
  0x33   :  { %p2773_p0 = scmp.ne.s32.totalorder %s2771_s23, %s2772_s26  ;;  %p2775_p1 = scmp.lt.s32.totalorder %s2771_s23, %s3044_s12 }
  0x34   :  { %p2776_p2 = scmp.lt.s32.totalorder %s2774_s0, %s2772_s26 }
  0x36   :  { %p2777_p3 = por %p2776_p2, %p2775_p1 }
  0x38   :  { %p2778_p4 = pnand %p2777_p3, %p2773_p0 }
  0x3a   :  { %2781 = shalt.err (!%p2778_p4)
}
  0x3b   :  { %s2953_s28 = smov 128   ;;  %s2954_s1 = smov 8  }
  0x3c   :  { %121 = dma.hbm_to_vmem [thread:$0]  %s114_s15, 8192, %s116_s18, [#allocation8], %s2953_s28, %s2953_s28, %s2954_s1  }
  0x3d   :  { %s2955_s2 = smov [#allocation10]   ;;  %s2794_s10 = sshra.s32 %s156_s22, 4  ;;  %s2795_s10 = int_to_ptr.hbm [resolvable:$true] %s2794_s10 }
  0x3e   :  { %s157_s7 = sshll.u32 %s2955_s2, 4  ;;  %s2796_s11 = scalar_lea.hbm %s2795_s10, 512  ;;  %s158_s7 = int_to_ptr.vmem [resolvable:$true] %s157_s7 }
  0x3f   :  { %p2797_p5 = scmp.ne.s32.totalorder %s2795_s10, %s2796_s11  ;;  %s2798_s12 = scalar_lea.hbm %s3094_s27, 512 }
  0x40   :  { %p2799_p6 = scmp.lt.s32.totalorder %s2795_s10, %s3094_s27  ;;  %p2800_p7 = scmp.lt.s32.totalorder %s2798_s12, %s2796_s11 }
  0x42   :  { %p2801_p8 = por %p2800_p7, %p2799_p6 }
  0x44   :  { %p2802_p9 = pnand %p2801_p8, %p2797_p5 }
  0x46   :  { %2805 = shalt.err (!%p2802_p9)
}
  0x47   :  { %s2956_s16 = smov 512   ;;  %s2957_s15 = smov 32  }
  0x48   :  { %163 = dma.hbm_to_vmem [thread:$0]  %s156_s22, 8192, %s158_s7, [#allocation11], %s2956_s16, %s2956_s16, %s2957_s15  }
  0x49   :  { %s86_s18 = sshll.u32 %s3004_s29, 4  ;;  %s2958_s23 = smov [#allocation4]   ;;  %s87_s18 = int_to_ptr.hbm [resolvable:$true] %s86_s18 }
  0x4a   :  { %s88_s26 = sshll.u32 %s2958_s23, 4  ;;  %s132_s0 = sshll.u32 %s3064_s6, 4  ;;  %s89_s26 = int_to_ptr.vmem [resolvable:$true] %s88_s26  ;;  %s133_s0 = int_to_ptr.hbm [resolvable:$true] %s132_s0 }
  0x4b   :  { %s2818_s2 = sshra.s32 %s87_s18, 4  ;;  %s2822_s10 = scalar_lea.hbm %s3004_s29, 384  ;;  %s2819_s2 = int_to_ptr.hbm [resolvable:$true] %s2818_s2 }
  0x4c   :  { %s2820_s27 = scalar_lea.hbm %s2819_s2, 384  ;;  %p2823_p11 = scmp.lt.s32.totalorder %s2819_s2, %s3004_s29 }
  0x4d   :  { %p2821_p10 = scmp.ne.s32.totalorder %s2819_s2, %s2820_s27  ;;  %p2824_p12 = scmp.lt.s32.totalorder %s2822_s10, %s2820_s27 }
  0x4f   :  { %p2825_p13 = por %p2824_p12, %p2823_p11 }
  0x51   :  { %p2826_p0 = pnand %p2825_p13, %p2821_p10 }
  0x53   :  { %2829 = shalt.err (!%p2826_p0)
}
  0x54   :  { %s2959_s11 = smov 384   ;;  %s2960_s22 = smov 24  }
  0x55   :  { %94 = dma.hbm_to_vmem [thread:$0]  %s87_s18, 6144, %s89_s26, [#allocation5], %s2959_s11, %s2959_s11, %s2960_s22  }
  0x56   :  { %s2961_s7 = smov [#allocation9]   ;;  %s170_s16 = sshll.u32 %s3104_s24, 4  ;;  %s171_s16 = int_to_ptr.hbm [resolvable:$true] %s170_s16 }
  0x57   :  { %s134_s12 = sshll.u32 %s2961_s7, 4  ;;  %s2842_s15 = sshra.s32 %s133_s0, 4  ;;  %s135_s12 = int_to_ptr.vmem [resolvable:$true] %s134_s12  ;;  %s2843_s15 = int_to_ptr.hbm [resolvable:$true] %s2842_s15 }
  0x58   :  { %s2844_s23 = scalar_lea.hbm %s2843_s15, 384  ;;  %s2846_s29 = scalar_lea.hbm %s3064_s6, 384 }
  0x59   :  { %p2845_p1 = scmp.ne.s32.totalorder %s2843_s15, %s2844_s23  ;;  %p2847_p2 = scmp.lt.s32.totalorder %s2843_s15, %s3064_s6 }
  0x5a   :  { %p2848_p3 = scmp.lt.s32.totalorder %s2846_s29, %s2844_s23 }
  0x5c   :  { %p2849_p4 = por %p2848_p3, %p2847_p2 }
  0x5e   :  { %p2850_p5 = pnand %p2849_p4, %p2845_p1 }
  0x60   :  { %2853 = shalt.err (!%p2850_p5)
}
  0x61   :  { %140 = dma.hbm_to_vmem [thread:$0]  %s133_s0, 6144, %s135_s12, [#allocation8], %s2959_s11, %s2959_s11, %s2960_s22  }
  0x62   :  { %s2962_s18 = smov [#allocation12]   ;;  %s2866_s2 = sshra.s32 %s171_s16, 4  ;;  %s2867_s2 = int_to_ptr.hbm [resolvable:$true] %s2866_s2 }
  0x63   :  { %s172_s26 = sshll.u32 %s2962_s18, 4  ;;  %s2868_s27 = scalar_lea.hbm %s2867_s2, 512  ;;  %s173_s26 = int_to_ptr.vmem [resolvable:$true] %s172_s26 }
  0x64   :  { %p2869_p6 = scmp.ne.s32.totalorder %s2867_s2, %s2868_s27  ;;  %s2870_s10 = scalar_lea.hbm %s3104_s24, 512 }
  0x65   :  { %p2871_p7 = scmp.lt.s32.totalorder %s2867_s2, %s3104_s24  ;;  %p2872_p8 = scmp.lt.s32.totalorder %s2870_s10, %s2868_s27 }
  0x67   :  { %p2873_p9 = por %p2872_p8, %p2871_p7 }
  0x69   :  { %p2874_p10 = pnand %p2873_p9, %p2869_p6 }
  0x6b   :  { %2877 = shalt.err (!%p2874_p10)
}
  0x6c   :  { %178 = dma.hbm_to_vmem [thread:$0]  %s171_s16, 8192, %s173_s26, [#allocation11], %s2953_s28, %s2953_s28, %s2954_s1  }
  0x6d   :  { %2914 = dma.done.wait [#allocation5], 6144  }
  0x6e   :  { %2915 = vsyncadd [#allocation5], 4294961152 }
  0x6f   :  { %2916 = dma.done.wait [#allocation8], 14336  }
  0x70   :  { %2917 = vsyncadd [#allocation8], 4294952960 }
  0x71   :  { %2918 = dma.done.wait [#allocation11], 16384  }
  0x72   :  { %2919 = vsyncadd [#allocation11], 4294950912  ;;  %vm212_vm0 = vcmask 64512   ;;  %v207_v0 = vld [vmem:[%s2979_s9] sm:$0xff]  ;;  %v206_v2 = vld [vmem:[%s2974_s5 + $0x8] sm:$0x3] }
  0x73   :  { %v205_v1 = vld [vmem:[%s2974_s5] sm:$0xff]  ;;  %234 = vmatpush.msra.mxu0 %v207_v0  ;;  %v243_v9 = vld [vmem:[%s2989_s17 + $0x8] sm:$0x3]  ;;  %vm250_vm1 = vcmask 1041408   ;;  %v2963_v13 = vmov 128.0   ;;  %v353_v16 = vld [vmem:[#allocation4 + $0x168] sm:$0xff] }
  0x74   :  { %2591 = vmatmul.msk.f32.vlgmr.msra.gmra.mxu0 %vm212_vm0, %v205_v1  ;;  %v2674_v3 = vld [vmem:[%s2984_s13] ss:$0 sm:$0xff]  ;;  %2688 = vrcp.f32 %v2963_v13  ;;  %v354_v17 = vld [vmem:[#allocation4 + $0x170] sm:$0xff]  ;;  %364 = vmatpush.msra.mxu1 %v353_v16  ;;  %v352_v22 = vld [vmem:[#allocation4 + $0x160] sm:$0xff]  ;;  %s2964_s5 = smov 64   ;;  %vm433_vm9 = vcmask 523264  }
  0x75   :  { %v242_v5 = vld [vmem:[%s2989_s17] sm:$0xff]  ;;  %387 = vmatpush.msra.mxu2 %v354_v17  ;;  %v350_v20 = vld [vmem:[#allocation4 + $0x150] sm:$0xff]  ;;  %v349_v37 = vld [vmem:[#allocation4 + $0x148] sm:$0xff]  ;;  %vm490_vm10 = vcmask 1044480   ;;  %vm603_vm11 = vcmask 1042432   ;;  %vm461_vm12 = vcmask 36864  }
  0x76   :  { %v355_v18 = vld [vmem:[#allocation4 + $0x178] sm:$0xff]  ;;  %365 = vmatpush.msra.mxu1 %v350_v20  ;;  %v348_v36 = vld [vmem:[#allocation4 + $0x140] sm:$0xff]  ;;  %v345_v39 = vld [vmem:[#allocation4 + $0x128] sm:$0xff]  ;;  %s3616_s9 = sld [smem:[#allocation20_spill]]  ;;  %s2549_s11 = sshll.u32 %s3124_s30, 4  ;;  %s2550_s11 = int_to_ptr.hbm [resolvable:$true] %s2549_s11 }
  0x77   :  { %v351_v21 = vld [vmem:[#allocation4 + $0x158] sm:$0xff]  ;;  %410 = vmatpush.msra.mxu3 %v355_v18  ;;  %v344_v38 = vld [vmem:[#allocation4 + $0x120] sm:$0xff]  ;;  %v346_v40 = vld [vmem:[#allocation4 + $0x130] sm:$0xff]  ;;  %s3617_s13 = sld [smem:[#allocation18_spill]]  ;;  %s2906_s7 = scalar_lea.hbm %s3124_s30, 2 }
  0x78   :  { %388 = vmatpush.msra.mxu2 %v351_v21  ;;  %v347_v35 = vld [vmem:[#allocation4 + $0x138] sm:$0xff]  ;;  %v341_v41 = vld [vmem:[#allocation4 + $0x108] sm:$0xff]  ;;  %v342_v42 = vld [vmem:[#allocation4 + $0x110] sm:$0xff]  ;;  %s3618_s17 = sld [smem:[#allocation19_spill]] }
  0x79   :  { %411 = vmatpush.msra.mxu3 %v352_v22  ;;  %366 = vmatpush.msra.mxu1 %v347_v35  ;;  %v343_v43 = vld [vmem:[#allocation4 + $0x118] sm:$0xff]  ;;  %v338_v44 = vld [vmem:[#allocation4 + $0xf0] sm:$0xff]  ;;  %v340_v46 = vld [vmem:[#allocation4 + $0x100] sm:$0xff]  ;;  %s3624_s24 = sld [smem:[#allocation26_spill]] }
  0x7a   :  { %v2689_v14 = vpop.eup %2688  ;;  %389 = vmatpush.msra.mxu2 %v348_v36  ;;  %v339_v45 = vld [vmem:[#allocation4 + $0xf8] sm:$0xff]  ;;  %v336_v48 = vld [vmem:[#allocation4 + $0xe0] sm:$0xff]  ;;  %v337_v49 = vld [vmem:[#allocation4 + $0xe8] sm:$0xff]  ;;  %s3625_s6 = sld [smem:[#allocation27_spill]] }
  0x7b   :  { %v255_v15 = vmul.f32 128.0, %v2689_v14  ;;  %vm259_vm2 = vweird.f32 %v2689_v14  ;;  %412 = vmatpush.msra.mxu3 %v349_v37  ;;  %367 = vmatpush.msra.mxu1 %v344_v38  ;;  %v335_v47 = vld [vmem:[#allocation4 + $0xd8] sm:$0xff]  ;;  %v332_v50 = vld [vmem:[#allocation4 + $0xc0] sm:$0xff]  ;;  %v333_v51 = vld [vmem:[#allocation4 + $0xc8] sm:$0xff]  ;;  %s3626_s28 = sld [smem:[#allocation28_spill]] }
  0x7c   :  { %2592 = vmatmul.msk.f32.gmra.mxu0 %vm212_vm0, %v206_v2  ;;  %390 = vmatpush.msra.mxu2 %v345_v39  ;;  %v334_v52 = vld [vmem:[#allocation4 + $0xd0] sm:$0xff]  ;;  %v329_v53 = vld [vmem:[#allocation4 + $0xa8] sm:$0xff]  ;;  %v331_v55 = vld [vmem:[#allocation4 + $0xb8] sm:$0xff]  ;;  %s3627_s1 = sld [smem:[#allocation29_spill]] }
  0x7d   :  { %v256_v19 = vsub.f32 1.0, %v255_v15  ;;  %413 = vmatpush.msra.mxu3 %v346_v40  ;;  %368 = vmatpush.msra.mxu1 %v341_v41  ;;  %v330_v54 = vld [vmem:[#allocation4 + $0xb0] sm:$0xff]  ;;  %v327_v57 = vld [vmem:[#allocation4 + $0x98] sm:$0xff]  ;;  %v328_v58 = vld [vmem:[#allocation4 + $0xa0] sm:$0xff]  ;;  %s3628_s0 = sld [smem:[#allocation30_spill]] }
  0x7e   :  { %391 = vmatpush.msra.mxu2 %v342_v42  ;;  %v326_v56 = vld [vmem:[#allocation4 + $0x90] sm:$0xff]  ;;  %v323_v59 = vld [vmem:[#allocation4 + $0x78] sm:$0xff]  ;;  %v324_v60 = vld [vmem:[#allocation4 + $0x80] sm:$0xff] }
  0x7f   :  { %v257_v23 = vmul.f32 %v2689_v14, %v256_v19  ;;  %414 = vmatpush.msra.mxu3 %v343_v43  ;;  %369 = vmatpush.msra.mxu1 %v338_v44  ;;  %v325_v61 = vld [vmem:[#allocation4 + $0x88] sm:$0xff]  ;;  %v320_v62 = vld [vmem:[#allocation4 + $0x60] sm:$0xff]  ;;  %v322_v0 = vld [vmem:[#allocation4 + $0x70] sm:$0xff] }
  0x80   :  { %392 = vmatpush.msra.mxu2 %v339_v45  ;;  %v321_v63 = vld [vmem:[#allocation4 + $0x68] sm:$0xff]  ;;  %v318_v2 = vld [vmem:[#allocation4 + $0x50] sm:$0xff]  ;;  %v2676_v35 = vld [vmem:[%s2999_s25] ss:$0 sm:$0xff]  ;;  %s3620_s25 = sld [smem:[#allocation22_spill]] }
  0x81   :  { %v258_v24 = vadd.f32 %v2689_v14, %v257_v23  ;;  %415 = vmatpush.msra.mxu3 %v340_v46  ;;  %370 = vmatpush.msra.mxu1 %v335_v47  ;;  %v317_v1 = vld [vmem:[#allocation4 + $0x48] sm:$0xff] }
  0x82   :  { %393 = vmatpush.msra.mxu2 %v336_v48  ;;  %v309_v13 = vld [vmem:[#allocation4 + $0x8] sm:$0xff] }
  0x83   :  { %v3160_v25 = vsel %vm259_vm2, %v2689_v14, %v258_v24  ;;  %416 = vmatpush.msra.mxu3 %v337_v49  ;;  %371 = vmatpush.msra.mxu1 %v332_v50  ;;  %v310_v14 = vld [vmem:[#allocation4 + $0x10] sm:$0xff]  ;;  %vm486_vm2 = vcmask 39936  }
  0x84   :  { %394 = vmatpush.msra.mxu2 %v333_v51 }
  0x85   :  { %417 = vmatpush.msra.mxu3 %v334_v52  ;;  %372 = vmatpush.msra.mxu1 %v329_v53 }
  0x86   :  { %395 = vmatpush.msra.mxu2 %v330_v54 }
  0x87   :  { %418 = vmatpush.msra.mxu3 %v331_v55  ;;  %373 = vmatpush.msra.mxu1 %v326_v56 }
  0x88   :  { %396 = vmatpush.msra.mxu2 %v327_v57 }
  0x89   :  { %419 = vmatpush.msra.mxu3 %v328_v58  ;;  %374 = vmatpush.msra.mxu1 %v323_v59 }
  0x8a   :  { %397 = vmatpush.msra.mxu2 %v324_v60 }
  0x8b   :  { %420 = vmatpush.msra.mxu3 %v325_v61  ;;  %375 = vmatpush.msra.mxu1 %v320_v62 }
  0x8c   :  { %398 = vmatpush.msra.mxu2 %v321_v63 }
  0x8d   :  { %421 = vmatpush.msra.mxu3 %v322_v0  ;;  %376 = vmatpush.msra.mxu1 %v317_v1 }
  0x8e   :  { %399 = vmatpush.msra.mxu2 %v318_v2 }
  0xf1   :  { %v236_v4 = vpop.f32.mrf.mxu0 }
  0xf2   :  { %v237_v6 = vadd.f32 %v2674_v3, %v236_v4  ;;  %v314_v4 = vld [vmem:[#allocation4 + $0x30] sm:$0xff] }
  0xf3   :  { %377 = vmatpush.msra.mxu1 %v314_v4 }
  0xf4   :  { %v3152_v7 = vadd.f32 %v242_v5, %v237_v6  ;;  %v315_v5 = vld [vmem:[#allocation4 + $0x38] sm:$0xff]  ;;  %v316_v6 = vld [vmem:[#allocation4 + $0x40] sm:$0xff] }
  0xf5   :  { %400 = vmatpush.msra.mxu2 %v315_v5 }
  0xf6   :  { %248 = vadd.xlane.f32.xlu0 %v3152_v7 }
  0xf9   :  { %v239_v8 = vpop.f32.mrf.mxu0 }
  0xfa   :  { %v240_v10 = vadd.f32 %v2674_v3, %v239_v8  ;;  %v319_v3 = vld [vmem:[#allocation4 + $0x58] sm:$0xff] }
  0xfb   :  { %422 = vmatpush.msra.mxu3 %v319_v3  ;;  %v311_v8 = vld [vmem:[#allocation4 + $0x18] sm:$0xff] }
  0xfc   :  { %v3156_v11 = vadd.f32 %v243_v9, %v240_v10  ;;  %v312_v9 = vld [vmem:[#allocation4 + $0x20] sm:$0xff]  ;;  %v313_v10 = vld [vmem:[#allocation4 + $0x28] sm:$0xff]  ;;  %378 = vmatpush.msra.mxu1 %v311_v8 }
  0xfd   :  { %423 = vmatpush.msra.mxu3 %v316_v6  ;;  %401 = vmatpush.msra.mxu2 %v312_v9 }
  0xfe   :  { %v251_v12 = vsel %vm250_vm1, %v3156_v11, 0.0 }
  0xff   :  { %252 = vadd.xlane.f32.xlu1 %v251_v12  ;;  %424 = vmatpush.msra.mxu3 %v313_v10  ;;  %v308_v12 = vld [vmem:[#allocation4] sm:$0xff] }
 0x100   :  { %379 = vmatpush.msra.mxu1 %v308_v12  ;;  %402 = vmatpush.msra.mxu2 %v309_v13 }
 0x101   :  { %425 = vmatpush.msra.mxu3 %v310_v14 }
 0x169   :  { %v249_v26 = vpop.xlane.xlu0 %248 }
 0x16a   :  { %v261_v27 = vmul.f32 %v3160_v25, %v249_v26 }
 0x16c   :  { %v3164_v28 = vsub.f32 %v3152_v7, %v261_v27 }
 0x16e   :  { %v265_v29 = vmul.f32 %v3164_v28, %v3164_v28 }
 0x170   :  { %267 = vadd.xlane.f32.xlu0 %v265_v29 }
 0x172   :  { %v253_v30 = vpop.xlane.xlu1 %252 }
 0x173   :  { %v262_v31 = vmul.f32 %v3160_v25, %v253_v30  ;;  %v2675_v30 = vld [vmem:[%s2994_s21] ss:$0 sm:$0xff]  ;;  %s3619_s21 = sld [smem:[#allocation21_spill]] }
 0x175   :  { %v3170_v32 = vsub.f32 %v3156_v11, %v262_v31 }
 0x177   :  { %v266_v33 = vmul.f32 %v3170_v32, %v3170_v32 }
 0x179   :  { %v269_v34 = vsel %vm250_vm1, %v266_v33, 0.0 }
 0x17a   :  { %270 = vadd.xlane.f32.xlu1 %v269_v34 }
 0x1e3   :  { %v268_v15 = vpop.xlane.xlu0 %267 }
 0x1e4   :  { %v272_v16 = vmul.f32 %v268_v15, %v3160_v25 }
 0x1e6   :  { %v274_v17 = vadd.f32 1e-05, %v272_v16 }
 0x1e8   :  { %2690 = vrsqrt.f32 %v274_v17  ;;  %vm282_vm4 = vweird.f32 %v274_v17 }
 0x1ed   :  { %v271_v18 = vpop.xlane.xlu1 %270 }
 0x1ee   :  { %v2691_v19 = vpop.eup %2690  ;;  %v273_v20 = vmul.f32 %v271_v18, %v3160_v25 }
 0x1ef   :  { %v277_v21 = vmul.f32 %v2691_v19, %v274_v17  ;;  %vm283_vm3 = vweird.f32 %v2691_v19 }
 0x1f0   :  { %v275_v22 = vadd.f32 1e-05, %v273_v20  ;;  %vm284_vm5 = vmor %vm282_vm4, %vm283_vm3  ;;  %vm514_vm3 = vcmask 520192  }
 0x1f1   :  { %v278_v23 = vmul.f32 %v2691_v19, %v277_v21 }
 0x1f2   :  { %2692 = vrsqrt.f32 %v275_v22  ;;  %vm292_vm6 = vweird.f32 %v275_v22 }
 0x1f3   :  { %v279_v24 = vmul.f32 0.5, %v278_v23 }
 0x1f5   :  { %v280_v26 = vsub.f32 1.5, %v279_v24 }
 0x1f7   :  { %v281_v27 = vmul.f32 %v2691_v19, %v280_v26 }
 0x1f8   :  { %v2693_v29 = vpop.eup %2692 }
 0x1f9   :  { %v285_v31 = vsel %vm284_vm5, %v2691_v19, %v281_v27  ;;  %v287_v33 = vmul.f32 %v2693_v29, %v275_v22  ;;  %vm293_vm7 = vweird.f32 %v2693_v29 }
 0x1fa   :  { %v296_v34 = vmul.f32 %v285_v31, %v3164_v28  ;;  %vm294_vm8 = vmor %vm292_vm6, %vm293_vm7  ;;  %v356_v28 = vld [vmem:[%s3009_s3] sm:$0x7]  ;;  %s3621_s3 = sld [smem:[#allocation23_spill]] }
 0x1fb   :  { %v288_v36 = vmul.f32 %v2693_v29, %v287_v33  ;;  %v358_v46 = vperm.slane %v356_v28, 0  ;;  %v359_v49 = vperm.slane %v356_v28, 1  ;;  %v360_v50 = vperm.slane %v356_v28, 2 }
 0x1fc   :  { %v301_v37 = vmul.f32 %v2675_v30, %v296_v34 }
 0x1fd   :  { %v289_v38 = vmul.f32 0.5, %v288_v36 }
 0x1fe   :  { %v306_v39 = vadd.f32 %v2676_v35, %v301_v37 }
 0x1ff   :  { %v290_v40 = vsub.f32 1.5, %v289_v38 }
 0x200   :  { %380 = vmatmul.f32.vlgmr.msra.gmra.mxu1 %v306_v39  ;;  %403 = vmatmul.f32.vlgmr.msra.gmra.mxu2 %v306_v39 }
 0x201   :  { %v291_v41 = vmul.f32 %v2693_v29, %v290_v40  ;;  %426 = vmatmul.f32.vlgmr.msra.gmra.mxu3 %v306_v39 }
 0x203   :  { %v295_v42 = vsel %vm294_vm8, %v2693_v29, %v291_v41 }
 0x204   :  { %v297_v43 = vmul.f32 %v295_v42, %v3170_v32 }
 0x206   :  { %v302_v44 = vmul.f32 %v2675_v30, %v297_v43 }
 0x208   :  { %v307_v45 = vadd.f32 %v2676_v35, %v302_v44 }
 0x20a   :  { %383 = vmatmul.f32.gmra.mxu1 %v307_v45  ;;  %406 = vmatmul.f32.gmra.mxu2 %v307_v45 }
 0x20b   :  { %429 = vmatmul.f32.gmra.mxu3 %v307_v45 }
 0x27d   :  { %v381_v47 = vpop.f32.mrf.mxu1 }
 0x27e   :  { %v382_v48 = vadd.f32 %v381_v47, %v358_v46 }
 0x280   :  { %516 = vrot.lane.b32.xlu1 %v382_v48, %s2964_s5  ;;  %v604_v56 = vrot.slane %v382_v48, 5 }
 0x283   :  { %v404_v51 = vpop.f32.mrf.mxu2 }
 0x284   :  { %v405_v52 = vadd.f32 %v404_v51, %v359_v49  ;;  %v427_v53 = vpop.f32.mrf.mxu3 }
 0x285   :  { %v3183_v32 = vadd.f32 %v427_v53, %v360_v50 }
 0x286   :  { %518 = vrot.lane.b32.xlu0 %v405_v52, %s2964_s5  ;;  %2593 = vmatpush.xpose.msk.msrb.mxu0 %vm433_vm9, %v405_v52  ;;  %v608_v61 = vrot.slane %v405_v52, 5 }
 0x287   :  { %v384_v54 = vpop.f32.mrf.mxu1  ;;  %v661_v23 = vrot.slane %v3183_v32, 5 }
 0x288   :  { %v385_v55 = vadd.f32 %v384_v54, %v358_v46 }
 0x289   :  { %2594 = vmatmul.msk.f32.vlgmr.msrb.gmra.mxu0 %vm433_vm9, %v382_v48 }
 0x28a   :  { %2595 = vmatpush.msk.msra.mxu0 %vm490_vm10, %v3183_v32  ;;  %v605_v57 = vrot.slane %v385_v55, 5 }
 0x28c   :  { %v606_v58 = vsel %vm603_vm11, %v604_v56, %v605_v57 }
 0x28d   :  { %v407_v59 = vpop.f32.mrf.mxu2 }
 0x28e   :  { %v408_v60 = vadd.f32 %v407_v59, %v359_v49  ;;  %690 = vrot.lane.b32.xlu0 %v606_v58, %s2964_s5  ;;  %v430_v4 = vpop.f32.mrf.mxu3 }
 0x28f   :  { %v431_v21 = vadd.f32 %v430_v4, %v360_v50 }
 0x290   :  { %v609_v62 = vrot.slane %v408_v60, 5 }
 0x291   :  { %v662_v22 = vrot.slane %v431_v21, 5 }
 0x292   :  { %v610_v63 = vsel %vm603_vm11, %v608_v61, %v609_v62 }
 0x293   :  { %2601 = vmatpush.xpose.msk.msrb.mxu3 %vm433_vm9, %v610_v63  ;;  %v3206_v24 = vsel %vm603_vm11, %v661_v23, %v662_v22 }
 0x296   :  { %2602 = vmatmul.msk.f32.vlgmr.msrb.gmra.mxu3 %vm433_vm9, %v606_v58 }
 0x2f2   :  { %v517_v14 = vpop.permute.xlu1 %516 }
 0x2f8   :  { %v519_v0 = vpop.permute.xlu0 %518 }
 0x2f9   :  { %2597 = vmatpush.xpose.msk.msrb.mxu0 %vm433_vm9, %v519_v0 }
 0x300   :  { %v691_v33 = vpop.permute.xlu0 %690 }
 0x306   :  { %v457_v1 = vpop.f32.mrf.mxu0 }
 0x307   :  { %v460_v2 = vmul.f32 0.125, %v457_v1 }
 0x309   :  { %v462_v3 = vsel %vm461_vm12, %v460_v2, -inf }
 0x30a   :  { %463 = vmax.xlane.f32.xlu2 %v462_v3 }
 0x319   :  { %v632_v5 = vpop.f32.mrf.mxu3 }
 0x31a   :  { %v635_v6 = vmul.f32 0.125, %v632_v5 }
 0x31c   :  { %v636_v8 = vsel %vm461_vm12, %v635_v6, -inf }
 0x31d   :  { %637 = vmax.xlane.f32.xlu1 %v636_v8 }
 0x37d   :  { %v464_v9 = vpop.xlane.xlu2 %463 }
 0x37e   :  { %v465_v10 = vsub.f32 %v460_v2, %v464_v9 }
 0x380   :  { %v466_v12 = vmul.f32 1.442695, %v465_v10 }
 0x382   :  { %2694 = vpow2.f32 %v466_v12 }
 0x388   :  { %v2695_v13 = vpop.eup %2694 }
 0x389   :  { %v468_v15 = vsel %vm461_vm12, %v2695_v13, 0.0 }
 0x38a   :  { %469 = vadd.xlane.f32.xlu2 %v468_v15 }
 0x390   :  { %v638_v16 = vpop.xlane.xlu1 %637 }
 0x391   :  { %v639_v17 = vsub.f32 %v635_v6, %v638_v16 }
 0x393   :  { %v640_v18 = vmul.f32 1.442695, %v639_v17 }
 0x395   :  { %2696 = vpow2.f32 %v640_v18 }
 0x39b   :  { %v3199_v19 = vpop.eup %2696 }
 0x39c   :  { %v642_v20 = vsel %vm461_vm12, %v3199_v19, 0.0 }
 0x39d   :  { %643 = vadd.xlane.f32.xlu1 %v642_v20 }
 0x3a2   :  { %692 = vrot.lane.b32.xlu2 %v610_v63, %s2964_s5 }
 0x3b6   :  { %743 = vrot.lane.b32.xlu1 %v3206_v24, %s2964_s5 }
 0x3fd   :  { %v470_v26 = vpop.xlane.xlu2 %469 }
 0x3fe   :  { %2698 = vrcp.f32 %v470_v26  ;;  %v482_v34 = vand.u32 2147483648, %v470_v26  ;;  %v480_v36 = vand.u32 2147483647, %v470_v26  ;;  %vm476_vm14 = vweird.f32 %v470_v26 }
 0x400   :  { %v483_v38 = vor.u32 1.1754944e-38, %v482_v34  ;;  %vm481_vm0 = vcmp.eq.f32.partialorder %v480_v36, 8.507059e+37 }
 0x404   :  { %v2699_v27 = vpop.eup %2698 }
 0x405   :  { %v472_v29 = vmul.f32 %v2699_v27, %v470_v26  ;;  %v693_v30 = vpop.permute.xlu2 %692  ;;  %vm477_vm13 = vweird.f32 %v2699_v27 }
 0x406   :  { %2605 = vmatpush.xpose.msk.msra.mxu3 %vm433_vm9, %v693_v30  ;;  %vm478_vm15 = vmor %vm476_vm14, %vm477_vm13 }
 0x407   :  { %v473_v31 = vsub.f32 1.0, %v472_v29 }
 0x409   :  { %v474_v35 = vmul.f32 %v2699_v27, %v473_v31  ;;  %2606 = vmatmul.msk.f32.vlgmr.msra.gmra.mxu3 %vm433_vm9, %v691_v33 }
 0x40b   :  { %v475_v37 = vadd.f32 %v2699_v27, %v474_v35 }
 0x40d   :  { %v479_v39 = vsel %vm478_vm15, %v2699_v27, %v475_v37  ;;  %v792_v37 = vld [vmem:[%s3014_s8 + $0x78] sm:$0xff] }
 0x40e   :  { %v484_v40 = vsel %vm481_vm0, %v483_v38, %v479_v39  ;;  %v791_v38 = vld [vmem:[%s3014_s8 + $0x70] sm:$0xff]  ;;  %797 = vmatpush.msrb.mxu1 %v792_v37  ;;  %v790_v39 = vld [vmem:[%s3014_s8 + $0x68] sm:$0xff]  ;;  %v919_v37 = vld [vmem:[%s3616_s9 + $0x158] sm:$0xff] }
 0x40f   :  { %v485_v41 = vmul.f32 %v2695_v13, %v484_v40  ;;  %v788_v40 = vld [vmem:[%s3014_s8 + $0x58] sm:$0xff] }
 0x410   :  { %v644_v58 = vpop.xlane.xlu1 %643  ;;  %798 = vmatpush.msrb.mxu1 %v791_v38  ;;  %v912_v38 = vld [vmem:[%s3616_s9 + $0x120] sm:$0xff] }
 0x411   :  { %2596 = vmatmul.msk.f32.vlgmr.msra.gmra.mxu0 %vm486_vm2, %v485_v41  ;;  %v656_v16 = vand.u32 2147483648, %v644_v58  ;;  %vm650_vm13 = vweird.f32 %v644_v58  ;;  %v654_v18 = vand.u32 2147483647, %v644_v58  ;;  %v787_v41 = vld [vmem:[%s3014_s8 + $0x50] sm:$0xff] }
 0x412   :  { %799 = vmatpush.msrb.mxu1 %v790_v39  ;;  %v913_v39 = vld [vmem:[%s3616_s9 + $0x128] sm:$0xff] }
 0x413   :  { %vm655_vm15 = vcmp.eq.f32.partialorder %v654_v18, 8.507059e+37  ;;  %v928_v18 = vld [vmem:[%s3616_s9 + $0x1a0] sm:$0xff] }
 0x419   :  { %2598 = vmatmul.msk.f32.vlgmr.msrb.gmra.mxu0 %vm433_vm9, %v517_v14 }
 0x428   :  { %v744_v22 = vpop.permute.xlu1 %743 }
 0x48c   :  { %v715_v42 = vpop.f32.mrf.mxu3 }
 0x48d   :  { %v718_v43 = vmul.f32 0.125, %v715_v42  ;;  %v786_v42 = vld [vmem:[%s3014_s8 + $0x48] sm:$0xff] }
 0x48e   :  { %v511_v44 = vpop.f32.mrf.mxu0 }
 0x48f   :  { %515 = vst.msk [vmem:[#allocation2] sm:$0x1f] %vm514_vm3, %v511_v44  ;;  %v719_v45 = vsel %vm461_vm12, %v718_v43, -inf }
 0x490   :  { %720 = vmax.xlane.f32.xlu0 %v719_v45 }
 0x496   :  { %v541_v28 = vpop.f32.mrf.mxu0 }
 0x497   :  { %v544_v46 = vmul.f32 0.125, %v541_v28 }
 0x499   :  { %v545_v47 = vsel %vm461_vm12, %v544_v46, -inf }
 0x49a   :  { %546 = vmax.xlane.f32.xlu2 %v545_v47  ;;  %v783_v47 = vld [vmem:[%s3014_s8 + $0x30] sm:$0xff] }
 0x503   :  { %v721_v48 = vpop.xlane.xlu0 %720 }
 0x504   :  { %v722_v49 = vsub.f32 %v718_v43, %v721_v48  ;;  %v785_v43 = vld [vmem:[%s3014_s8 + $0x40] sm:$0xff]  ;;  %v782_v48 = vld [vmem:[%s3014_s8 + $0x28] sm:$0xff] }
 0x506   :  { %v723_v50 = vmul.f32 1.442695, %v722_v49  ;;  %v781_v49 = vld [vmem:[%s3014_s8 + $0x20] sm:$0xff] }
 0x508   :  { %2700 = vpow2.f32 %v723_v50  ;;  %v780_v50 = vld [vmem:[%s3014_s8 + $0x18] sm:$0xff] }
 0x50d   :  { %v547_v51 = vpop.xlane.xlu2 %546 }
 0x50e   :  { %v3217_v52 = vpop.eup %2700  ;;  %v548_v53 = vsub.f32 %v544_v46, %v547_v51  ;;  %v784_v46 = vld [vmem:[%s3014_s8 + $0x38] sm:$0xff]  ;;  %v779_v51 = vld [vmem:[%s3014_s8 + $0x10] sm:$0xff] }
 0x50f   :  { %v725_v54 = vsel %vm461_vm12, %v3217_v52, 0.0 }
 0x510   :  { %v549_v55 = vmul.f32 1.442695, %v548_v53  ;;  %726 = vadd.xlane.f32.xlu0 %v725_v54  ;;  %v777_v53 = vld [vmem:[%s3014_s8] sm:$0xff] }
 0x512   :  { %2702 = vpow2.f32 %v549_v55 }
 0x513   :  { %2704 = vrcp.f32 %v644_v58 }
 0x518   :  { %v2703_v56 = vpop.eup %2702 }
 0x519   :  { %v551_v57 = vsel %vm461_vm12, %v2703_v56, 0.0  ;;  %v2705_v59 = vpop.eup %2704 }
 0x51a   :  { %552 = vadd.xlane.f32.xlu2 %v551_v57  ;;  %v646_v62 = vmul.f32 %v2705_v59, %v644_v58  ;;  %vm651_vm6 = vweird.f32 %v2705_v59  ;;  %v2677_v58 = vld [vmem:[%s3019_s14] ss:$0 sm:$0xff]  ;;  %s3623_s14 = sld [smem:[#allocation25_spill]] }
 0x51b   :  { %vm652_vm14 = vmor %vm650_vm13, %vm651_vm6 }
 0x51c   :  { %v647_v0 = vsub.f32 1.0, %v646_v62 }
 0x532   :  { %569 = vrot.lane.b32.xlu2 %v3183_v32, %s2964_s5  ;;  %v648_v32 = vmul.f32 %v2705_v59, %v647_v0 }
 0x534   :  { %v649_v13 = vadd.f32 %v2705_v59, %v648_v32  ;;  %v932_v32 = vld [vmem:[%s3616_s9 + $0x1c0] sm:$0xff] }
 0x536   :  { %v653_v21 = vsel %vm652_vm14, %v2705_v59, %v649_v13 }
 0x583   :  { %v727_v60 = vpop.xlane.xlu0 %726 }
 0x584   :  { %v739_v29 = vand.u32 2147483648, %v727_v60  ;;  %v737_v30 = vand.u32 2147483647, %v727_v60 }
 0x586   :  { %v740_v34 = vor.u32 1.1754944e-38, %v739_v29  ;;  %vm738_vm6 = vcmp.eq.f32.partialorder %v737_v30, 8.507059e+37  ;;  %v920_v29 = vld [vmem:[%s3616_s9 + $0x160] sm:$0xff]  ;;  %v921_v30 = vld [vmem:[%s3616_s9 + $0x168] sm:$0xff] }
 0x58d   :  { %v553_v61 = vpop.xlane.xlu2 %552 }
 0x58e   :  { %2706 = vrcp.f32 %v553_v61  ;;  %v565_v5 = vand.u32 2147483648, %v553_v61  ;;  %v563_v9 = vand.u32 2147483647, %v553_v61  ;;  %vm559_vm5 = vweird.f32 %v553_v61 }
 0x58f   :  { %2708 = vrcp.f32 %v727_v60 }
 0x590   :  { %v566_v12 = vor.u32 1.1754944e-38, %v565_v5  ;;  %vm564_vm8 = vcmp.eq.f32.partialorder %v563_v9, 8.507059e+37  ;;  %v933_v5 = vld [vmem:[%s3616_s9 + $0x1c8] sm:$0xff] }
 0x594   :  { %v2707_v63 = vpop.eup %2706 }
 0x595   :  { %v555_v1 = vmul.f32 %v2707_v63, %v553_v61  ;;  %v570_v2 = vpop.permute.xlu2 %569  ;;  %v2709_v3 = vpop.eup %2708  ;;  %vm560_vm4 = vweird.f32 %v2707_v63 }
 0x596   :  { %2599 = vmatpush.msk.msra.mxu0 %vm490_vm10, %v570_v2  ;;  %v729_v6 = vmul.f32 %v2709_v3, %v727_v60  ;;  %vm561_vm7 = vmor %vm559_vm5, %vm560_vm4  ;;  %vm734_vm0 = vweird.f32 %v2709_v3  ;;  %vm733_vm4 = vweird.f32 %v727_v60  ;;  %v936_v2 = vld [vmem:[%s3616_s9 + $0x1e0] sm:$0xff] }
 0x597   :  { %v556_v4 = vsub.f32 1.0, %v555_v1  ;;  %vm735_vm5 = vmor %vm733_vm4, %vm734_vm0  ;;  %950 = vmatpush.msrb.mxu2 %v936_v2  ;;  %v884_v2 = vld [vmem:[%s3616_s9 + $0x40] sm:$0xff] }
 0x598   :  { %2603 = vmatpush.msk.msrb.mxu0 %vm490_vm10, %v3206_v24  ;;  %v730_v14 = vsub.f32 1.0, %v729_v6  ;;  %v657_v24 = vor.u32 1.1754944e-38, %v656_v16  ;;  %v934_v6 = vld [vmem:[%s3616_s9 + $0x1d0] sm:$0xff] }
 0x599   :  { %v557_v8 = vmul.f32 %v2707_v63, %v556_v4  ;;  %v938_v4 = vld [vmem:[%s3616_s9 + $0x1f0] sm:$0xff]  ;;  %951 = vmatpush.msrb.mxu2 %v932_v32  ;;  %v880_v32 = vld [vmem:[%s3616_s9 + $0x20] sm:$0xff] }
 0x59a   :  { %v731_v23 = vmul.f32 %v2709_v3, %v730_v14  ;;  %v658_v26 = vsel %vm655_vm15, %v657_v24, %v653_v21  ;;  %v930_v21 = vld [vmem:[%s3616_s9 + $0x1b0] sm:$0xff]  ;;  %v925_v24 = vld [vmem:[%s3616_s9 + $0x188] sm:$0xff] }
 0x59b   :  { %v558_v10 = vadd.f32 %v2707_v63, %v557_v8  ;;  %v659_v31 = vmul.f32 %v3199_v19, %v658_v26  ;;  %v789_v19 = vld [vmem:[%s3014_s8 + $0x60] sm:$0xff]  ;;  %v935_v8 = vld [vmem:[%s3616_s9 + $0x1d8] sm:$0xff]  ;;  %952 = vmatpush.msrb.mxu2 %v928_v18  ;;  %v926_v26 = vld [vmem:[%s3616_s9 + $0x190] sm:$0xff] }
 0x59c   :  { %v732_v27 = vadd.f32 %v2709_v3, %v731_v23  ;;  %800 = vmatpush.msrb.mxu1 %v789_v19  ;;  %v924_v23 = vld [vmem:[%s3616_s9 + $0x180] sm:$0xff]  ;;  %v914_v19 = vld [vmem:[%s3616_s9 + $0x130] sm:$0xff] }
 0x59d   :  { %v562_v15 = vsel %vm561_vm7, %v2707_v63, %v558_v10  ;;  %vm600_vm7 = vcmask 1044992   ;;  %953 = vmatpush.msrb.mxu2 %v924_v23  ;;  %v1161_v18 = vld [vmem:[#allocation7 + $0x178] sm:$0xff]  ;;  %v1159_v23 = vld [vmem:[#allocation7 + $0x168] sm:$0xff] }
 0x59e   :  { %v567_v17 = vsel %vm564_vm8, %v566_v12, %v562_v15  ;;  %v736_v33 = vsel %vm735_vm5, %v2709_v3, %v732_v27  ;;  %801 = vmatpush.msrb.mxu1 %v788_v40  ;;  %v937_v3 = vld [vmem:[%s3616_s9 + $0x1e8] sm:$0xff]  ;;  %v927_v27 = vld [vmem:[%s3616_s9 + $0x198] sm:$0xff] }
 0x59f   :  { %v568_v20 = vmul.f32 %v2703_v56, %v567_v17  ;;  %v741_v35 = vsel %vm738_vm6, %v740_v34, %v736_v33  ;;  %973 = vmatpush.msrb.mxu3 %v937_v3  ;;  %954 = vmatpush.msrb.mxu2 %v920_v29  ;;  %v923_v33 = vld [vmem:[%s3616_s9 + $0x178] sm:$0xff]  ;;  %v916_v34 = vld [vmem:[%s3616_s9 + $0x140] sm:$0xff]  ;;  %v885_v3 = vld [vmem:[%s3616_s9 + $0x48] sm:$0xff] }
 0x5a0   :  { %v742_v36 = vmul.f32 %v3217_v52, %v741_v35  ;;  %802 = vmatpush.msrb.mxu1 %v787_v41  ;;  %v778_v52 = vld [vmem:[%s3014_s8 + $0x8] sm:$0xff]  ;;  %v915_v40 = vld [vmem:[%s3616_s9 + $0x138] sm:$0xff]  ;;  %v908_v41 = vld [vmem:[%s3616_s9 + $0x100] sm:$0xff]  ;;  %s3622_s8 = sld [smem:[#allocation24_spill]] }
 0x5a1   :  { %2600 = vmatmul.msk.f32.vlgmr.msra.gmra.mxu0 %vm486_vm2, %v568_v20  ;;  %974 = vmatpush.msrb.mxu3 %v933_v5  ;;  %v929_v20 = vld [vmem:[%s3616_s9 + $0x1a8] sm:$0xff]  ;;  %v1145_v29 = vld [vmem:[#allocation7 + $0xf8] sm:$0xff] }
 0x5a2   :  { %2607 = vmatpush.msk.msra.mxu0 %vm490_vm10, %v744_v22  ;;  %803 = vmatpush.msrb.mxu1 %v786_v42  ;;  %v931_v22 = vld [vmem:[%s3616_s9 + $0x1b8] sm:$0xff]  ;;  %v917_v35 = vld [vmem:[%s3616_s9 + $0x148] sm:$0xff] }
 0x5a3   :  { %975 = vmatpush.msrb.mxu3 %v929_v20  ;;  %955 = vmatpush.msrb.mxu2 %v916_v34  ;;  %v909_v42 = vld [vmem:[%s3616_s9 + $0x108] sm:$0xff]  ;;  %v1177_v20 = vld [vmem:[#allocation7 + $0x1f8] sm:$0xff] }
 0x5a4   :  { %804 = vmatpush.msrb.mxu1 %v785_v43  ;;  %v910_v43 = vld [vmem:[%s3616_s9 + $0x110] sm:$0xff]  ;;  %v881_v5 = vld [vmem:[%s3616_s9 + $0x28] sm:$0xff] }
 0x5a5   :  { %976 = vmatpush.msrb.mxu3 %v925_v24  ;;  %956 = vmatpush.msrb.mxu2 %v912_v38  ;;  %v1158_v34 = vld [vmem:[#allocation7 + $0x160] sm:$0xff] }
 0x5a6   :  { %805 = vmatpush.msrb.mxu1 %v784_v46  ;;  %v906_v46 = vld [vmem:[%s3616_s9 + $0xf0] sm:$0xff] }
 0x5a7   :  { %977 = vmatpush.msrb.mxu3 %v921_v30  ;;  %957 = vmatpush.msrb.mxu2 %v908_v41  ;;  %v2678_v41 = vld [vmem:[%s3617_s13] ss:$0 sm:$0xff] }
 0x5a8   :  { %806 = vmatpush.msrb.mxu1 %v783_v47  ;;  %v907_v47 = vld [vmem:[%s3616_s9 + $0xf8] sm:$0xff] }
 0x5a9   :  { %2604 = vmatmul.msk.f32.vlgmr.msrb.gmra.mxu0 %vm486_vm2, %v659_v31  ;;  %v922_v31 = vld [vmem:[%s3616_s9 + $0x170] sm:$0xff]  ;;  %978 = vmatpush.msrb.mxu3 %v917_v35  ;;  %v1174_v35 = vld [vmem:[#allocation7 + $0x1e0] sm:$0xff] }
 0x5aa   :  { %807 = vmatpush.msrb.mxu1 %v782_v48  ;;  %996 = vmatpush.msrb.mxu0 %v938_v4  ;;  %v900_v48 = vld [vmem:[%s3616_s9 + $0xc0] sm:$0xff]  ;;  %v886_v4 = vld [vmem:[%s3616_s9 + $0x50] sm:$0xff] }
 0x5ab   :  { %979 = vmatpush.msrb.mxu3 %v913_v39 }
 0x5ac   :  { %808 = vmatpush.msrb.mxu1 %v781_v49  ;;  %997 = vmatpush.msrb.mxu0 %v934_v6  ;;  %v901_v49 = vld [vmem:[%s3616_s9 + $0xc8] sm:$0xff]  ;;  %v882_v6 = vld [vmem:[%s3616_s9 + $0x30] sm:$0xff] }
 0x5ad   :  { %980 = vmatpush.msrb.mxu3 %v909_v42 }
 0x5ae   :  { %809 = vmatpush.msrb.mxu1 %v780_v50  ;;  %998 = vmatpush.msrb.mxu0 %v930_v21  ;;  %v902_v50 = vld [vmem:[%s3616_s9 + $0xd0] sm:$0xff] }
 0x5af   :  { %v1160_v21 = vld [vmem:[#allocation7 + $0x170] sm:$0xff] }
 0x5b0   :  { %810 = vmatpush.msrb.mxu1 %v779_v51  ;;  %999 = vmatpush.msrb.mxu0 %v926_v26  ;;  %v903_v51 = vld [vmem:[%s3616_s9 + $0xd8] sm:$0xff]  ;;  %v1175_v26 = vld [vmem:[#allocation7 + $0x1e8] sm:$0xff] }
 0x5b1   :  { %2608 = vmatmul.msk.f32.vlgmr.msra.gmra.mxu0 %vm486_vm2, %v742_v36  ;;  %v918_v36 = vld [vmem:[%s3616_s9 + $0x150] sm:$0xff] }
 0x5b2   :  { %811 = vmatpush.msrb.mxu1 %v778_v52  ;;  %1000 = vmatpush.msrb.mxu0 %v922_v31  ;;  %v896_v52 = vld [vmem:[%s3616_s9 + $0xa0] sm:$0xff] }
 0x5b4   :  { %812 = vmatpush.msrb.mxu1 %v777_v53  ;;  %1001 = vmatpush.msrb.mxu0 %v918_v36  ;;  %v897_v53 = vld [vmem:[%s3616_s9 + $0xa8] sm:$0xff] }
 0x5b6   :  { %1002 = vmatpush.msrb.mxu0 %v914_v19 }
 0x5b8   :  { %1003 = vmatpush.msrb.mxu0 %v910_v43 }
 0x5ba   :  { %1004 = vmatpush.msrb.mxu0 %v906_v46 }
 0x5bc   :  { %1005 = vmatpush.msrb.mxu0 %v902_v50 }
 0x61e   :  { %v593_v44 = vpop.f32.mrf.mxu0 }
 0x61f   :  { %597 = vrot.lane.b32.xlu0 %v593_v44, %s2964_s5  ;;  %v911_v44 = vld [vmem:[%s3616_s9 + $0x118] sm:$0xff] }
 0x626   :  { %v686_v45 = vpop.f32.mrf.mxu0 }
 0x627   :  { %689 = vst.msk [vmem:[#allocation2 + $0x5] sm:$0x1f] %vm514_vm3, %v686_v45  ;;  %v904_v45 = vld [vmem:[%s3616_s9 + $0xe0] sm:$0xff] }
 0x628   :  { %958 = vmatpush.msrb.mxu2 %v904_v45  ;;  %v2679_v45 = vld [vmem:[%s3618_s17] ss:$0 sm:$0xff] }
 0x62a   :  { %959 = vmatpush.msrb.mxu2 %v900_v48 }
 0x62c   :  { %960 = vmatpush.msrb.mxu2 %v896_v52 }
 0x62e   :  { %v767_v28 = vpop.f32.mrf.mxu0 }
 0x62f   :  { %771 = vrot.lane.b32.xlu2 %v767_v28, %s2964_s5  ;;  %v905_v28 = vld [vmem:[%s3616_s9 + $0xe8] sm:$0xff] }
 0x630   :  { %981 = vmatpush.msrb.mxu3 %v905_v28 }
 0x632   :  { %982 = vmatpush.msrb.mxu3 %v901_v49 }
 0x634   :  { %983 = vmatpush.msrb.mxu3 %v897_v53 }
 0x689   :  { %v772_v54 = vpop.permute.xlu2 %771 }
 0x68a   :  { %774 = vst.msk [vmem:[#allocation2 + $0x5] sm:$0x1f] %vm600_vm7, %v772_v54  ;;  %v898_v54 = vld [vmem:[%s3616_s9 + $0xb0] sm:$0xff] }
 0x68b   :  { %1006 = vmatpush.msrb.mxu0 %v898_v54 }
 0x691   :  { %v598_v55 = vpop.permute.xlu0 %597  ;;  %v776_v57 = vld [vmem:[#allocation2 + $0x8] sm:$0x3] }
 0x692   :  { %601 = vst.msk [vmem:[#allocation2] sm:$0x1f] %vm600_vm7, %v598_v55  ;;  %v899_v55 = vld [vmem:[%s3616_s9 + $0xb8] sm:$0xff] }
 0x699   :  { %v775_v56 = vld [vmem:[#allocation2] sm:$0xff] }
 0x69a   :  { %813 = vmatmul.f32.vlgmr.msrb.gmra.mxu1 %v775_v56  ;;  %v892_v56 = vld [vmem:[%s3616_s9 + $0x80] sm:$0xff] }
 0x69b   :  { %961 = vmatpush.msrb.mxu2 %v892_v56  ;;  %v1157_v56 = vld [vmem:[#allocation7 + $0x158] sm:$0xff] }
 0x6a2   :  { %816 = vmatmul.f32.gmra.mxu1 %v776_v57  ;;  %v893_v57 = vld [vmem:[%s3616_s9 + $0x88] sm:$0xff] }
 0x6a3   :  { %984 = vmatpush.msrb.mxu3 %v893_v57  ;;  %v1173_v57 = vld [vmem:[#allocation7 + $0x1d8] sm:$0xff] }
 0x717   :  { %v814_v59 = vpop.f32.mrf.mxu1 }
 0x718   :  { %v815_v60 = vadd.f32 %v2677_v58, %v814_v59  ;;  %v895_v59 = vld [vmem:[%s3616_s9 + $0x98] sm:$0xff] }
 0x71a   :  { %v3256_v61 = vadd.f32 %v815_v60, %v3152_v7  ;;  %v939_v7 = vld [vmem:[%s3616_s9 + $0x1f8] sm:$0xff]  ;;  %v888_v60 = vld [vmem:[%s3616_s9 + $0x60] sm:$0xff] }
 0x71b   :  { %1019 = vmatpush.msra.mxu1 %v939_v7  ;;  %962 = vmatpush.msrb.mxu2 %v888_v60  ;;  %v887_v7 = vld [vmem:[%s3616_s9 + $0x58] sm:$0xff] }
 0x71c   :  { %824 = vadd.xlane.f32.xlu0 %v3256_v61  ;;  %v1156_v60 = vld [vmem:[#allocation7 + $0x150] sm:$0xff] }
 0x71d   :  { %1020 = vmatpush.msra.mxu1 %v935_v8  ;;  %963 = vmatpush.msrb.mxu2 %v884_v2  ;;  %v883_v8 = vld [vmem:[%s3616_s9 + $0x38] sm:$0xff]  ;;  %v1171_v2 = vld [vmem:[#allocation7 + $0x1c8] sm:$0xff] }
 0x71f   :  { %v817_v62 = vpop.f32.mrf.mxu1  ;;  %1021 = vmatpush.msra.mxu1 %v931_v22  ;;  %964 = vmatpush.msrb.mxu2 %v880_v32  ;;  %v1176_v22 = vld [vmem:[#allocation7 + $0x1f0] sm:$0xff]  ;;  %v1170_v32 = vld [vmem:[#allocation7 + $0x1c0] sm:$0xff] }
 0x720   :  { %v818_v63 = vadd.f32 %v2677_v58, %v817_v62  ;;  %v894_v58 = vld [vmem:[%s3616_s9 + $0x90] sm:$0xff]  ;;  %v889_v62 = vld [vmem:[%s3616_s9 + $0x68] sm:$0xff] }
 0x721   :  { %1022 = vmatpush.msra.mxu1 %v927_v27  ;;  %1007 = vmatpush.msrb.mxu0 %v894_v58  ;;  %v1129_v27 = vld [vmem:[#allocation7 + $0x78] sm:$0xff]  ;;  %v1127_v58 = vld [vmem:[#allocation7 + $0x68] sm:$0xff] }
 0x722   :  { %v3260_v0 = vadd.f32 %v818_v63, %v3156_v11  ;;  %v890_v63 = vld [vmem:[%s3616_s9 + $0x70] sm:$0xff]  ;;  %985 = vmatpush.msrb.mxu3 %v889_v62  ;;  %v1126_v62 = vld [vmem:[#allocation7 + $0x60] sm:$0xff] }
 0x723   :  { %1023 = vmatpush.msra.mxu1 %v923_v33  ;;  %1008 = vmatpush.msrb.mxu0 %v890_v63  ;;  %v1142_v63 = vld [vmem:[#allocation7 + $0xe0] sm:$0xff] }
 0x724   :  { %v826_v1 = vsel %vm250_vm1, %v3260_v0, 0.0  ;;  %986 = vmatpush.msrb.mxu3 %v885_v3  ;;  %v1125_v3 = vld [vmem:[#allocation7 + $0x58] sm:$0xff] }
 0x725   :  { %827 = vadd.xlane.f32.xlu1 %v826_v1  ;;  %1024 = vmatpush.msra.mxu1 %v919_v37  ;;  %v891_v1 = vld [vmem:[%s3616_s9 + $0x78] sm:$0xff] }
 0x726   :  { %1009 = vmatpush.msrb.mxu0 %v886_v4  ;;  %987 = vmatpush.msrb.mxu3 %v881_v5  ;;  %v1141_v4 = vld [vmem:[#allocation7 + $0xd8] sm:$0xff]  ;;  %v1124_v5 = vld [vmem:[#allocation7 + $0x50] sm:$0xff] }
 0x727   :  { %1025 = vmatpush.msra.mxu1 %v915_v40 }
 0x728   :  { %1010 = vmatpush.msrb.mxu0 %v882_v6  ;;  %v1140_v6 = vld [vmem:[#allocation7 + $0xd0] sm:$0xff] }
 0x729   :  { %1026 = vmatpush.msra.mxu1 %v911_v44 }
 0x72b   :  { %1027 = vmatpush.msra.mxu1 %v907_v47 }
 0x72d   :  { %1028 = vmatpush.msra.mxu1 %v903_v51 }
 0x72f   :  { %1029 = vmatpush.msra.mxu1 %v899_v55  ;;  %v1144_v55 = vld [vmem:[#allocation7 + $0xf0] sm:$0xff] }
 0x731   :  { %1030 = vmatpush.msra.mxu1 %v895_v59  ;;  %v1143_v59 = vld [vmem:[#allocation7 + $0xe8] sm:$0xff] }
 0x733   :  { %1031 = vmatpush.msra.mxu1 %v891_v1  ;;  %v1155_v1 = vld [vmem:[#allocation7 + $0x148] sm:$0xff] }
 0x735   :  { %1032 = vmatpush.msra.mxu1 %v887_v7  ;;  %v1154_v7 = vld [vmem:[#allocation7 + $0x140] sm:$0xff] }
 0x737   :  { %1033 = vmatpush.msra.mxu1 %v883_v8  ;;  %v1153_v8 = vld [vmem:[#allocation7 + $0x138] sm:$0xff] }
 0x78f   :  { %v825_v11 = vpop.xlane.xlu0 %824 }
 0x790   :  { %v829_v9 = vmul.f32 %v825_v11, %v3160_v25  ;;  %v876_v11 = vld [vmem:[%s3616_s9] sm:$0xff] }
 0x791   :  { %965 = vmatpush.msrb.mxu2 %v876_v11  ;;  %v1169_v11 = vld [vmem:[#allocation7 + $0x1b8] sm:$0xff] }
 0x792   :  { %v3274_v10 = vsub.f32 %v3256_v61, %v829_v9  ;;  %v877_v9 = vld [vmem:[%s3616_s9 + $0x8] sm:$0xff] }
 0x793   :  { %988 = vmatpush.msrb.mxu3 %v877_v9  ;;  %1182 = vmatpush.msra.mxu2 %v1129_v27  ;;  %v1123_v9 = vld [vmem:[#allocation7 + $0x48] sm:$0xff]  ;;  %v1136_v27 = vld [vmem:[#allocation7 + $0xb0] sm:$0xff] }
 0x794   :  { %v833_v12 = vmul.f32 %v3274_v10, %v3274_v10 }
 0x795   :  { %1205 = vmatpush.msra.mxu3 %v1145_v29  ;;  %v1149_v29 = vld [vmem:[#allocation7 + $0x118] sm:$0xff] }
 0x796   :  { %835 = vadd.xlane.f32.xlu2 %v833_v12  ;;  %v878_v12 = vld [vmem:[%s3616_s9 + $0x10] sm:$0xff] }
 0x797   :  { %1011 = vmatpush.msrb.mxu0 %v878_v12  ;;  %1206 = vmatpush.msra.mxu3 %v1144_v55  ;;  %v1139_v12 = vld [vmem:[#allocation7 + $0xc8] sm:$0xff] }
 0x798   :  { %v828_v13 = vpop.xlane.xlu1 %827 }
 0x799   :  { %v830_v14 = vmul.f32 %v828_v13, %v3160_v25  ;;  %v879_v13 = vld [vmem:[%s3616_s9 + $0x18] sm:$0xff]  ;;  %1228 = vmatpush.msra.mxu0 %v1161_v18  ;;  %1207 = vmatpush.msra.mxu3 %v1143_v59  ;;  %v1151_v18 = vld [vmem:[#allocation7 + $0x128] sm:$0xff] }
 0x79a   :  { %1034 = vmatpush.msra.mxu1 %v879_v13  ;;  %v1152_v13 = vld [vmem:[#allocation7 + $0x130] sm:$0xff] }
 0x79b   :  { %v3280_v15 = vsub.f32 %v3260_v0, %v830_v14  ;;  %1229 = vmatpush.msra.mxu0 %v1160_v21  ;;  %1208 = vmatpush.msra.mxu3 %v1142_v63  ;;  %v1121_v21 = vld [vmem:[#allocation7 + $0x38] sm:$0xff] }
 0x79c   :  { %1251 = vmatpush.msrb.mxu1 %v1177_v20  ;;  %v1167_v20 = vld [vmem:[#allocation7 + $0x1a8] sm:$0xff] }
 0x79d   :  { %v834_v16 = vmul.f32 %v3280_v15, %v3280_v15  ;;  %1230 = vmatpush.msra.mxu0 %v1159_v23  ;;  %1209 = vmatpush.msra.mxu3 %v1141_v4  ;;  %v1150_v23 = vld [vmem:[#allocation7 + $0x120] sm:$0xff] }
 0x79e   :  { %1252 = vmatpush.msrb.mxu1 %v1176_v22  ;;  %v1137_v22 = vld [vmem:[#allocation7 + $0xb8] sm:$0xff] }
 0x79f   :  { %v837_v17 = vsel %vm250_vm1, %v834_v16, 0.0  ;;  %1231 = vmatpush.msra.mxu0 %v1158_v34  ;;  %1210 = vmatpush.msra.mxu3 %v1140_v6  ;;  %v1148_v34 = vld [vmem:[#allocation7 + $0x110] sm:$0xff] }
 0x7a0   :  { %838 = vadd.xlane.f32.xlu0 %v837_v17  ;;  %1253 = vmatpush.msrb.mxu1 %v1175_v26  ;;  %v1120_v26 = vld [vmem:[#allocation7 + $0x30] sm:$0xff] }
 0x7a1   :  { %1232 = vmatpush.msra.mxu0 %v1157_v56  ;;  %1211 = vmatpush.msra.mxu3 %v1139_v12 }
 0x7a2   :  { %1254 = vmatpush.msrb.mxu1 %v1174_v35  ;;  %v1164_v35 = vld [vmem:[#allocation7 + $0x190] sm:$0xff] }
 0x7a3   :  { %1233 = vmatpush.msra.mxu0 %v1156_v60 }
 0x7a4   :  { %1255 = vmatpush.msrb.mxu1 %v1173_v57 }
 0x7a5   :  { %1234 = vmatpush.msra.mxu0 %v1155_v1 }
 0x7a7   :  { %1235 = vmatpush.msra.mxu0 %v1154_v7 }
 0x7a9   :  { %1236 = vmatpush.msra.mxu0 %v1153_v8 }
 0x7ab   :  { %1237 = vmatpush.msra.mxu0 %v1152_v13 }
 0x7ad   :  { %1238 = vmatpush.msra.mxu0 %v1151_v18 }
 0x7af   :  { %1239 = vmatpush.msra.mxu0 %v1150_v23 }
 0x7b1   :  { %1240 = vmatpush.msra.mxu0 %v1149_v29 }
 0x7b3   :  { %1241 = vmatpush.msra.mxu0 %v1148_v34 }
 0x809   :  { %v836_v14 = vpop.xlane.xlu2 %835 }
 0x80a   :  { %v840_v16 = vmul.f32 %v836_v14, %v3160_v25  ;;  %v1168_v14 = vld [vmem:[#allocation7 + $0x1b0] sm:$0xff] }
 0x80c   :  { %v842_v17 = vadd.f32 1e-05, %v840_v16  ;;  %v1122_v16 = vld [vmem:[#allocation7 + $0x40] sm:$0xff] }
 0x80e   :  { %2710 = vrsqrt.f32 %v842_v17  ;;  %vm850_vm13 = vweird.f32 %v842_v17 }
 0x813   :  { %v839_v24 = vpop.xlane.xlu0 %838 }
 0x814   :  { %v2711_v30 = vpop.eup %2710  ;;  %v841_v31 = vmul.f32 %v839_v24, %v3160_v25  ;;  %v1166_v24 = vld [vmem:[#allocation7 + $0x1a0] sm:$0xff] }
 0x815   :  { %v845_v33 = vmul.f32 %v2711_v30, %v842_v17  ;;  %vm851_vm8 = vweird.f32 %v2711_v30  ;;  %v1138_v17 = vld [vmem:[#allocation7 + $0xc0] sm:$0xff] }
 0x816   :  { %v843_v36 = vadd.f32 1e-05, %v841_v31  ;;  %vm852_vm14 = vmor %vm850_vm13, %vm851_vm8  ;;  %1212 = vmatpush.msra.mxu3 %v1138_v17  ;;  %v1119_v31 = vld [vmem:[#allocation7 + $0x28] sm:$0xff] }
 0x817   :  { %v846_v37 = vmul.f32 %v2711_v30, %v845_v33  ;;  %v1135_v33 = vld [vmem:[#allocation7 + $0xa8] sm:$0xff] }
 0x818   :  { %2712 = vrsqrt.f32 %v843_v36  ;;  %vm860_vm0 = vweird.f32 %v843_v36  ;;  %1213 = vmatpush.msra.mxu3 %v1137_v22 }
 0x819   :  { %v847_v38 = vmul.f32 0.5, %v846_v37  ;;  %v1134_v37 = vld [vmem:[#allocation7 + $0xa0] sm:$0xff] }
 0x81a   :  { %1214 = vmatpush.msra.mxu3 %v1136_v27 }
 0x81b   :  { %v848_v39 = vsub.f32 1.5, %v847_v38  ;;  %v1147_v38 = vld [vmem:[#allocation7 + $0x108] sm:$0xff] }
 0x81c   :  { %1215 = vmatpush.msra.mxu3 %v1135_v33  ;;  %1242 = vmatpush.msra.mxu0 %v1147_v38 }
 0x81d   :  { %v849_v19 = vmul.f32 %v2711_v30, %v848_v39  ;;  %v1163_v39 = vld [vmem:[#allocation7 + $0x188] sm:$0xff] }
 0x81e   :  { %v2713_v40 = vpop.eup %2712  ;;  %1216 = vmatpush.msra.mxu3 %v1134_v37 }
 0x81f   :  { %v853_v42 = vsel %vm852_vm14, %v2711_v30, %v849_v19  ;;  %v855_v43 = vmul.f32 %v2713_v40, %v843_v36  ;;  %vm861_vm15 = vweird.f32 %v2713_v40  ;;  %v1165_v30 = vld [vmem:[#allocation7 + $0x198] sm:$0xff]  ;;  %v1118_v36 = vld [vmem:[#allocation7 + $0x20] sm:$0xff] }
 0x820   :  { %v864_v44 = vmul.f32 %v853_v42, %v3274_v10  ;;  %vm862_vm4 = vmor %vm860_vm0, %vm861_vm15  ;;  %v1128_v10 = vld [vmem:[#allocation7 + $0x70] sm:$0xff]  ;;  %v1117_v19 = vld [vmem:[#allocation7 + $0x18] sm:$0xff] }
 0x821   :  { %v856_v28 = vmul.f32 %v2713_v40, %v855_v43  ;;  %1183 = vmatpush.msra.mxu2 %v1128_v10  ;;  %v1162_v42 = vld [vmem:[#allocation7 + $0x180] sm:$0xff]  ;;  %v1116_v43 = vld [vmem:[#allocation7 + $0x10] sm:$0xff] }
 0x822   :  { %v869_v46 = vmul.f32 %v2678_v41, %v864_v44  ;;  %v1132_v44 = vld [vmem:[#allocation7 + $0x90] sm:$0xff] }
 0x823   :  { %v857_v47 = vmul.f32 0.5, %v856_v28  ;;  %1184 = vmatpush.msra.mxu2 %v1127_v58  ;;  %v940_v28 = vld [vmem:[%s3619_s21] sm:$0xf] }
 0x824   :  { %v874_v48 = vadd.f32 %v2679_v45, %v869_v46  ;;  %v1131_v46 = vld [vmem:[#allocation7 + $0x88] sm:$0xff]  ;;  %v942_v10 = vperm.slane %v940_v28, 0  ;;  %v943_v55 = vperm.slane %v940_v28, 1 }
 0x825   :  { %v858_v49 = vsub.f32 1.5, %v857_v47  ;;  %1185 = vmatpush.msra.mxu2 %v1126_v62  ;;  %v1114_v47 = vld [vmem:[#allocation7] sm:$0xff] }
 0x826   :  { %966 = vmatmul.f32.vlgmr.msrb.gmra.mxu2 %v874_v48  ;;  %989 = vmatmul.f32.vlgmr.msrb.gmra.mxu3 %v874_v48 }
 0x827   :  { %v859_v50 = vmul.f32 %v2713_v40, %v858_v49  ;;  %1012 = vmatmul.f32.vlgmr.msrb.gmra.mxu0 %v874_v48  ;;  %1035 = vmatmul.f32.vlgmr.msra.gmra.mxu1 %v874_v48  ;;  %v1130_v48 = vld [vmem:[#allocation7 + $0x80] sm:$0xff]  ;;  %v944_v49 = vperm.slane %v940_v28, 2 }
 0x828   :  { %1186 = vmatpush.msra.mxu2 %v1125_v3 }
 0x829   :  { %v863_v51 = vsel %vm862_vm4, %v2713_v40, %v859_v50  ;;  %v1133_v40 = vld [vmem:[#allocation7 + $0x98] sm:$0xff]  ;;  %v945_v50 = vperm.slane %v940_v28, 3 }
 0x82a   :  { %v865_v52 = vmul.f32 %v863_v51, %v3280_v15  ;;  %v1172_v15 = vld [vmem:[#allocation7 + $0x1d0] sm:$0xff]  ;;  %1187 = vmatpush.msra.mxu2 %v1124_v5  ;;  %1217 = vmatpush.msra.mxu3 %v1133_v40 }
 0x82b   :  { %1256 = vmatpush.msrb.mxu1 %v1172_v15 }
 0x82c   :  { %v870_v53 = vmul.f32 %v2678_v41, %v865_v52  ;;  %1188 = vmatpush.msra.mxu2 %v1123_v9  ;;  %v1146_v41 = vld [vmem:[#allocation7 + $0x100] sm:$0xff]  ;;  %1218 = vmatpush.msra.mxu3 %v1132_v44 }
 0x82d   :  { %1257 = vmatpush.msrb.mxu1 %v1171_v2  ;;  %1243 = vmatpush.msra.mxu0 %v1146_v41 }
 0x82e   :  { %v875_v54 = vadd.f32 %v2679_v45, %v870_v53  ;;  %1189 = vmatpush.msra.mxu2 %v1122_v16  ;;  %v1115_v45 = vld [vmem:[#allocation7 + $0x8] sm:$0xff]  ;;  %1219 = vmatpush.msra.mxu3 %v1131_v46 }
 0x82f   :  { %1258 = vmatpush.msrb.mxu1 %v1170_v32 }
 0x830   :  { %969 = vmatmul.f32.gmra.mxu2 %v875_v54  ;;  %992 = vmatmul.f32.gmra.mxu3 %v875_v54 }
 0x831   :  { %1015 = vmatmul.f32.gmra.mxu0 %v875_v54  ;;  %1038 = vmatmul.f32.gmra.mxu1 %v875_v54 }
 0x832   :  { %1259 = vmatpush.msrb.mxu1 %v1169_v11  ;;  %1190 = vmatpush.msra.mxu2 %v1121_v21 }
 0x833   :  { %1220 = vmatpush.msra.mxu3 %v1130_v48 }
 0x834   :  { %1260 = vmatpush.msrb.mxu1 %v1168_v14  ;;  %1191 = vmatpush.msra.mxu2 %v1120_v26 }
 0x836   :  { %1261 = vmatpush.msrb.mxu1 %v1167_v20  ;;  %1192 = vmatpush.msra.mxu2 %v1119_v31 }
 0x838   :  { %1262 = vmatpush.msrb.mxu1 %v1166_v24  ;;  %1193 = vmatpush.msra.mxu2 %v1118_v36 }
 0x83a   :  { %1263 = vmatpush.msrb.mxu1 %v1165_v30  ;;  %1194 = vmatpush.msra.mxu2 %v1117_v19 }
 0x83c   :  { %1264 = vmatpush.msrb.mxu1 %v1164_v35  ;;  %1195 = vmatpush.msra.mxu2 %v1116_v43 }
 0x83e   :  { %1265 = vmatpush.msrb.mxu1 %v1163_v39  ;;  %1196 = vmatpush.msra.mxu2 %v1115_v45 }
 0x840   :  { %1266 = vmatpush.msrb.mxu1 %v1162_v42  ;;  %1197 = vmatpush.msra.mxu2 %v1114_v47 }
 0x8a4   :  { %v1013_v51 = vpop.f32.mrf.mxu0  ;;  %v1036_v52 = vpop.f32.mrf.mxu1 }
 0x8a5   :  { %v1014_v53 = vadd.f32 %v1013_v51, %v944_v49  ;;  %v1037_v54 = vadd.f32 %v1036_v52, %v945_v50 }
 0x8a7   :  { %v1052_v56 = vmul.f32 0.044715, %v1014_v53  ;;  %v1053_v57 = vmul.f32 0.044715, %v1037_v54  ;;  %v1044_v40 = vmul.f32 0.5, %v1014_v53  ;;  %v1045_v42 = vmul.f32 0.5, %v1037_v54 }
 0x8a9   :  { %v1060_v58 = vmul.f32 %v1052_v56, %v1014_v53  ;;  %v1061_v59 = vmul.f32 %v1053_v57, %v1037_v54  ;;  %v967_v60 = vpop.f32.mrf.mxu2  ;;  %v990_v15 = vpop.f32.mrf.mxu3 }
 0x8aa   :  { %v968_v62 = vadd.f32 %v967_v60, %v942_v10  ;;  %v3348_v63 = vadd.f32 %v990_v15, %v943_v55 }
 0x8ab   :  { %v1068_v1 = vmul.f32 %v1060_v58, %v1014_v53  ;;  %v1069_v2 = vmul.f32 %v1061_v59, %v1037_v54 }
 0x8ac   :  { %v1050_v3 = vmul.f32 0.044715, %v968_v62  ;;  %v1051_v4 = vmul.f32 0.044715, %v3348_v63  ;;  %v1043_v57 = vmul.f32 0.5, %v3348_v63 }
 0x8ad   :  { %v1076_v7 = vadd.f32 %v1068_v1, %v1014_v53  ;;  %v1077_v32 = vadd.f32 %v1069_v2, %v1037_v54  ;;  %v1042_v53 = vmul.f32 0.5, %v968_v62 }
 0x8ae   :  { %v1058_v5 = vmul.f32 %v1050_v3, %v968_v62  ;;  %v1059_v6 = vmul.f32 %v1051_v4, %v3348_v63  ;;  %v1016_v8 = vpop.f32.mrf.mxu0  ;;  %v1039_v11 = vpop.f32.mrf.mxu1 }
 0x8af   :  { %v1017_v9 = vadd.f32 %v1016_v8, %v944_v49  ;;  %v3352_v12 = vadd.f32 %v1039_v11, %v945_v50  ;;  %v1084_v13 = vmul.f32 0.7978846, %v1076_v7  ;;  %v1085_v14 = vmul.f32 0.7978846, %v1077_v32 }
 0x8b0   :  { %v1066_v16 = vmul.f32 %v1058_v5, %v968_v62  ;;  %v1067_v17 = vmul.f32 %v1059_v6, %v3348_v63 }
 0x8b1   :  { %2714 = vtanh.f32 %v1084_v13  ;;  %v1056_v18 = vmul.f32 0.044715, %v1017_v9  ;;  %v1057_v22 = vmul.f32 0.044715, %v3352_v12  ;;  %v1048_v3 = vmul.f32 0.5, %v1017_v9 }
 0x8b2   :  { %2716 = vtanh.f32 %v1085_v14  ;;  %v1074_v20 = vadd.f32 %v1066_v16, %v968_v62  ;;  %v1075_v21 = vadd.f32 %v1067_v17, %v3348_v63  ;;  %v1049_v62 = vmul.f32 0.5, %v3352_v12 }
 0x8b3   :  { %v970_v23 = vpop.f32.mrf.mxu2  ;;  %v993_v24 = vpop.f32.mrf.mxu3  ;;  %v1064_v26 = vmul.f32 %v1056_v18, %v1017_v9  ;;  %v1065_v34 = vmul.f32 %v1057_v22, %v3352_v12 }
 0x8b4   :  { %v971_v27 = vadd.f32 %v970_v23, %v942_v10  ;;  %v994_v29 = vadd.f32 %v993_v24, %v943_v55  ;;  %v1082_v30 = vmul.f32 0.7978846, %v1074_v20  ;;  %v1083_v31 = vmul.f32 0.7978846, %v1075_v21 }
 0x8b5   :  { %v1072_v33 = vmul.f32 %v1064_v26, %v1017_v9  ;;  %v1073_v38 = vmul.f32 %v1065_v34, %v3352_v12 }
 0x8b6   :  { %2718 = vtanh.f32 %v1082_v30  ;;  %v1054_v35 = vmul.f32 0.044715, %v971_v27  ;;  %v1055_v39 = vmul.f32 0.044715, %v994_v29  ;;  %v1046_v11 = vmul.f32 0.5, %v971_v27 }
 0x8b7   :  { %v2715_v36 = vpop.eup %2714  ;;  %2720 = vtanh.f32 %v1083_v31  ;;  %v1080_v37 = vadd.f32 %v1072_v33, %v1017_v9  ;;  %v1081_v28 = vadd.f32 %v1073_v38, %v3352_v12  ;;  %v1047_v14 = vmul.f32 0.5, %v994_v29  ;;  %v2680_v9 = vld [vmem:[%s3620_s25] ss:$0 sm:$0xff] }
 0x8b8   :  { %v2717_v19 = vpop.eup %2716  ;;  %v1100_v41 = vadd.f32 1.0, %v2715_v36  ;;  %v1062_v43 = vmul.f32 %v1054_v35, %v971_v27  ;;  %v1063_v46 = vmul.f32 %v1055_v39, %v994_v29 }
 0x8b9   :  { %v1101_v44 = vadd.f32 1.0, %v2717_v19  ;;  %v1088_v45 = vmul.f32 0.7978846, %v1080_v37  ;;  %v1089_v50 = vmul.f32 0.7978846, %v1081_v28 }
 0x8ba   :  { %v1108_v47 = vmul.f32 %v1100_v41, %v1044_v40  ;;  %v1070_v48 = vmul.f32 %v1062_v43, %v971_v27  ;;  %v1071_v51 = vmul.f32 %v1063_v46, %v994_v29  ;;  %v1375_v40 = vld [vmem:[#allocation9 + $0x168] sm:$0xff]  ;;  %v1377_v41 = vld [vmem:[#allocation9 + $0x178] sm:$0xff] }
 0x8bb   :  { %v1109_v49 = vmul.f32 %v1101_v44, %v1045_v42  ;;  %2722 = vtanh.f32 %v1088_v45  ;;  %1386 = vmatpush.msrb.mxu2 %v1375_v40  ;;  %v1372_v42 = vld [vmem:[#allocation9 + $0x150] sm:$0xff]  ;;  %v1373_v43 = vld [vmem:[#allocation9 + $0x158] sm:$0xff]  ;;  %v1374_v44 = vld [vmem:[#allocation9 + $0x160] sm:$0xff]  ;;  %1432 = vmatpush.msrb.mxu0 %v1377_v41 }
 0x8bc   :  { %v2719_v52 = vpop.eup %2718  ;;  %1244 = vmatmul.f32.vlgmr.msra.gmra.mxu0 %v1108_v47  ;;  %v1078_v10 = vadd.f32 %v1070_v48, %v971_v27  ;;  %2724 = vtanh.f32 %v1089_v50  ;;  %v1079_v54 = vadd.f32 %v1071_v51, %v994_v29 }
 0x8bd   :  { %v2721_v55 = vpop.eup %2720  ;;  %1267 = vmatmul.f32.vlgmr.msrb.gmra.mxu1 %v1109_v49  ;;  %v1098_v56 = vadd.f32 1.0, %v2719_v52  ;;  %1387 = vmatpush.msrb.mxu2 %v1372_v42  ;;  %v1369_v52 = vld [vmem:[#allocation9 + $0x138] sm:$0xff] }
 0x8be   :  { %v1099_v58 = vadd.f32 1.0, %v2721_v55  ;;  %v1086_v59 = vmul.f32 0.7978846, %v1078_v10  ;;  %v1087_v15 = vmul.f32 0.7978846, %v1079_v54  ;;  %1433 = vmatpush.msrb.mxu0 %v1374_v44  ;;  %v1370_v10 = vld [vmem:[#allocation9 + $0x140] sm:$0xff] }
 0x8bf   :  { %v1106_v60 = vmul.f32 %v1098_v56, %v1042_v53  ;;  %v1371_v55 = vld [vmem:[#allocation9 + $0x148] sm:$0xff]  ;;  %1388 = vmatpush.msrb.mxu2 %v1369_v52  ;;  %v1366_v53 = vld [vmem:[#allocation9 + $0x120] sm:$0xff]  ;;  %v1368_v54 = vld [vmem:[#allocation9 + $0x130] sm:$0xff] }
 0x8c0   :  { %v1107_v1 = vmul.f32 %v1099_v58, %v1043_v57  ;;  %2726 = vtanh.f32 %v1086_v59  ;;  %1434 = vmatpush.msrb.mxu0 %v1371_v55  ;;  %v1367_v56 = vld [vmem:[#allocation9 + $0x128] sm:$0xff]  ;;  %v1364_v58 = vld [vmem:[#allocation9 + $0x110] sm:$0xff]  ;;  %v1365_v59 = vld [vmem:[#allocation9 + $0x118] sm:$0xff] }
 0x8c1   :  { %v2723_v2 = vpop.eup %2722  ;;  %1198 = vmatmul.f32.vlgmr.msra.gmra.mxu2 %v1106_v60  ;;  %2728 = vtanh.f32 %v1087_v15  ;;  %v1363_v57 = vld [vmem:[#allocation9 + $0x108] sm:$0xff]  ;;  %v1360_v60 = vld [vmem:[#allocation9 + $0xf0] sm:$0xff]  ;;  %v1361_v15 = vld [vmem:[#allocation9 + $0xf8] sm:$0xff] }
 0x8c2   :  { %1221 = vmatmul.f32.vlgmr.msra.gmra.mxu3 %v1107_v1  ;;  %v1104_v4 = vadd.f32 1.0, %v2723_v2  ;;  %v2725_v7 = vpop.eup %2724  ;;  %1389 = vmatpush.msrb.mxu2 %v1366_v53  ;;  %v1362_v1 = vld [vmem:[#allocation9 + $0x100] sm:$0xff]  ;;  %v1357_v2 = vld [vmem:[#allocation9 + $0xd8] sm:$0xff] }
 0x8c3   :  { %v1105_v5 = vadd.f32 1.0, %v2725_v7  ;;  %1435 = vmatpush.msrb.mxu0 %v1368_v54  ;;  %v1354_v7 = vld [vmem:[#allocation9 + $0xc0] sm:$0xff] }
 0x8c4   :  { %v1112_v32 = vmul.f32 %v1104_v4, %v1048_v3  ;;  %1390 = vmatpush.msrb.mxu2 %v1363_v57  ;;  %v1358_v3 = vld [vmem:[#allocation9 + $0xe0] sm:$0xff]  ;;  %v1359_v4 = vld [vmem:[#allocation9 + $0xe8] sm:$0xff] }
 0x8c5   :  { %v1113_v63 = vmul.f32 %v1105_v5, %v1049_v62  ;;  %1436 = vmatpush.msrb.mxu0 %v1365_v59  ;;  %v1356_v62 = vld [vmem:[#allocation9 + $0xd0] sm:$0xff]  ;;  %v1351_v5 = vld [vmem:[#allocation9 + $0xa8] sm:$0xff] }
 0x8c6   :  { %v2727_v6 = vpop.eup %2726  ;;  %1247 = vmatmul.f32.gmra.mxu0 %v1112_v32  ;;  %1391 = vmatpush.msrb.mxu2 %v1360_v60  ;;  %v1355_v32 = vld [vmem:[#allocation9 + $0xc8] sm:$0xff] }
 0x8c7   :  { %v2729_v8 = vpop.eup %2728  ;;  %v1102_v13 = vadd.f32 1.0, %v2727_v6  ;;  %1270 = vmatmul.f32.gmra.mxu1 %v1113_v63  ;;  %1437 = vmatpush.msrb.mxu0 %v1362_v1  ;;  %v1352_v6 = vld [vmem:[#allocation9 + $0xb0] sm:$0xff]  ;;  %v1353_v63 = vld [vmem:[#allocation9 + $0xb8] sm:$0xff] }
 0x8c8   :  { %v1103_v16 = vadd.f32 1.0, %v2729_v8  ;;  %1392 = vmatpush.msrb.mxu2 %v1357_v2  ;;  %v1348_v8 = vld [vmem:[#allocation9 + $0x90] sm:$0xff] }
 0x8c9   :  { %v1110_v17 = vmul.f32 %v1102_v13, %v1046_v11  ;;  %1438 = vmatpush.msrb.mxu0 %v1359_v4  ;;  %v1349_v11 = vld [vmem:[#allocation9 + $0x98] sm:$0xff]  ;;  %v1350_v13 = vld [vmem:[#allocation9 + $0xa0] sm:$0xff] }
 0x8ca   :  { %v1111_v18 = vmul.f32 %v1103_v16, %v1047_v14  ;;  %1393 = vmatpush.msrb.mxu2 %v1354_v7  ;;  %v1345_v14 = vld [vmem:[#allocation9 + $0x78] sm:$0xff]  ;;  %v1346_v16 = vld [vmem:[#allocation9 + $0x80] sm:$0xff] }
 0x8cb   :  { %1201 = vmatmul.f32.gmra.mxu2 %v1110_v17  ;;  %1439 = vmatpush.msrb.mxu0 %v1356_v62  ;;  %v1347_v17 = vld [vmem:[#allocation9 + $0x88] sm:$0xff] }
 0x8cc   :  { %1224 = vmatmul.f32.gmra.mxu3 %v1111_v18  ;;  %1394 = vmatpush.msrb.mxu2 %v1351_v5  ;;  %v1342_v18 = vld [vmem:[#allocation9 + $0x60] sm:$0xff] }
 0x8cd   :  { %1440 = vmatpush.msrb.mxu0 %v1353_v63 }
 0x8ce   :  { %1395 = vmatpush.msrb.mxu2 %v1348_v8 }
 0x8cf   :  { %1441 = vmatpush.msrb.mxu0 %v1350_v13 }
 0x8d0   :  { %1396 = vmatpush.msrb.mxu2 %v1345_v14 }
 0x8d1   :  { %1442 = vmatpush.msrb.mxu0 %v1347_v17 }
 0x8d2   :  { %1397 = vmatpush.msrb.mxu2 %v1342_v18 }
 0x939   :  { %v1245_v12 = vpop.f32.mrf.mxu0 }
 0x93a   :  { %v1268_v26 = vpop.f32.mrf.mxu1 }
 0x943   :  { %v1248_v35 = vpop.f32.mrf.mxu0 }
 0x944   :  { %v1199_v20 = vpop.f32.mrf.mxu2  ;;  %v1271_v37 = vpop.f32.mrf.mxu1 }
 0x945   :  { %v1200_v21 = vadd.f32 %v2680_v9, %v1199_v20  ;;  %v1222_v22 = vpop.f32.mrf.mxu3  ;;  %v1344_v20 = vld [vmem:[#allocation9 + $0x70] sm:$0xff] }
 0x946   :  { %1443 = vmatpush.msrb.mxu0 %v1344_v20 }
 0x947   :  { %v1223_v23 = vadd.f32 %v1222_v22, %v1200_v21  ;;  %v1339_v21 = vld [vmem:[#allocation9 + $0x48] sm:$0xff]  ;;  %v1340_v22 = vld [vmem:[#allocation9 + $0x50] sm:$0xff] }
 0x948   :  { %1398 = vmatpush.msrb.mxu2 %v1339_v21 }
 0x949   :  { %v1246_v24 = vadd.f32 %v1245_v12, %v1223_v23  ;;  %v1341_v23 = vld [vmem:[#allocation9 + $0x58] sm:$0xff]  ;;  %v1336_v12 = vld [vmem:[#allocation9 + $0x30] sm:$0xff] }
 0x94a   :  { %1444 = vmatpush.msrb.mxu0 %v1341_v23  ;;  %1399 = vmatpush.msrb.mxu2 %v1336_v12 }
 0x94b   :  { %v1269_v30 = vadd.f32 %v1268_v26, %v1246_v24  ;;  %v1337_v24 = vld [vmem:[#allocation9 + $0x38] sm:$0xff]  ;;  %v1338_v26 = vld [vmem:[#allocation9 + $0x40] sm:$0xff] }
 0x94c   :  { %1445 = vmatpush.msrb.mxu0 %v1338_v26 }
 0x94d   :  { %v3364_v31 = vadd.f32 %v1269_v30, %v3256_v61  ;;  %v1376_v61 = vld [vmem:[#allocation9 + $0x170] sm:$0xff]  ;;  %v1333_v30 = vld [vmem:[#allocation9 + $0x18] sm:$0xff] }
 0x94e   :  { %v1202_v27 = vpop.f32.mrf.mxu2  ;;  %1409 = vmatpush.msrb.mxu3 %v1376_v61  ;;  %1400 = vmatpush.msrb.mxu2 %v1333_v30 }
 0x94f   :  { %v1203_v33 = vadd.f32 %v2680_v9, %v1202_v27  ;;  %1278 = vadd.xlane.f32.xlu1 %v3364_v31  ;;  %v1225_v29 = vpop.f32.mrf.mxu3  ;;  %v1343_v9 = vld [vmem:[#allocation9 + $0x68] sm:$0xff]  ;;  %v1334_v27 = vld [vmem:[#allocation9 + $0x20] sm:$0xff] }
 0x950   :  { %1410 = vmatpush.msrb.mxu3 %v1373_v43 }
 0x951   :  { %v1226_v34 = vadd.f32 %v1225_v29, %v1203_v33  ;;  %v1335_v33 = vld [vmem:[#allocation9 + $0x28] sm:$0xff]  ;;  %v1330_v29 = vld [vmem:[#allocation9] sm:$0xff] }
 0x952   :  { %1411 = vmatpush.msrb.mxu3 %v1370_v10  ;;  %1446 = vmatpush.msrb.mxu0 %v1335_v33 }
 0x953   :  { %v1249_v36 = vadd.f32 %v1248_v35, %v1226_v34  ;;  %v1331_v34 = vld [vmem:[#allocation9 + $0x8] sm:$0xff]  ;;  %v1332_v35 = vld [vmem:[#allocation9 + $0x10] sm:$0xff]  ;;  %1401 = vmatpush.msrb.mxu2 %v1330_v29 }
 0x954   :  { %1412 = vmatpush.msrb.mxu3 %v1367_v56  ;;  %1447 = vmatpush.msrb.mxu0 %v1332_v35 }
 0x955   :  { %v1272_v38 = vadd.f32 %v1271_v37, %v1249_v36 }
 0x956   :  { %1413 = vmatpush.msrb.mxu3 %v1364_v58 }
 0x957   :  { %v3368_v39 = vadd.f32 %v1272_v38, %v3260_v0 }
 0x958   :  { %1414 = vmatpush.msrb.mxu3 %v1361_v15  ;;  %v1378_v15 = vld [vmem:[%s3623_s14] sm:$0x7] }
 0x959   :  { %v1280_v19 = vsel %vm250_vm1, %v3368_v39, 0.0  ;;  %v1382_v1 = vperm.slane %v1378_v15, 2  ;;  %v1380_v4 = vperm.slane %v1378_v15, 0  ;;  %v1381_v7 = vperm.slane %v1378_v15, 1 }
 0x95a   :  { %1281 = vadd.xlane.f32.xlu2 %v1280_v19  ;;  %1415 = vmatpush.msrb.mxu3 %v1358_v3 }
 0x95c   :  { %1416 = vmatpush.msrb.mxu3 %v1355_v32 }
 0x95e   :  { %1417 = vmatpush.msrb.mxu3 %v1352_v6 }
 0x960   :  { %1418 = vmatpush.msrb.mxu3 %v1349_v11 }
 0x962   :  { %1419 = vmatpush.msrb.mxu3 %v1346_v16 }
 0x964   :  { %1420 = vmatpush.msrb.mxu3 %v1343_v9 }
 0x966   :  { %1421 = vmatpush.msrb.mxu3 %v1340_v22 }
 0x968   :  { %1422 = vmatpush.msrb.mxu3 %v1337_v24 }
 0x96a   :  { %1423 = vmatpush.msrb.mxu3 %v1334_v27 }
 0x96c   :  { %1424 = vmatpush.msrb.mxu3 %v1331_v34 }
 0x9c2   :  { %v1279_v45 = vpop.xlane.xlu1 %1278 }
 0x9c3   :  { %v1283_v0 = vmul.f32 %v1279_v45, %v3160_v25 }
 0x9c5   :  { %v3374_v28 = vsub.f32 %v3364_v31, %v1283_v0 }
 0x9c7   :  { %v1287_v46 = vmul.f32 %v3374_v28, %v3374_v28 }
 0x9c9   :  { %1289 = vadd.xlane.f32.xlu0 %v1287_v46  ;;  %v2681_v46 = vld [vmem:[%s3621_s3] ss:$0 sm:$0xff] }
 0x9cd   :  { %v1282_v47 = vpop.xlane.xlu2 %1281 }
 0x9ce   :  { %v1284_v48 = vmul.f32 %v1282_v47, %v3160_v25 }
 0x9d0   :  { %v3380_v49 = vsub.f32 %v3368_v39, %v1284_v48 }
 0x9d2   :  { %v1288_v50 = vmul.f32 %v3380_v49, %v3380_v49 }
 0x9d4   :  { %v1291_v51 = vsel %vm250_vm1, %v1288_v50, 0.0 }
 0x9d5   :  { %1292 = vadd.xlane.f32.xlu1 %v1291_v51  ;;  %v2682_v51 = vld [vmem:[%s3622_s8] ss:$0 sm:$0xff] }
 0xa3c   :  { %v1290_v36 = vpop.xlane.xlu0 %1289 }
 0xa3d   :  { %v1294_v37 = vmul.f32 %v1290_v36, %v3160_v25 }
 0xa3f   :  { %v1296_v38 = vadd.f32 1e-05, %v1294_v37 }
 0xa41   :  { %2730 = vrsqrt.f32 %v1296_v38  ;;  %vm1304_vm6 = vweird.f32 %v1296_v38 }
 0xa47   :  { %v2731_v19 = vpop.eup %2730 }
 0xa48   :  { %v1299_v40 = vmul.f32 %v2731_v19, %v1296_v38  ;;  %v1293_v61 = vpop.xlane.xlu1 %1292  ;;  %vm1305_vm5 = vweird.f32 %v2731_v19 }
 0xa49   :  { %v1295_v41 = vmul.f32 %v1293_v61, %v3160_v25  ;;  %vm1306_vm8 = vmor %vm1304_vm6, %vm1305_vm5 }
 0xa4a   :  { %v1300_v42 = vmul.f32 %v2731_v19, %v1299_v40 }
 0xa4b   :  { %v1297_v43 = vadd.f32 1e-05, %v1295_v41 }
 0xa4c   :  { %v1301_v44 = vmul.f32 0.5, %v1300_v42 }
 0xa4d   :  { %2732 = vrsqrt.f32 %v1297_v43  ;;  %vm1314_vm14 = vweird.f32 %v1297_v43 }
 0xa4e   :  { %v1302_v45 = vsub.f32 1.5, %v1301_v44 }
 0xa50   :  { %v1303_v0 = vmul.f32 %v2731_v19, %v1302_v45 }
 0xa52   :  { %v1307_v47 = vsel %vm1306_vm8, %v2731_v19, %v1303_v0 }
 0xa53   :  { %v2733_v48 = vpop.eup %2732  ;;  %v1318_v50 = vmul.f32 %v1307_v47, %v3374_v28 }
 0xa54   :  { %v1309_v52 = vmul.f32 %v2733_v48, %v1297_v43  ;;  %vm1315_vm13 = vweird.f32 %v2733_v48 }
 0xa55   :  { %v1323_v10 = vmul.f32 %v2681_v46, %v1318_v50  ;;  %vm1316_vm15 = vmor %vm1314_vm14, %vm1315_vm13 }
 0xa56   :  { %v1310_v55 = vmul.f32 %v2733_v48, %v1309_v52 }
 0xa57   :  { %v1328_v53 = vadd.f32 %v2682_v51, %v1323_v10 }
 0xa58   :  { %v1311_v56 = vmul.f32 0.5, %v1310_v55 }
 0xa59   :  { %1402 = vmatmul.f32.vlgmr.msrb.gmra.mxu2 %v1328_v53  ;;  %1425 = vmatmul.f32.vlgmr.msrb.gmra.mxu3 %v1328_v53 }
 0xa5a   :  { %v1312_v54 = vsub.f32 1.5, %v1311_v56  ;;  %1448 = vmatmul.f32.vlgmr.msrb.gmra.mxu0 %v1328_v53 }
 0xa5c   :  { %v1313_v57 = vmul.f32 %v2733_v48, %v1312_v54 }
 0xa5e   :  { %v1317_v58 = vsel %vm1316_vm15, %v2733_v48, %v1313_v57 }
 0xa5f   :  { %v1319_v59 = vmul.f32 %v1317_v58, %v3380_v49 }
 0xa61   :  { %v1324_v60 = vmul.f32 %v2681_v46, %v1319_v59 }
 0xa63   :  { %v1329_v28 = vadd.f32 %v2682_v51, %v1324_v60 }
 0xa65   :  { %1405 = vmatmul.f32.gmra.mxu2 %v1329_v28  ;;  %1428 = vmatmul.f32.gmra.mxu3 %v1329_v28 }
 0xa66   :  { %1451 = vmatmul.f32.gmra.mxu0 %v1329_v28 }
 0xad7   :  { %v1449_v2 = vpop.f32.mrf.mxu0 }
 0xad8   :  { %v1450_v3 = vadd.f32 %v1449_v2, %v1382_v1 }
 0xada   :  { %2611 = vmatpush.msk.msra.mxu2 %vm490_vm10, %v1450_v3  ;;  %v1676_v8 = vrot.slane %v1450_v3, 5 }
 0xadc   :  { %v1403_v32 = vpop.f32.mrf.mxu2  ;;  %v1426_v62 = vpop.f32.mrf.mxu3 }
 0xadd   :  { %v1404_v5 = vadd.f32 %v1403_v32, %v1380_v4  ;;  %v1427_v6 = vadd.f32 %v1426_v62, %v1381_v7 }
 0xadf   :  { %2609 = vmatpush.xpose.msk.msra.mxu1 %vm433_vm9, %v1427_v6  ;;  %1533 = vrot.lane.b32.xlu0 %v1404_v5, %s2964_s5  ;;  %v1619_v9 = vrot.slane %v1404_v5, 5  ;;  %v1623_v20 = vrot.slane %v1427_v6, 5 }
 0xae0   :  { %1535 = vrot.lane.b32.xlu2 %v1427_v6, %s2964_s5 }
 0xae2   :  { %2610 = vmatmul.msk.f32.vlgmr.msra.gmra.mxu1 %vm433_vm9, %v1404_v5 }
 0xae3   :  { %v1452_v49 = vpop.f32.mrf.mxu0 }
 0xae4   :  { %v1453_v63 = vadd.f32 %v1452_v49, %v1382_v1 }
 0xae6   :  { %v1677_v11 = vrot.slane %v1453_v63, 5 }
 0xae8   :  { %v3398_v13 = vsel %vm603_vm11, %v1676_v8, %v1677_v11  ;;  %v1406_v14 = vpop.f32.mrf.mxu2  ;;  %v1429_v16 = vpop.f32.mrf.mxu3 }
 0xae9   :  { %v1407_v17 = vadd.f32 %v1406_v14, %v1380_v4  ;;  %v1430_v18 = vadd.f32 %v1429_v16, %v1381_v7  ;;  %2619 = vmatpush.msk.msrb.mxu2 %vm490_vm10, %v3398_v13 }
 0xaeb   :  { %v1620_v21 = vrot.slane %v1407_v17, 5  ;;  %v1624_v22 = vrot.slane %v1430_v18, 5 }
 0xaed   :  { %v1625_v23 = vsel %vm603_vm11, %v1623_v20, %v1624_v22  ;;  %v1621_v12 = vsel %vm603_vm11, %v1619_v9, %v1620_v21 }
 0xaee   :  { %1707 = vrot.lane.b32.xlu1 %v1625_v23, %s2964_s5  ;;  %2617 = vmatpush.xpose.msk.msrb.mxu1 %vm433_vm9, %v1625_v23 }
 0xaef   :  { %1705 = vrot.lane.b32.xlu0 %v1621_v12, %s2964_s5 }
 0xaf1   :  { %2618 = vmatmul.msk.f32.vlgmr.msrb.gmra.mxu1 %vm433_vm9, %v1621_v12 }
 0xb3a   :  { %v1536_v24 = vpop.permute.xlu2 %1535 }
 0xb3b   :  { %2613 = vmatpush.xpose.msk.msra.mxu3 %vm433_vm9, %v1536_v24 }
 0xb51   :  { %v1534_v26 = vpop.permute.xlu0 %1533 }
 0xb52   :  { %2614 = vmatmul.msk.f32.vlgmr.msra.gmra.mxu3 %vm433_vm9, %v1534_v26 }
 0xb5f   :  { %v1478_v30 = vpop.f32.mrf.mxu1 }
 0xb60   :  { %v1481_v27 = vmul.f32 0.125, %v1478_v30  ;;  %v1708_v33 = vpop.permute.xlu1 %1707 }
 0xb61   :  { %2621 = vmatpush.xpose.msk.msrb.mxu3 %vm433_vm9, %v1708_v33  ;;  %v1706_v34 = vpop.permute.xlu0 %1705 }
 0xb62   :  { %v1482_v29 = vsel %vm461_vm12, %v1481_v27, -inf }
 0xb63   :  { %1483 = vmax.xlane.f32.xlu0 %v1482_v29 }
 0xb64   :  { %2622 = vmatmul.msk.f32.vlgmr.msrb.gmra.mxu3 %vm433_vm9, %v1706_v34 }
 0xb6e   :  { %v1647_v38 = vpop.f32.mrf.mxu1 }
 0xb6f   :  { %v1650_v19 = vmul.f32 0.125, %v1647_v38 }
 0xb71   :  { %v1651_v40 = vsel %vm461_vm12, %v1650_v19, -inf }
 0xbd5   :  { %v1558_v35 = vpop.f32.mrf.mxu3 }
 0xbd6   :  { %v1561_v36 = vmul.f32 0.125, %v1558_v35  ;;  %v1484_v50 = vpop.xlane.xlu0 %1483 }
 0xbd7   :  { %v1485_v10 = vsub.f32 %v1481_v27, %v1484_v50 }
 0xbd8   :  { %v1562_v37 = vsel %vm461_vm12, %v1561_v36, -inf }
 0xbd9   :  { %1563 = vmax.xlane.f32.xlu2 %v1562_v37  ;;  %v1486_v53 = vmul.f32 1.442695, %v1485_v10  ;;  %v1807_v10 = vld [vmem:[%s3624_s24 + $0x78] sm:$0xff] }
 0xbda   :  { %1812 = vmatpush.msra.mxu1 %v1807_v10  ;;  %v1934_v10 = vld [vmem:[#allocation10 + $0x158] sm:$0xff] }
 0xbe1   :  { %1652 = vmax.xlane.f32.xlu2 %v1651_v40 }
 0xbe7   :  { %v1730_v61 = vpop.f32.mrf.mxu3 }
 0xbe8   :  { %v1733_v41 = vmul.f32 0.125, %v1730_v61 }
 0xbea   :  { %v1734_v42 = vsel %vm461_vm12, %v1733_v41, -inf }
 0xbeb   :  { %1735 = vmax.xlane.f32.xlu1 %v1734_v42 }
 0xbf9   :  { %1586 = vrot.lane.b32.xlu2 %v1450_v3, %s2964_s5 }
 0xc4c   :  { %v1564_v43 = vpop.xlane.xlu2 %1563 }
 0xc4d   :  { %v1565_v44 = vsub.f32 %v1561_v36, %v1564_v43 }
 0xc4f   :  { %v1566_v45 = vmul.f32 1.442695, %v1565_v44 }
 0xc51   :  { %2734 = vpow2.f32 %v1566_v45 }
 0xc54   :  { %v1653_v0 = vpop.xlane.xlu2 %1652 }
 0xc55   :  { %v1654_v54 = vsub.f32 %v1650_v19, %v1653_v0 }
 0xc57   :  { %v2735_v46 = vpop.eup %2734  ;;  %v1655_v58 = vmul.f32 1.442695, %v1654_v54  ;;  %v1803_v54 = vld [vmem:[%s3624_s24 + $0x58] sm:$0xff] }
 0xc58   :  { %v1568_v47 = vsel %vm461_vm12, %v2735_v46, 0.0 }
 0xc59   :  { %1569 = vadd.xlane.f32.xlu1 %v1568_v47 }
 0xc5c   :  { %v1587_v48 = vpop.permute.xlu2 %1586 }
 0xc5d   :  { %2615 = vmatpush.msk.msra.mxu0 %vm490_vm10, %v1587_v48 }
 0xc5e   :  { %v1736_v51 = vpop.xlane.xlu1 %1735 }
 0xc5f   :  { %v1737_v52 = vsub.f32 %v1733_v41, %v1736_v51 }
 0xc61   :  { %v1738_v55 = vmul.f32 1.442695, %v1737_v52 }
 0xc63   :  { %2736 = vpow2.f32 %v1738_v55  ;;  %v1806_v55 = vld [vmem:[%s3624_s24 + $0x70] sm:$0xff] }
 0xc64   :  { %2738 = vpow2.f32 %v1486_v53  ;;  %v1805_v53 = vld [vmem:[%s3624_s24 + $0x68] sm:$0xff]  ;;  %1813 = vmatpush.msra.mxu1 %v1806_v55 }
 0xc65   :  { %2740 = vpow2.f32 %v1655_v58  ;;  %v1927_v55 = vld [vmem:[#allocation10 + $0x120] sm:$0xff] }
 0xc66   :  { %1814 = vmatpush.msra.mxu1 %v1805_v53  ;;  %v1928_v53 = vld [vmem:[#allocation10 + $0x128] sm:$0xff] }
 0xc69   :  { %v2737_v56 = vpop.eup %2736 }
 0xc6a   :  { %v1740_v57 = vsel %vm461_vm12, %v2737_v56, 0.0  ;;  %v3420_v59 = vpop.eup %2738 }
 0xc6b   :  { %1741 = vadd.xlane.f32.xlu0 %v1740_v57  ;;  %v1488_v60 = vsel %vm461_vm12, %v3420_v59, 0.0  ;;  %v3426_v28 = vpop.eup %2740  ;;  %v1802_v57 = vld [vmem:[%s3624_s24 + $0x50] sm:$0xff] }
 0xc6c   :  { %v1657_v15 = vsel %vm461_vm12, %v3426_v28, 0.0 }
 0xc72   :  { %1758 = vrot.lane.b32.xlu1 %v3398_v13, %s2964_s5 }
 0xc73   :  { %1489 = vadd.xlane.f32.xlu0 %v1488_v60  ;;  %v1800_v60 = vld [vmem:[%s3624_s24 + $0x40] sm:$0xff] }
 0xc7b   :  { %1658 = vadd.xlane.f32.xlu0 %v1657_v15 }
 0xccc   :  { %v1570_v1 = vpop.xlane.xlu1 %1569 }
 0xccd   :  { %2742 = vrcp.f32 %v1570_v1  ;;  %v1582_v7 = vand.u32 2147483648, %v1570_v1  ;;  %v1580_v62 = vand.u32 2147483647, %v1570_v1  ;;  %vm1576_vm11 = vweird.f32 %v1570_v1 }
 0xccf   :  { %v1583_v6 = vor.u32 1.1754944e-38, %v1582_v7  ;;  %vm1581_vm4 = vcmp.eq.f32.partialorder %v1580_v62, 8.507059e+37  ;;  %v1795_v7 = vld [vmem:[%s3624_s24 + $0x18] sm:$0xff]  ;;  %v1793_v62 = vld [vmem:[%s3624_s24 + $0x8] sm:$0xff] }
 0xcd3   :  { %v2743_v2 = vpop.eup %2742 }
 0xcd4   :  { %v1572_v3 = vmul.f32 %v2743_v2, %v1570_v1  ;;  %vm1577_vm9 = vweird.f32 %v2743_v2 }
 0xcd5   :  { %vm1578_vm0 = vmor %vm1576_vm11, %vm1577_vm9 }
 0xcd6   :  { %v1573_v4 = vsub.f32 1.0, %v1572_v3  ;;  %v1797_v3 = vld [vmem:[%s3624_s24 + $0x28] sm:$0xff] }
 0xcd8   :  { %v1574_v32 = vmul.f32 %v2743_v2, %v1573_v4  ;;  %v1796_v4 = vld [vmem:[%s3624_s24 + $0x20] sm:$0xff] }
 0xcda   :  { %v1575_v5 = vadd.f32 %v2743_v2, %v1574_v32  ;;  %v1794_v32 = vld [vmem:[%s3624_s24 + $0x10] sm:$0xff] }
 0xcdc   :  { %v1579_v49 = vsel %vm1578_vm0, %v2743_v2, %v1575_v5  ;;  %v1798_v2 = vld [vmem:[%s3624_s24 + $0x30] sm:$0xff]  ;;  %v1792_v5 = vld [vmem:[%s3624_s24] sm:$0xff] }
 0xcdd   :  { %v1584_v63 = vsel %vm1581_vm4, %v1583_v6, %v1579_v49 }
 0xcde   :  { %v1742_v8 = vpop.xlane.xlu0 %1741  ;;  %v1585_v11 = vmul.f32 %v2735_v46, %v1584_v63 }
 0xcdf   :  { %2744 = vrcp.f32 %v1742_v8  ;;  %v1754_v9 = vand.u32 2147483648, %v1742_v8  ;;  %v1752_v21 = vand.u32 2147483647, %v1742_v8  ;;  %vm1748_vm5 = vweird.f32 %v1742_v8 }
 0xce0   :  { %2616 = vmatmul.msk.f32.vlgmr.msra.gmra.mxu0 %vm486_vm2, %v1585_v11  ;;  %v2683_v11 = vld [vmem:[%s3625_s6] ss:$0 sm:$0xff] }
 0xce1   :  { %v1755_v12 = vor.u32 1.1754944e-38, %v1754_v9  ;;  %vm1753_vm8 = vcmp.eq.f32.partialorder %v1752_v21, 8.507059e+37  ;;  %v1951_v21 = vld [vmem:[#allocation10 + $0x1e0] sm:$0xff] }
 0xce4   :  { %v1759_v13 = vpop.permute.xlu1 %1758 }
 0xce5   :  { %v2745_v14 = vpop.eup %2744  ;;  %2623 = vmatpush.msk.msrb.mxu0 %vm490_vm10, %v1759_v13 }
 0xce6   :  { %v1744_v16 = vmul.f32 %v2745_v14, %v1742_v8  ;;  %v1490_v17 = vpop.xlane.xlu0 %1489  ;;  %vm1749_vm12 = vweird.f32 %v2745_v14 }
 0xce7   :  { %2746 = vrcp.f32 %v1490_v17  ;;  %vm1750_vm6 = vmor %vm1748_vm5, %vm1749_vm12  ;;  %v1502_v34 = vand.u32 2147483648, %v1490_v17  ;;  %v1500_v36 = vand.u32 2147483647, %v1490_v17  ;;  %vm1496_vm13 = vweird.f32 %v1490_v17 }
 0xce8   :  { %v1745_v18 = vsub.f32 1.0, %v1744_v16 }
 0xce9   :  { %v1503_v19 = vor.u32 1.1754944e-38, %v1502_v34  ;;  %vm1501_vm15 = vcmp.eq.f32.partialorder %v1500_v36, 8.507059e+37 }
 0xcea   :  { %v1746_v20 = vmul.f32 %v2745_v14, %v1745_v18 }
 0xcec   :  { %v1747_v22 = vadd.f32 %v2745_v14, %v1746_v20 }
 0xced   :  { %v2747_v23 = vpop.eup %2746 }
 0xcee   :  { %v1751_v24 = vsel %vm1750_vm6, %v2745_v14, %v1747_v22  ;;  %v1492_v26 = vmul.f32 %v2747_v23, %v1490_v17  ;;  %v1659_v30 = vpop.xlane.xlu0 %1658  ;;  %vm1497_vm10 = vweird.f32 %v2747_v23  ;;  %v1952_v22 = vld [vmem:[#allocation10 + $0x1e8] sm:$0xff]  ;;  %vm2540_vm6 = vcmask 254976  }
 0xcef   :  { %v1756_v27 = vsel %vm1753_vm8, %v1755_v12, %v1751_v24  ;;  %2748 = vrcp.f32 %v1659_v30  ;;  %vm1498_vm14 = vmor %vm1496_vm13, %vm1497_vm10  ;;  %v1671_v44 = vand.u32 2147483648, %v1659_v30  ;;  %v1669_v0 = vand.u32 2147483647, %v1659_v30  ;;  %1988 = vmatpush.msra.mxu3 %v1952_v22  ;;  %v1954_v12 = vld [vmem:[#allocation10 + $0x1f8] sm:$0xff]  ;;  %v1947_v24 = vld [vmem:[#allocation10 + $0x1c0] sm:$0xff] }
 0xcf0   :  { %v1493_v33 = vsub.f32 1.0, %v1492_v26  ;;  %v1757_v29 = vmul.f32 %v2737_v56, %v1756_v27  ;;  %vm1665_vm11 = vweird.f32 %v1659_v30  ;;  %v1804_v56 = vld [vmem:[%s3624_s24 + $0x60] sm:$0xff]  ;;  %v1949_v26 = vld [vmem:[#allocation10 + $0x1d0] sm:$0xff]  ;;  %v1900_v22 = vld [vmem:[#allocation10 + $0x48] sm:$0xff] }
 0xcf1   :  { %v1672_v47 = vor.u32 1.1754944e-38, %v1671_v44  ;;  %vm1670_vm4 = vcmp.eq.f32.partialorder %v1669_v0, 8.507059e+37  ;;  %1815 = vmatpush.msra.mxu1 %v1804_v56  ;;  %v1941_v44 = vld [vmem:[#allocation10 + $0x190] sm:$0xff]  ;;  %v1935_v0 = vld [vmem:[#allocation10 + $0x160] sm:$0xff] }
 0xcf2   :  { %v1494_v35 = vmul.f32 %v2747_v23, %v1493_v33  ;;  %2624 = vmatmul.msk.f32.vlgmr.msrb.gmra.mxu0 %vm486_vm2, %v1757_v29  ;;  %v1929_v56 = vld [vmem:[#allocation10 + $0x130] sm:$0xff] }
 0xcf3   :  { %1816 = vmatpush.msra.mxu1 %v1803_v54  ;;  %v1930_v54 = vld [vmem:[#allocation10 + $0x138] sm:$0xff] }
 0xcf4   :  { %v1495_v37 = vadd.f32 %v2747_v23, %v1494_v35 }
 0xcf5   :  { %v2749_v38 = vpop.eup %2748  ;;  %1817 = vmatpush.msra.mxu1 %v1802_v57  ;;  %v1923_v57 = vld [vmem:[#allocation10 + $0x100] sm:$0xff] }
 0xcf6   :  { %v1499_v40 = vsel %vm1498_vm14, %v2747_v23, %v1495_v37  ;;  %v1661_v61 = vmul.f32 %v2749_v38, %v1659_v30  ;;  %vm1666_vm9 = vweird.f32 %v2749_v38  ;;  %v1953_v23 = vld [vmem:[#allocation10 + $0x1f0] sm:$0xff]  ;;  %v1950_v30 = vld [vmem:[#allocation10 + $0x1d8] sm:$0xff] }
 0xcf7   :  { %v1504_v41 = vsel %vm1501_vm15, %v1503_v19, %v1499_v40  ;;  %vm1667_vm0 = vmor %vm1665_vm11, %vm1666_vm9  ;;  %2011 = vmatpush.msra.mxu0 %v1953_v23  ;;  %v1943_v19 = vld [vmem:[#allocation10 + $0x1a0] sm:$0xff]  ;;  %v1944_v40 = vld [vmem:[#allocation10 + $0x1a8] sm:$0xff] }
 0xcf8   :  { %v1662_v42 = vsub.f32 1.0, %v1661_v61  ;;  %v1505_v43 = vmul.f32 %v3420_v59, %v1504_v41  ;;  %v1801_v59 = vld [vmem:[%s3624_s24 + $0x48] sm:$0xff]  ;;  %v1945_v61 = vld [vmem:[#allocation10 + $0x1b0] sm:$0xff]  ;;  %v1946_v41 = vld [vmem:[#allocation10 + $0x1b8] sm:$0xff] }
 0xcf9   :  { %1818 = vmatpush.msra.mxu1 %v1801_v59  ;;  %2012 = vmatpush.msra.mxu0 %v1949_v26  ;;  %v1925_v59 = vld [vmem:[#allocation10 + $0x110] sm:$0xff] }
 0xcfa   :  { %v1663_v45 = vmul.f32 %v2749_v38, %v1662_v42  ;;  %2612 = vmatmul.msk.f32.vlgmr.msra.gmra.mxu2 %vm486_vm2, %v1505_v43  ;;  %v1939_v42 = vld [vmem:[#allocation10 + $0x180] sm:$0xff]  ;;  %v1940_v43 = vld [vmem:[#allocation10 + $0x188] sm:$0xff]  ;;  %v1901_v23 = vld [vmem:[#allocation10 + $0x50] sm:$0xff] }
 0xcfb   :  { %1819 = vmatpush.msra.mxu1 %v1800_v60  ;;  %1965 = vmatpush.msra.mxu2 %v1951_v21  ;;  %v1926_v60 = vld [vmem:[#allocation10 + $0x118] sm:$0xff]  ;;  %v1899_v21 = vld [vmem:[#allocation10 + $0x40] sm:$0xff]  ;;  %v1897_v26 = vld [vmem:[#allocation10 + $0x30] sm:$0xff] }
 0xcfc   :  { %v1664_v46 = vadd.f32 %v2749_v38, %v1663_v45  ;;  %2013 = vmatpush.msra.mxu0 %v1945_v61  ;;  %v1942_v45 = vld [vmem:[#allocation10 + $0x198] sm:$0xff]  ;;  %v2175_v61 = vld [vmem:[#allocation12 + $0x170] sm:$0xff] }
 0xcfd   :  { %1966 = vmatpush.msra.mxu2 %v1947_v24  ;;  %v1895_v24 = vld [vmem:[#allocation10 + $0x20] sm:$0xff] }
 0xcfe   :  { %v1668_v48 = vsel %vm1667_vm0, %v2749_v38, %v1664_v46  ;;  %2014 = vmatpush.msra.mxu0 %v1941_v44  ;;  %v1936_v46 = vld [vmem:[#allocation10 + $0x168] sm:$0xff] }
 0xcff   :  { %v1673_v50 = vsel %vm1670_vm4, %v1672_v47, %v1668_v48  ;;  %1967 = vmatpush.msra.mxu2 %v1943_v19  ;;  %v1937_v47 = vld [vmem:[#allocation10 + $0x170] sm:$0xff]  ;;  %v1938_v48 = vld [vmem:[#allocation10 + $0x178] sm:$0xff]  ;;  %v2190_v44 = vld [vmem:[#allocation12 + $0x1e8] sm:$0xff] }
 0xd00   :  { %v1674_v51 = vmul.f32 %v3426_v28, %v1673_v50  ;;  %v1799_v28 = vld [vmem:[%s3624_s24 + $0x38] sm:$0xff]  ;;  %2015 = vmatpush.msra.mxu0 %v1937_v47  ;;  %v1931_v50 = vld [vmem:[#allocation10 + $0x140] sm:$0xff] }
 0xd01   :  { %1820 = vmatpush.msra.mxu1 %v1799_v28  ;;  %1968 = vmatpush.msra.mxu2 %v1939_v42  ;;  %v1919_v28 = vld [vmem:[#allocation10 + $0xe0] sm:$0xff]  ;;  %v2176_v19 = vld [vmem:[#allocation12 + $0x178] sm:$0xff]  ;;  %v2174_v42 = vld [vmem:[#allocation12 + $0x168] sm:$0xff] }
 0xd02   :  { %2620 = vmatmul.msk.f32.vlgmr.msrb.gmra.mxu2 %vm486_vm2, %v1674_v51  ;;  %v1932_v51 = vld [vmem:[#allocation10 + $0x148] sm:$0xff] }
 0xd03   :  { %1821 = vmatpush.msra.mxu1 %v1798_v2  ;;  %1969 = vmatpush.msra.mxu2 %v1935_v0  ;;  %v1922_v2 = vld [vmem:[#allocation10 + $0xf8] sm:$0xff] }
 0xd04   :  { %v2160_v0 = vld [vmem:[#allocation12 + $0xf8] sm:$0xff] }
 0xd05   :  { %1822 = vmatpush.msra.mxu1 %v1797_v3  ;;  %1970 = vmatpush.msra.mxu2 %v1931_v50  ;;  %v1915_v3 = vld [vmem:[#allocation10 + $0xc0] sm:$0xff] }
 0xd06   :  { %v2173_v50 = vld [vmem:[#allocation12 + $0x160] sm:$0xff] }
 0xd07   :  { %1823 = vmatpush.msra.mxu1 %v1796_v4  ;;  %1971 = vmatpush.msra.mxu2 %v1927_v55  ;;  %v1916_v4 = vld [vmem:[#allocation10 + $0xc8] sm:$0xff] }
 0xd09   :  { %1824 = vmatpush.msra.mxu1 %v1795_v7  ;;  %1972 = vmatpush.msra.mxu2 %v1923_v57  ;;  %v1917_v7 = vld [vmem:[#allocation10 + $0xd0] sm:$0xff] }
 0xd0b   :  { %1825 = vmatpush.msra.mxu1 %v1794_v32  ;;  %1973 = vmatpush.msra.mxu2 %v1919_v28  ;;  %v1918_v32 = vld [vmem:[#allocation10 + $0xd8] sm:$0xff] }
 0xd0d   :  { %1826 = vmatpush.msra.mxu1 %v1793_v62  ;;  %1974 = vmatpush.msra.mxu2 %v1915_v3  ;;  %v1911_v62 = vld [vmem:[#allocation10 + $0xa0] sm:$0xff] }
 0xd0f   :  { %1827 = vmatpush.msra.mxu1 %v1792_v5  ;;  %v1912_v5 = vld [vmem:[#allocation10 + $0xa8] sm:$0xff]  ;;  %1975 = vmatpush.msra.mxu2 %v1911_v62 }
 0xd11   :  { %2034 = vmatpush.msrb.mxu1 %v1954_v12  ;;  %v1902_v12 = vld [vmem:[#allocation10 + $0x58] sm:$0xff] }
 0xd13   :  { %2035 = vmatpush.msrb.mxu1 %v1950_v30  ;;  %v1898_v30 = vld [vmem:[#allocation10 + $0x38] sm:$0xff] }
 0xd15   :  { %2036 = vmatpush.msrb.mxu1 %v1946_v41  ;;  %v2191_v41 = vld [vmem:[#allocation12 + $0x1f0] sm:$0xff] }
 0xd17   :  { %2037 = vmatpush.msrb.mxu1 %v1942_v45  ;;  %v2144_v45 = vld [vmem:[#allocation12 + $0x78] sm:$0xff] }
 0xd19   :  { %2038 = vmatpush.msrb.mxu1 %v1938_v48 }
 0xd1b   :  { %2039 = vmatpush.msrb.mxu1 %v1934_v10 }
 0xd1d   :  { %2040 = vmatpush.msrb.mxu1 %v1930_v54  ;;  %v2684_v54 = vld [vmem:[%s3626_s28] ss:$0 sm:$0xff] }
 0xd1f   :  { %2041 = vmatpush.msrb.mxu1 %v1926_v60  ;;  %v2685_v60 = vld [vmem:[%s3627_s1] ss:$0 sm:$0xff] }
 0xd21   :  { %2042 = vmatpush.msrb.mxu1 %v1922_v2 }
 0xd23   :  { %2043 = vmatpush.msrb.mxu1 %v1918_v32 }
 0xd5d   :  { %v1610_v52 = vpop.f32.mrf.mxu0 }
 0xd5e   :  { %1614 = vrot.lane.b32.xlu0 %v1610_v52, %s2964_s5  ;;  %v1933_v52 = vld [vmem:[#allocation10 + $0x150] sm:$0xff] }
 0xd5f   :  { %2016 = vmatpush.msra.mxu0 %v1933_v52 }
 0xd61   :  { %2017 = vmatpush.msra.mxu0 %v1929_v56 }
 0xd63   :  { %2018 = vmatpush.msra.mxu0 %v1925_v59 }
 0xd6f   :  { %v1782_v58 = vpop.f32.mrf.mxu0 }
 0xd70   :  { %1786 = vrot.lane.b32.xlu2 %v1782_v58, %s2964_s5  ;;  %v1924_v58 = vld [vmem:[#allocation10 + $0x108] sm:$0xff] }
 0xd7d   :  { %v1529_v15 = vpop.f32.mrf.mxu2 }
 0xd7e   :  { %1532 = vst.msk [vmem:[#allocation2] sm:$0x1f] %vm514_vm3, %v1529_v15  ;;  %v1920_v15 = vld [vmem:[#allocation10 + $0xe8] sm:$0xff] }
 0xd85   :  { %v1701_v1 = vpop.f32.mrf.mxu2 }
 0xd86   :  { %1704 = vst.msk [vmem:[#allocation2 + $0x5] sm:$0x1f] %vm514_vm3, %v1701_v1  ;;  %v1921_v1 = vld [vmem:[#allocation10 + $0xf0] sm:$0xff] }
 0xd87   :  { %2019 = vmatpush.msra.mxu0 %v1921_v1 }
 0xd89   :  { %2020 = vmatpush.msra.mxu0 %v1917_v7 }
 0xdca   :  { %v1787_v6 = vpop.permute.xlu2 %1786 }
 0xdcb   :  { %1789 = vst.msk [vmem:[#allocation2 + $0x5] sm:$0x1f] %vm600_vm7, %v1787_v6  ;;  %v1913_v6 = vld [vmem:[#allocation10 + $0xb0] sm:$0xff] }
 0xdcc   :  { %2021 = vmatpush.msra.mxu0 %v1913_v6  ;;  %v2159_v6 = vld [vmem:[#allocation12 + $0xf0] sm:$0xff] }
 0xdd0   :  { %v1615_v49 = vpop.permute.xlu0 %1614 }
 0xdd1   :  { %1617 = vst.msk [vmem:[#allocation2] sm:$0x1f] %vm600_vm7, %v1615_v49  ;;  %v1914_v49 = vld [vmem:[#allocation10 + $0xb8] sm:$0xff] }
 0xdd2   :  { %v1791_v8 = vld [vmem:[#allocation2 + $0x8] sm:$0x3]  ;;  %2044 = vmatpush.msrb.mxu1 %v1914_v49  ;;  %v2172_v49 = vld [vmem:[#allocation12 + $0x158] sm:$0xff] }
 0xdd8   :  { %v1790_v63 = vld [vmem:[#allocation2] sm:$0xff] }
 0xdd9   :  { %1828 = vmatmul.f32.vlgmr.msra.gmra.mxu1 %v1790_v63  ;;  %v1907_v63 = vld [vmem:[#allocation10 + $0x80] sm:$0xff] }
 0xdda   :  { %1976 = vmatpush.msra.mxu2 %v1907_v63  ;;  %v2188_v63 = vld [vmem:[#allocation12 + $0x1d8] sm:$0xff] }
 0xde1   :  { %1831 = vmatmul.f32.gmra.mxu1 %v1791_v8  ;;  %v1908_v8 = vld [vmem:[#allocation10 + $0x88] sm:$0xff] }
 0xe56   :  { %v1829_v13 = vpop.f32.mrf.mxu1 }
 0xe57   :  { %v1830_v14 = vadd.f32 %v2683_v11, %v1829_v13  ;;  %v1910_v13 = vld [vmem:[#allocation10 + $0x98] sm:$0xff] }
 0xe58   :  { %2045 = vmatpush.msrb.mxu1 %v1910_v13  ;;  %v2171_v13 = vld [vmem:[#allocation12 + $0x150] sm:$0xff] }
 0xe59   :  { %v3461_v16 = vadd.f32 %v1830_v14, %v3364_v31  ;;  %v1948_v31 = vld [vmem:[#allocation10 + $0x1c8] sm:$0xff]  ;;  %v1903_v14 = vld [vmem:[#allocation10 + $0x60] sm:$0xff] }
 0xe5a   :  { %1989 = vmatpush.msra.mxu3 %v1948_v31  ;;  %1977 = vmatpush.msra.mxu2 %v1903_v14  ;;  %v1896_v31 = vld [vmem:[#allocation10 + $0x28] sm:$0xff]  ;;  %v2141_v14 = vld [vmem:[#allocation12 + $0x60] sm:$0xff] }
 0xe5b   :  { %1839 = vadd.xlane.f32.xlu1 %v3461_v16 }
 0xe5c   :  { %1990 = vmatpush.msra.mxu3 %v1944_v40  ;;  %1978 = vmatpush.msra.mxu2 %v1899_v21  ;;  %v2192_v40 = vld [vmem:[#allocation12 + $0x1f8] sm:$0xff] }
 0xe5d   :  { %v2140_v21 = vld [vmem:[#allocation12 + $0x58] sm:$0xff] }
 0xe5e   :  { %v1832_v17 = vpop.f32.mrf.mxu1  ;;  %1991 = vmatpush.msra.mxu3 %v1940_v43  ;;  %1979 = vmatpush.msra.mxu2 %v1895_v24  ;;  %v2139_v24 = vld [vmem:[#allocation12 + $0x50] sm:$0xff] }
 0xe5f   :  { %v1833_v18 = vadd.f32 %v2683_v11, %v1832_v17  ;;  %v1909_v11 = vld [vmem:[#allocation10 + $0x90] sm:$0xff]  ;;  %v1904_v17 = vld [vmem:[#allocation10 + $0x68] sm:$0xff] }
 0xe60   :  { %1992 = vmatpush.msra.mxu3 %v1936_v46  ;;  %2022 = vmatpush.msra.mxu0 %v1909_v11  ;;  %v2158_v11 = vld [vmem:[#allocation12 + $0xe8] sm:$0xff] }
 0xe61   :  { %v3465_v9 = vadd.f32 %v1833_v18, %v3368_v39  ;;  %v1905_v18 = vld [vmem:[#allocation10 + $0x70] sm:$0xff] }
 0xe62   :  { %1993 = vmatpush.msra.mxu3 %v1932_v51  ;;  %2023 = vmatpush.msra.mxu0 %v1905_v18  ;;  %v2189_v51 = vld [vmem:[#allocation12 + $0x1e0] sm:$0xff]  ;;  %v2170_v18 = vld [vmem:[#allocation12 + $0x148] sm:$0xff] }
 0xe63   :  { %v1841_v20 = vsel %vm250_vm1, %v3465_v9, 0.0 }
 0xe64   :  { %1842 = vadd.xlane.f32.xlu0 %v1841_v20  ;;  %1994 = vmatpush.msra.mxu3 %v1928_v53  ;;  %v1906_v20 = vld [vmem:[#allocation10 + $0x78] sm:$0xff] }
 0xe65   :  { %2046 = vmatpush.msrb.mxu1 %v1906_v20  ;;  %2024 = vmatpush.msra.mxu0 %v1901_v23  ;;  %v2186_v20 = vld [vmem:[#allocation12 + $0x1c8] sm:$0xff]  ;;  %v2169_v23 = vld [vmem:[#allocation12 + $0x140] sm:$0xff] }
 0xe66   :  { %1995 = vmatpush.msra.mxu3 %v1924_v58 }
 0xe67   :  { %2047 = vmatpush.msrb.mxu1 %v1902_v12  ;;  %2025 = vmatpush.msra.mxu0 %v1897_v26  ;;  %v2185_v12 = vld [vmem:[#allocation12 + $0x1c0] sm:$0xff]  ;;  %v2168_v26 = vld [vmem:[#allocation12 + $0x138] sm:$0xff] }
 0xe68   :  { %1996 = vmatpush.msra.mxu3 %v1920_v15 }
 0xe69   :  { %2048 = vmatpush.msrb.mxu1 %v1898_v30  ;;  %v2184_v30 = vld [vmem:[#allocation12 + $0x1b8] sm:$0xff] }
 0xe6a   :  { %1997 = vmatpush.msra.mxu3 %v1916_v4 }
 0xe6c   :  { %1998 = vmatpush.msra.mxu3 %v1912_v5 }
 0xe6e   :  { %1999 = vmatpush.msra.mxu3 %v1908_v8  ;;  %v2142_v8 = vld [vmem:[#allocation12 + $0x68] sm:$0xff] }
 0xe70   :  { %2000 = vmatpush.msra.mxu3 %v1904_v17  ;;  %v2157_v17 = vld [vmem:[#allocation12 + $0xe0] sm:$0xff] }
 0xe72   :  { %2001 = vmatpush.msra.mxu3 %v1900_v22  ;;  %v2156_v22 = vld [vmem:[#allocation12 + $0xd8] sm:$0xff] }
 0xe74   :  { %2002 = vmatpush.msra.mxu3 %v1896_v31  ;;  %v2155_v31 = vld [vmem:[#allocation12 + $0xd0] sm:$0xff] }
 0xece   :  { %v1840_v39 = vpop.xlane.xlu1 %1839 }
 0xecf   :  { %v1844_v27 = vmul.f32 %v1840_v39, %v3160_v25  ;;  %v1891_v39 = vld [vmem:[#allocation10] sm:$0xff] }
 0xed0   :  { %1980 = vmatpush.msra.mxu2 %v1891_v39  ;;  %v2138_v39 = vld [vmem:[#allocation12 + $0x48] sm:$0xff] }
 0xed1   :  { %v3471_v33 = vsub.f32 %v3461_v16, %v1844_v27  ;;  %v1892_v27 = vld [vmem:[#allocation10 + $0x8] sm:$0xff] }
 0xed2   :  { %2003 = vmatpush.msra.mxu3 %v1892_v27  ;;  %2197 = vmatpush.msrb.mxu2 %v2144_v45  ;;  %v2154_v27 = vld [vmem:[#allocation12 + $0xc8] sm:$0xff]  ;;  %v2164_v45 = vld [vmem:[#allocation12 + $0x118] sm:$0xff] }
 0xed3   :  { %v1848_v29 = vmul.f32 %v3471_v33, %v3471_v33 }
 0xed4   :  { %2220 = vmatpush.msrb.mxu3 %v2160_v0  ;;  %v2180_v0 = vld [vmem:[#allocation12 + $0x198] sm:$0xff] }
 0xed5   :  { %1850 = vadd.xlane.f32.xlu2 %v1848_v29  ;;  %v1893_v29 = vld [vmem:[#allocation10 + $0x10] sm:$0xff] }
 0xed6   :  { %2026 = vmatpush.msra.mxu0 %v1893_v29  ;;  %2221 = vmatpush.msrb.mxu3 %v2159_v6  ;;  %v2167_v29 = vld [vmem:[#allocation12 + $0x130] sm:$0xff] }
 0xed7   :  { %v1843_v34 = vpop.xlane.xlu0 %1842 }
 0xed8   :  { %v1845_v35 = vmul.f32 %v1843_v34, %v3160_v25  ;;  %v1894_v34 = vld [vmem:[#allocation10 + $0x18] sm:$0xff]  ;;  %2243 = vmatpush.msrb.mxu0 %v2176_v19  ;;  %2222 = vmatpush.msrb.mxu3 %v2158_v11  ;;  %v2182_v19 = vld [vmem:[#allocation12 + $0x1a8] sm:$0xff] }
 0xed9   :  { %2049 = vmatpush.msrb.mxu1 %v1894_v34  ;;  %v2183_v34 = vld [vmem:[#allocation12 + $0x1b0] sm:$0xff] }
 0xeda   :  { %v3477_v36 = vsub.f32 %v3465_v9, %v1845_v35  ;;  %2244 = vmatpush.msrb.mxu0 %v2175_v61  ;;  %2223 = vmatpush.msrb.mxu3 %v2157_v17  ;;  %v2152_v61 = vld [vmem:[#allocation12 + $0xb8] sm:$0xff] }
 0xedb   :  { %2266 = vmatpush.msra.mxu1 %v2192_v40  ;;  %v2136_v40 = vld [vmem:[#allocation12 + $0x38] sm:$0xff] }
 0xedc   :  { %v1849_v37 = vmul.f32 %v3477_v36, %v3477_v36  ;;  %2245 = vmatpush.msrb.mxu0 %v2174_v42  ;;  %2224 = vmatpush.msrb.mxu3 %v2156_v22  ;;  %v2181_v42 = vld [vmem:[#allocation12 + $0x1a0] sm:$0xff] }
 0xedd   :  { %2267 = vmatpush.msra.mxu1 %v2191_v41  ;;  %v2165_v41 = vld [vmem:[#allocation12 + $0x120] sm:$0xff] }
 0xede   :  { %v1852_v38 = vsel %vm250_vm1, %v1849_v37, 0.0  ;;  %2246 = vmatpush.msrb.mxu0 %v2173_v50  ;;  %2225 = vmatpush.msrb.mxu3 %v2155_v31  ;;  %v2179_v50 = vld [vmem:[#allocation12 + $0x190] sm:$0xff] }
 0xedf   :  { %1853 = vadd.xlane.f32.xlu1 %v1852_v38  ;;  %2268 = vmatpush.msra.mxu1 %v2190_v44  ;;  %v2151_v44 = vld [vmem:[#allocation12 + $0xb0] sm:$0xff] }
 0xee0   :  { %2247 = vmatpush.msrb.mxu0 %v2172_v49  ;;  %2226 = vmatpush.msrb.mxu3 %v2154_v27 }
 0xee1   :  { %2269 = vmatpush.msra.mxu1 %v2189_v51  ;;  %v2133_v51 = vld [vmem:[#allocation12 + $0x20] sm:$0xff] }
 0xee2   :  { %2248 = vmatpush.msrb.mxu0 %v2171_v13 }
 0xee3   :  { %2270 = vmatpush.msra.mxu1 %v2188_v63 }
 0xee4   :  { %2249 = vmatpush.msrb.mxu0 %v2170_v18 }
 0xee6   :  { %2250 = vmatpush.msrb.mxu0 %v2169_v23 }
 0xee8   :  { %2251 = vmatpush.msrb.mxu0 %v2168_v26 }
 0xeea   :  { %2252 = vmatpush.msrb.mxu0 %v2167_v29 }
 0xf48   :  { %v1851_v35 = vpop.xlane.xlu2 %1850 }
 0xf49   :  { %v1855_v37 = vmul.f32 %v1851_v35, %v3160_v25  ;;  %v2137_v35 = vld [vmem:[#allocation12 + $0x40] sm:$0xff] }
 0xf4b   :  { %v1857_v38 = vadd.f32 1e-05, %v1855_v37  ;;  %v2153_v37 = vld [vmem:[#allocation12 + $0xc0] sm:$0xff] }
 0xf4c   :  { %2227 = vmatpush.msrb.mxu3 %v2153_v37 }
 0xf4d   :  { %2750 = vrsqrt.f32 %v1857_v38  ;;  %vm1865_vm2 = vweird.f32 %v1857_v38 }
 0xf4e   :  { %2228 = vmatpush.msrb.mxu3 %v2152_v61 }
 0xf50   :  { %2229 = vmatpush.msrb.mxu3 %v2151_v44 }
 0xf52   :  { %v1854_v43 = vpop.xlane.xlu1 %1853 }
 0xf53   :  { %v2751_v46 = vpop.eup %2750  ;;  %v1856_v47 = vmul.f32 %v1854_v43, %v3160_v25  ;;  %v2135_v43 = vld [vmem:[#allocation12 + $0x30] sm:$0xff] }
 0xf54   :  { %v1860_v48 = vmul.f32 %v2751_v46, %v1857_v38  ;;  %vm1866_vm1 = vweird.f32 %v2751_v46  ;;  %v2166_v38 = vld [vmem:[#allocation12 + $0x128] sm:$0xff] }
 0xf55   :  { %v1858_v52 = vadd.f32 1e-05, %v1856_v47  ;;  %vm1867_vm3 = vmor %vm1865_vm2, %vm1866_vm1  ;;  %2253 = vmatpush.msrb.mxu0 %v2166_v38  ;;  %v2150_v47 = vld [vmem:[#allocation12 + $0xa8] sm:$0xff] }
 0xf56   :  { %v1861_v10 = vmul.f32 %v2751_v46, %v1860_v48  ;;  %v2163_v48 = vld [vmem:[#allocation12 + $0x110] sm:$0xff]  ;;  %2230 = vmatpush.msrb.mxu3 %v2150_v47 }
 0xf57   :  { %2752 = vrsqrt.f32 %v1858_v52  ;;  %vm1875_vm12 = vweird.f32 %v1858_v52  ;;  %2254 = vmatpush.msrb.mxu0 %v2165_v41 }
 0xf58   :  { %v1862_v55 = vmul.f32 0.5, %v1861_v10  ;;  %v2162_v10 = vld [vmem:[#allocation12 + $0x108] sm:$0xff] }
 0xf59   :  { %2255 = vmatpush.msrb.mxu0 %v2164_v45 }
 0xf5a   :  { %v1863_v53 = vsub.f32 1.5, %v1862_v55  ;;  %v2178_v55 = vld [vmem:[#allocation12 + $0x188] sm:$0xff] }
 0xf5b   :  { %2256 = vmatpush.msrb.mxu0 %v2163_v48 }
 0xf5c   :  { %v1864_v25 = vmul.f32 %v2751_v46, %v1863_v53  ;;  %v2132_v53 = vld [vmem:[#allocation12 + $0x18] sm:$0xff] }
 0xf5d   :  { %v2753_v56 = vpop.eup %2752  ;;  %2257 = vmatpush.msrb.mxu0 %v2162_v10 }
 0xf5e   :  { %v1868_v57 = vsel %vm1867_vm3, %v2751_v46, %v1864_v25  ;;  %v1870_v58 = vmul.f32 %v2753_v56, %v1858_v52  ;;  %vm1876_vm7 = vweird.f32 %v2753_v56  ;;  %v2134_v46 = vld [vmem:[#allocation12 + $0x28] sm:$0xff]  ;;  %v2149_v52 = vld [vmem:[#allocation12 + $0xa0] sm:$0xff]  ;;  %v2148_v25 = vld [vmem:[#allocation12 + $0x98] sm:$0xff] }
 0xf5f   :  { %v1879_v59 = vmul.f32 %v1868_v57, %v3471_v33  ;;  %vm1877_vm5 = vmor %vm1875_vm12, %vm1876_vm7  ;;  %v2143_v33 = vld [vmem:[#allocation12 + $0x70] sm:$0xff]  ;;  %2231 = vmatpush.msrb.mxu3 %v2149_v52 }
 0xf60   :  { %v1871_v28 = vmul.f32 %v2753_v56, %v1870_v58  ;;  %2198 = vmatpush.msrb.mxu2 %v2143_v33  ;;  %v2131_v57 = vld [vmem:[#allocation12 + $0x10] sm:$0xff] }
 0xf61   :  { %v1884_v15 = vmul.f32 %v2684_v54, %v1879_v59  ;;  %2232 = vmatpush.msrb.mxu3 %v2148_v25  ;;  %v2147_v58 = vld [vmem:[#allocation12 + $0x90] sm:$0xff]  ;;  %v1955_v59 = vld [vmem:[%s3628_s0] sm:$0xf] }
 0xf62   :  { %v1872_v1 = vmul.f32 0.5, %v1871_v28  ;;  %2199 = vmatpush.msrb.mxu2 %v2142_v8  ;;  %v2146_v28 = vld [vmem:[#allocation12 + $0x88] sm:$0xff]  ;;  %v1958_v33 = vperm.slane %v1955_v59, 1 }
 0xf63   :  { %v1889_v2 = vadd.f32 %v2685_v60, %v1884_v15  ;;  %2233 = vmatpush.msrb.mxu3 %v2147_v58  ;;  %v2129_v15 = vld [vmem:[#allocation12] sm:$0xff] }
 0xf64   :  { %v1873_v3 = vsub.f32 1.5, %v1872_v1  ;;  %2200 = vmatpush.msrb.mxu2 %v2141_v14  ;;  %v2145_v1 = vld [vmem:[#allocation12 + $0x80] sm:$0xff] }
 0xf65   :  { %1981 = vmatmul.f32.vlgmr.msra.gmra.mxu2 %v1889_v2  ;;  %2004 = vmatmul.f32.vlgmr.msra.gmra.mxu3 %v1889_v2 }
 0xf66   :  { %v1874_v4 = vmul.f32 %v2753_v56, %v1873_v3  ;;  %2027 = vmatmul.f32.vlgmr.msra.gmra.mxu0 %v1889_v2  ;;  %2050 = vmatmul.f32.vlgmr.msrb.gmra.mxu1 %v1889_v2  ;;  %v1959_v2 = vperm.slane %v1955_v59, 2  ;;  %v1960_v3 = vperm.slane %v1955_v59, 3 }
 0xf67   :  { %2201 = vmatpush.msrb.mxu2 %v2140_v21  ;;  %2234 = vmatpush.msrb.mxu3 %v2146_v28 }
 0xf68   :  { %v1878_v7 = vsel %vm1877_vm5, %v2753_v56, %v1874_v4  ;;  %v2161_v56 = vld [vmem:[#allocation12 + $0x100] sm:$0xff] }
 0xf69   :  { %v1880_v32 = vmul.f32 %v1878_v7, %v3477_v36  ;;  %v2187_v36 = vld [vmem:[#allocation12 + $0x1d0] sm:$0xff]  ;;  %2202 = vmatpush.msrb.mxu2 %v2139_v24  ;;  %2258 = vmatpush.msrb.mxu0 %v2161_v56 }
 0xf6a   :  { %2271 = vmatpush.msra.mxu1 %v2187_v36  ;;  %2235 = vmatpush.msrb.mxu3 %v2145_v1 }
 0xf6b   :  { %v1885_v62 = vmul.f32 %v2684_v54, %v1880_v32  ;;  %2203 = vmatpush.msrb.mxu2 %v2138_v39  ;;  %v2177_v54 = vld [vmem:[#allocation12 + $0x180] sm:$0xff] }
 0xf6c   :  { %2272 = vmatpush.msra.mxu1 %v2186_v20 }
 0xf6d   :  { %v1890_v5 = vadd.f32 %v2685_v60, %v1885_v62  ;;  %2204 = vmatpush.msrb.mxu2 %v2137_v35  ;;  %v2130_v60 = vld [vmem:[#allocation12 + $0x8] sm:$0xff] }
 0xf6e   :  { %2273 = vmatpush.msra.mxu1 %v2185_v12 }
 0xf6f   :  { %1984 = vmatmul.f32.gmra.mxu2 %v1890_v5  ;;  %2007 = vmatmul.f32.gmra.mxu3 %v1890_v5 }
 0xf70   :  { %2030 = vmatmul.f32.gmra.mxu0 %v1890_v5  ;;  %2053 = vmatmul.f32.gmra.mxu1 %v1890_v5  ;;  %v1957_v5 = vperm.slane %v1955_v59, 0 }
 0xf71   :  { %2274 = vmatpush.msra.mxu1 %v2184_v30  ;;  %2205 = vmatpush.msrb.mxu2 %v2136_v40 }
 0xf73   :  { %2275 = vmatpush.msra.mxu1 %v2183_v34  ;;  %2206 = vmatpush.msrb.mxu2 %v2135_v43 }
 0xf75   :  { %2276 = vmatpush.msra.mxu1 %v2182_v19  ;;  %2207 = vmatpush.msrb.mxu2 %v2134_v46 }
 0xf77   :  { %2277 = vmatpush.msra.mxu1 %v2181_v42  ;;  %2208 = vmatpush.msrb.mxu2 %v2133_v51 }
 0xf79   :  { %2278 = vmatpush.msra.mxu1 %v2180_v0  ;;  %2209 = vmatpush.msrb.mxu2 %v2132_v53 }
 0xf7b   :  { %2279 = vmatpush.msra.mxu1 %v2179_v50  ;;  %2210 = vmatpush.msrb.mxu2 %v2131_v57 }
 0xf7d   :  { %2280 = vmatpush.msra.mxu1 %v2178_v55  ;;  %2211 = vmatpush.msrb.mxu2 %v2130_v60 }
 0xf7f   :  { %2281 = vmatpush.msra.mxu1 %v2177_v54  ;;  %2212 = vmatpush.msrb.mxu2 %v2129_v15 }
 0xfe3   :  { %v2028_v4 = vpop.f32.mrf.mxu0  ;;  %v2051_v7 = vpop.f32.mrf.mxu1 }
 0xfe4   :  { %v2029_v32 = vadd.f32 %v2028_v4, %v1959_v2  ;;  %v2052_v62 = vadd.f32 %v2051_v7, %v1960_v3 }
 0xfe6   :  { %v2067_v6 = vmul.f32 0.044715, %v2029_v32  ;;  %v2068_v49 = vmul.f32 0.044715, %v2052_v62  ;;  %v2059_v53 = vmul.f32 0.5, %v2029_v32  ;;  %v2060_v56 = vmul.f32 0.5, %v2052_v62 }
 0xfe8   :  { %v2075_v63 = vmul.f32 %v2067_v6, %v2029_v32  ;;  %v2076_v8 = vmul.f32 %v2068_v49, %v2052_v62  ;;  %v1982_v11 = vpop.f32.mrf.mxu2  ;;  %v2005_v13 = vpop.f32.mrf.mxu3 }
 0xfe9   :  { %v1983_v36 = vadd.f32 %v1982_v11, %v1957_v5  ;;  %v3489_v14 = vadd.f32 %v2005_v13, %v1958_v33 }
 0xfea   :  { %v2083_v17 = vmul.f32 %v2075_v63, %v2029_v32  ;;  %v2084_v18 = vmul.f32 %v2076_v8, %v2052_v62 }
 0xfeb   :  { %v2065_v20 = vmul.f32 0.044715, %v1983_v36  ;;  %v2066_v21 = vmul.f32 0.044715, %v3489_v14  ;;  %v2058_v6 = vmul.f32 0.5, %v3489_v14 }
 0xfec   :  { %v2091_v22 = vadd.f32 %v2083_v17, %v2029_v32  ;;  %v2092_v23 = vadd.f32 %v2084_v18, %v2052_v62  ;;  %v2057_v32 = vmul.f32 0.5, %v1983_v36 }
 0xfed   :  { %v2073_v12 = vmul.f32 %v2065_v20, %v1983_v36  ;;  %v2074_v24 = vmul.f32 %v2066_v21, %v3489_v14  ;;  %v2031_v31 = vpop.f32.mrf.mxu0  ;;  %v2054_v26 = vpop.f32.mrf.mxu1 }
 0xfee   :  { %v2032_v30 = vadd.f32 %v2031_v31, %v1959_v2  ;;  %v3493_v39 = vadd.f32 %v2054_v26, %v1960_v3  ;;  %v2099_v27 = vmul.f32 0.7978846, %v2091_v22  ;;  %v2100_v29 = vmul.f32 0.7978846, %v2092_v23 }
 0xfef   :  { %v2081_v34 = vmul.f32 %v2073_v12, %v1983_v36  ;;  %v2082_v35 = vmul.f32 %v2074_v24, %v3489_v14 }
 0xff0   :  { %2754 = vtanh.f32 %v2099_v27  ;;  %v2071_v37 = vmul.f32 0.044715, %v2032_v30  ;;  %v2072_v40 = vmul.f32 0.044715, %v3493_v39  ;;  %v2063_v18 = vmul.f32 0.5, %v2032_v30 }
 0xff1   :  { %2756 = vtanh.f32 %v2100_v29  ;;  %v2089_v38 = vadd.f32 %v2081_v34, %v1983_v36  ;;  %v2090_v19 = vadd.f32 %v2082_v35, %v3489_v14  ;;  %v2064_v36 = vmul.f32 0.5, %v3493_v39  ;;  %v2355_v35 = vld [vmem:[%s3114_s19 + $0x70] sm:$0xff] }
 0xff2   :  { %v1985_v61 = vpop.f32.mrf.mxu2  ;;  %v2008_v41 = vpop.f32.mrf.mxu3  ;;  %v2079_v42 = vmul.f32 %v2071_v37, %v2032_v30  ;;  %v2080_v47 = vmul.f32 %v2072_v40, %v3493_v39  ;;  %v2686_v37 = vld [vmem:[%s3109_s20] ss:$0 sm:$0xff] }
 0xff3   :  { %v1986_v43 = vadd.f32 %v1985_v61, %v1957_v5  ;;  %v2009_v44 = vadd.f32 %v2008_v41, %v1958_v33  ;;  %v2097_v45 = vmul.f32 0.7978846, %v2089_v38  ;;  %v2098_v0 = vmul.f32 0.7978846, %v2090_v19  ;;  %v2354_v38 = vld [vmem:[%s3114_s19 + $0x68] sm:$0xff]  ;;  %v2353_v19 = vld [vmem:[%s3114_s19 + $0x60] sm:$0xff] }
 0xff4   :  { %v2087_v46 = vmul.f32 %v2079_v42, %v2032_v30  ;;  %v2088_v52 = vmul.f32 %v2080_v47, %v3493_v39  ;;  %v2352_v41 = vld [vmem:[%s3114_s19 + $0x58] sm:$0xff] }
 0xff5   :  { %2758 = vtanh.f32 %v2097_v45  ;;  %v2069_v48 = vmul.f32 0.044715, %v1986_v43  ;;  %v2070_v10 = vmul.f32 0.044715, %v2009_v44  ;;  %v2061_v31 = vmul.f32 0.5, %v1986_v43 }
 0xff6   :  { %v2755_v50 = vpop.eup %2754  ;;  %2760 = vtanh.f32 %v2098_v0  ;;  %v2095_v51 = vadd.f32 %v2087_v46, %v2032_v30  ;;  %v2096_v59 = vadd.f32 %v2088_v52, %v3493_v39  ;;  %v2062_v27 = vmul.f32 0.5, %v2009_v44  ;;  %v2356_v39 = vld [vmem:[%s3114_s19 + $0x78] sm:$0xff]  ;;  %v2350_v46 = vld [vmem:[%s3114_s19 + $0x48] sm:$0xff] }
 0xff7   :  { %v2757_v55 = vpop.eup %2756  ;;  %v2115_v25 = vadd.f32 1.0, %v2755_v50  ;;  %v2077_v54 = vmul.f32 %v2069_v48, %v1986_v43  ;;  %v2078_v60 = vmul.f32 %v2070_v10, %v2009_v44  ;;  %2440 = vmatpush.msra.mxu2 %v2356_v39  ;;  %v2349_v50 = vld [vmem:[%s3114_s19 + $0x40] sm:$0xff]  ;;  %v2348_v52 = vld [vmem:[%s3114_s19 + $0x38] sm:$0xff] }
 0xff8   :  { %v2116_v57 = vadd.f32 1.0, %v2757_v55  ;;  %v2103_v58 = vmul.f32 0.7978846, %v2095_v51  ;;  %v2104_v2 = vmul.f32 0.7978846, %v2096_v59  ;;  %v2345_v59 = vld [vmem:[%s3114_s19 + $0x20] sm:$0xff] }
 0xff9   :  { %v2123_v28 = vmul.f32 %v2115_v25, %v2059_v53  ;;  %v2085_v15 = vmul.f32 %v2077_v54, %v1986_v43  ;;  %v2086_v3 = vmul.f32 %v2078_v60, %v2009_v44  ;;  %2441 = vmatpush.msra.mxu2 %v2355_v35  ;;  %v2347_v25 = vld [vmem:[%s3114_s19 + $0x30] sm:$0xff]  ;;  %v2346_v54 = vld [vmem:[%s3114_s19 + $0x28] sm:$0xff]  ;;  %v2381_v39 = vld [vmem:[%s3114_s19 + $0x140] sm:$0xff] }
 0xffa   :  { %v2124_v1 = vmul.f32 %v2116_v57, %v2060_v56  ;;  %2762 = vtanh.f32 %v2103_v58 }
 0xffb   :  { %v2759_v4 = vpop.eup %2758  ;;  %2259 = vmatmul.f32.vlgmr.msrb.gmra.mxu0 %v2123_v28  ;;  %v2093_v7 = vadd.f32 %v2085_v15, %v1986_v43  ;;  %2764 = vtanh.f32 %v2104_v2  ;;  %v2094_v62 = vadd.f32 %v2086_v3, %v2009_v44  ;;  %2442 = vmatpush.msra.mxu2 %v2354_v38  ;;  %v2351_v44 = vld [vmem:[%s3114_s19 + $0x50] sm:$0xff]  ;;  %v2372_v28 = vld [vmem:[%s3114_s19 + $0xf8] sm:$0xff]  ;;  %v2417_v38 = vld [vmem:[%s3114_s19 + $0x260] sm:$0xff] }
 0xffc   :  { %v2761_v5 = vpop.eup %2760  ;;  %2282 = vmatmul.f32.vlgmr.msra.gmra.mxu1 %v2124_v1  ;;  %v2113_v33 = vadd.f32 1.0, %v2759_v4  ;;  %v2388_v15 = vld [vmem:[%s3114_s19 + $0x178] sm:$0xff]  ;;  %2460 = vmatpush.msra.mxu3 %v2372_v28  ;;  %v2371_v4 = vld [vmem:[%s3114_s19 + $0xf0] sm:$0xff]  ;;  %v2358_v28 = vld [vmem:[%s3114_s19 + $0x88] sm:$0xff] }
 0xffd   :  { %v2114_v49 = vadd.f32 1.0, %v2761_v5  ;;  %v2101_v63 = vmul.f32 0.7978846, %v2093_v7  ;;  %v2102_v11 = vmul.f32 0.7978846, %v2094_v62  ;;  %2443 = vmatpush.msra.mxu2 %v2353_v19  ;;  %v2404_v1 = vld [vmem:[%s3114_s19 + $0x1f8] sm:$0xff]  ;;  %2480 = vmatpush.msra.mxu0 %v2388_v15 }
 0xffe   :  { %v2121_v8 = vmul.f32 %v2113_v33, %v2057_v32  ;;  %v2344_v3 = vld [vmem:[%s3114_s19 + $0x18] sm:$0xff]  ;;  %v2387_v7 = vld [vmem:[%s3114_s19 + $0x170] sm:$0xff]  ;;  %2500 = vmatpush.msrb.mxu1 %v2404_v1  ;;  %v2370_v33 = vld [vmem:[%s3114_s19 + $0xe8] sm:$0xff]  ;;  %2461 = vmatpush.msra.mxu3 %v2371_v4 }
 0xfff   :  { %v2122_v13 = vmul.f32 %v2114_v49, %v2058_v6  ;;  %2766 = vtanh.f32 %v2101_v63  ;;  %2444 = vmatpush.msra.mxu2 %v2352_v41  ;;  %v2403_v5 = vld [vmem:[%s3114_s19 + $0x1f0] sm:$0xff]  ;;  %2481 = vmatpush.msra.mxu0 %v2387_v7  ;;  %v2386_v49 = vld [vmem:[%s3114_s19 + $0x168] sm:$0xff]  ;;  %v2364_v19 = vld [vmem:[%s3114_s19 + $0xb8] sm:$0xff] }
0x1000   :  { %v2763_v17 = vpop.eup %2762  ;;  %2213 = vmatmul.f32.vlgmr.msrb.gmra.mxu2 %v2121_v8  ;;  %2768 = vtanh.f32 %v2102_v11  ;;  %v2343_v32 = vld [vmem:[%s3114_s19 + $0x10] sm:$0xff]  ;;  %v2402_v63 = vld [vmem:[%s3114_s19 + $0x1e8] sm:$0xff]  ;;  %2501 = vmatpush.msrb.mxu1 %v2403_v5  ;;  %v2369_v11 = vld [vmem:[%s3114_s19 + $0xe0] sm:$0xff] }
0x1001   :  { %2236 = vmatmul.f32.vlgmr.msrb.gmra.mxu3 %v2122_v13  ;;  %v2119_v20 = vadd.f32 1.0, %v2763_v17  ;;  %v2765_v21 = vpop.eup %2764  ;;  %2445 = vmatpush.msra.mxu2 %v2351_v44  ;;  %v2342_v8 = vld [vmem:[%s3114_s19 + $0x8] sm:$0xff]  ;;  %v2385_v13 = vld [vmem:[%s3114_s19 + $0x160] sm:$0xff]  ;;  %v2416_v41 = vld [vmem:[%s3114_s19 + $0x258] sm:$0xff] }
0x1002   :  { %v2120_v23 = vadd.f32 1.0, %v2765_v21  ;;  %2462 = vmatpush.msra.mxu3 %v2370_v33  ;;  %2482 = vmatpush.msra.mxu0 %v2386_v49  ;;  %v2384_v21 = vld [vmem:[%s3114_s19 + $0x158] sm:$0xff]  ;;  %v2395_v44 = vld [vmem:[%s3114_s19 + $0x1b0] sm:$0xff]  ;;  %v2374_v15 = vld [vmem:[%s3114_s19 + $0x108] sm:$0xff] }
0x1003   :  { %v2127_v22 = vmul.f32 %v2119_v20, %v2063_v18  ;;  %2446 = vmatpush.msra.mxu2 %v2350_v46  ;;  %v2341_v18 = vld [vmem:[%s3114_s19] sm:$0xff]  ;;  %2502 = vmatpush.msrb.mxu1 %v2402_v63  ;;  %v2368_v20 = vld [vmem:[%s3114_s19 + $0xd8] sm:$0xff]  ;;  %v2378_v46 = vld [vmem:[%s3114_s19 + $0x128] sm:$0xff] }
0x1004   :  { %v2128_v12 = vmul.f32 %v2120_v23, %v2064_v36  ;;  %2463 = vmatpush.msra.mxu3 %v2369_v11  ;;  %2483 = vmatpush.msra.mxu0 %v2385_v13  ;;  %v2420_v36 = vld [vmem:[%s3114_s19 + $0x278] sm:$0xff]  ;;  %v2367_v23 = vld [vmem:[%s3114_s19 + $0xd0] sm:$0xff]  ;;  %v2390_v1 = vld [vmem:[%s3114_s19 + $0x188] sm:$0xff] }
0x1005   :  { %v2767_v14 = vpop.eup %2766  ;;  %2262 = vmatmul.f32.gmra.mxu0 %v2127_v22  ;;  %2447 = vmatpush.msra.mxu2 %v2349_v50  ;;  %v2400_v22 = vld [vmem:[%s3114_s19 + $0x1d8] sm:$0xff]  ;;  %v2373_v4 = vld [vmem:[%s3114_s19 + $0x100] sm:$0xff]  ;;  %v2407_v49 = vld [vmem:[%s3114_s19 + $0x210] sm:$0xff] }
0x1006   :  { %v2769_v24 = vpop.eup %2768  ;;  %v2117_v26 = vadd.f32 1.0, %v2767_v14  ;;  %2285 = vmatmul.f32.gmra.mxu1 %v2128_v12  ;;  %v2383_v14 = vld [vmem:[%s3114_s19 + $0x150] sm:$0xff]  ;;  %2464 = vmatpush.msra.mxu3 %v2368_v20  ;;  %v2409_v33 = vld [vmem:[%s3114_s19 + $0x220] sm:$0xff]  ;;  %v2406_v63 = vld [vmem:[%s3114_s19 + $0x208] sm:$0xff] }
0x1007   :  { %v2118_v30 = vadd.f32 1.0, %v2769_v24  ;;  %2448 = vmatpush.msra.mxu2 %v2348_v52  ;;  %2484 = vmatpush.msra.mxu0 %v2384_v21  ;;  %v2399_v12 = vld [vmem:[%s3114_s19 + $0x1d0] sm:$0xff]  ;;  %v2361_v52 = vld [vmem:[%s3114_s19 + $0xa0] sm:$0xff] }
0x1008   :  { %v2125_v29 = vmul.f32 %v2117_v26, %v2061_v31  ;;  %v2419_v24 = vld [vmem:[%s3114_s19 + $0x270] sm:$0xff]  ;;  %v2366_v31 = vld [vmem:[%s3114_s19 + $0xc8] sm:$0xff]  ;;  %2465 = vmatpush.msra.mxu3 %v2367_v23  ;;  %v2405_v11 = vld [vmem:[%s3114_s19 + $0x200] sm:$0xff] }
0x1009   :  { %v2126_v34 = vmul.f32 %v2118_v30, %v2062_v27  ;;  %2449 = vmatpush.msra.mxu2 %v2347_v25  ;;  %v2382_v26 = vld [vmem:[%s3114_s19 + $0x148] sm:$0xff]  ;;  %2485 = vmatpush.msra.mxu0 %v2383_v14  ;;  %v2360_v25 = vld [vmem:[%s3114_s19 + $0x98] sm:$0xff] }
0x100a   :  { %2216 = vmatmul.f32.gmra.mxu2 %v2125_v29  ;;  %v2398_v27 = vld [vmem:[%s3114_s19 + $0x1c8] sm:$0xff]  ;;  %2466 = vmatpush.msra.mxu3 %v2366_v31 }
0x100b   :  { %2239 = vmatmul.f32.gmra.mxu3 %v2126_v34  ;;  %2450 = vmatpush.msra.mxu2 %v2346_v54  ;;  %v2418_v30 = vld [vmem:[%s3114_s19 + $0x268] sm:$0xff]  ;;  %v2365_v34 = vld [vmem:[%s3114_s19 + $0xc0] sm:$0xff]  ;;  %v2412_v54 = vld [vmem:[%s3114_s19 + $0x238] sm:$0xff] }
0x100c   :  { %2486 = vmatpush.msra.mxu0 %v2382_v26  ;;  %2467 = vmatpush.msra.mxu3 %v2365_v34 }
0x100d   :  { %2451 = vmatpush.msra.mxu2 %v2345_v59  ;;  %v2391_v59 = vld [vmem:[%s3114_s19 + $0x190] sm:$0xff] }
0x100e   :  { %2487 = vmatpush.msra.mxu0 %v2381_v39  ;;  %2468 = vmatpush.msra.mxu3 %v2364_v19 }
0x100f   :  { %2452 = vmatpush.msra.mxu2 %v2344_v3  ;;  %v2357_v3 = vld [vmem:[%s3114_s19 + $0x80] sm:$0xff] }
0x1011   :  { %2453 = vmatpush.msra.mxu2 %v2343_v32  ;;  %v2389_v32 = vld [vmem:[%s3114_s19 + $0x180] sm:$0xff] }
0x1013   :  { %2454 = vmatpush.msra.mxu2 %v2342_v8 }
0x1015   :  { %2455 = vmatpush.msra.mxu2 %v2341_v18 }
0x1017   :  { %2520 = vmatpush.msrb.mxu2 %v2420_v36 }
0x1019   :  { %2521 = vmatpush.msrb.mxu2 %v2419_v24 }
0x101b   :  { %2522 = vmatpush.msrb.mxu2 %v2418_v30 }
0x101d   :  { %2523 = vmatpush.msrb.mxu2 %v2417_v38 }
0x101f   :  { %2524 = vmatpush.msrb.mxu2 %v2416_v41 }
0x1078   :  { %v2260_v45 = vpop.f32.mrf.mxu0 }
0x1079   :  { %v2283_v47 = vpop.f32.mrf.mxu1 }
0x1082   :  { %v2263_v57 = vpop.f32.mrf.mxu0 }
0x1083   :  { %v2214_v40 = vpop.f32.mrf.mxu2  ;;  %v2286_v60 = vpop.f32.mrf.mxu1 }
0x1084   :  { %v2215_v61 = vadd.f32 %v2686_v37, %v2214_v40  ;;  %v2237_v42 = vpop.f32.mrf.mxu3  ;;  %v2380_v40 = vld [vmem:[%s3114_s19 + $0x138] sm:$0xff] }
0x1085   :  { %2488 = vmatpush.msra.mxu0 %v2380_v40 }
0x1086   :  { %v2238_v43 = vadd.f32 %v2237_v42, %v2215_v61  ;;  %v2396_v61 = vld [vmem:[%s3114_s19 + $0x1b8] sm:$0xff]  ;;  %v2363_v42 = vld [vmem:[%s3114_s19 + $0xb0] sm:$0xff] }
0x1087   :  { %2469 = vmatpush.msra.mxu3 %v2363_v42 }
0x1088   :  { %v2261_v0 = vadd.f32 %v2260_v45, %v2238_v43  ;;  %v2379_v43 = vld [vmem:[%s3114_s19 + $0x130] sm:$0xff] }
0x1089   :  { %v2415_v45 = vld [vmem:[%s3114_s19 + $0x250] sm:$0xff]  ;;  %2489 = vmatpush.msra.mxu0 %v2379_v43 }
0x108a   :  { %v2284_v48 = vadd.f32 %v2283_v47, %v2261_v0  ;;  %v2362_v0 = vld [vmem:[%s3114_s19 + $0xa8] sm:$0xff]  ;;  %2525 = vmatpush.msrb.mxu2 %v2415_v45 }
0x108b   :  { %v2394_v47 = vld [vmem:[%s3114_s19 + $0x1a8] sm:$0xff]  ;;  %2470 = vmatpush.msra.mxu3 %v2362_v0  ;;  %2490 = vmatpush.msra.mxu0 %v2378_v46 }
0x108c   :  { %v3513_v51 = vadd.f32 %v2284_v48, %v3461_v16  ;;  %v2414_v48 = vld [vmem:[%s3114_s19 + $0x248] sm:$0xff] }
0x108d   :  { %v2217_v10 = vpop.f32.mrf.mxu2  ;;  %2526 = vmatpush.msrb.mxu2 %v2414_v48  ;;  %2471 = vmatpush.msra.mxu3 %v2361_v52 }
0x108e   :  { %2291 = vst [vmem:[#allocation3] sm:$0x1] %v3513_v51  ;;  %v2625_v55 = vrot.slane %v3513_v51, 9  ;;  %v2218_v53 = vadd.f32 %v2686_v37, %v2217_v10  ;;  %v2240_v56 = vpop.f32.mrf.mxu3  ;;  %v2397_v37 = vld [vmem:[%s3114_s19 + $0x1c0] sm:$0xff] }
0x108f   :  { %2297 = vst.sshfl [vmem:[#allocation1] sm:$0xff pattern:$0x73625140] %v3513_v51  ;;  %v2377_v10 = vld [vmem:[%s3114_s19 + $0x120] sm:$0xff]  ;;  %2472 = vmatpush.msra.mxu3 %v2360_v25 }
0x1090   :  { %2296 = vst [vmem:[#allocation3 + $0x2] sm:$0x1] %v2625_v55  ;;  %v2241_v16 = vadd.f32 %v2240_v56, %v2218_v53  ;;  %v2393_v55 = vld [vmem:[%s3114_s19 + $0x1a0] sm:$0xff]  ;;  %v2376_v56 = vld [vmem:[%s3114_s19 + $0x118] sm:$0xff]  ;;  %2491 = vmatpush.msra.mxu0 %v2377_v10 }
0x1091   :  { %v2413_v53 = vld [vmem:[%s3114_s19 + $0x240] sm:$0xff] }
0x1092   :  { %v2264_v58 = vadd.f32 %v2263_v57, %v2241_v16  ;;  %v2392_v16 = vld [vmem:[%s3114_s19 + $0x198] sm:$0xff]  ;;  %2527 = vmatpush.msrb.mxu2 %v2413_v53  ;;  %v2359_v57 = vld [vmem:[%s3114_s19 + $0x90] sm:$0xff]  ;;  %2492 = vmatpush.msra.mxu0 %v2376_v56 }
0x1093   :  { %2473 = vmatpush.msra.mxu3 %v2359_v57 }
0x1094   :  { %v2287_v2 = vadd.f32 %v2286_v60, %v2264_v58  ;;  %v2375_v58 = vld [vmem:[%s3114_s19 + $0x110] sm:$0xff]  ;;  %2528 = vmatpush.msrb.mxu2 %v2412_v54 }
0x1095   :  { %v2411_v60 = vld [vmem:[%s3114_s19 + $0x230] sm:$0xff]  ;;  %2493 = vmatpush.msra.mxu0 %v2375_v58  ;;  %2474 = vmatpush.msra.mxu3 %v2358_v28 }
0x1096   :  { %v2299_v62 = vld [vmem:[#allocation1 + $0x1] ss:$4 sm:$0xff]  ;;  %v2290_v6 = vadd.f32 %v2287_v2, %v3465_v9  ;;  %2529 = vmatpush.msrb.mxu2 %v2411_v60 }
0x1097   :  { %2301 = vst [vmem:[#allocation3 + $0x4] sm:$0x1] %v2299_v62  ;;  %v2401_v9 = vld [vmem:[%s3114_s19 + $0x1e0] sm:$0xff]  ;;  %v2410_v2 = vld [vmem:[%s3114_s19 + $0x228] sm:$0xff]  ;;  %2494 = vmatpush.msra.mxu0 %v2374_v15  ;;  %2475 = vmatpush.msra.mxu3 %v2357_v3 }
0x1098   :  { %2302 = vst.sshfl [vmem:[#allocation1] sm:$0xff pattern:$0x73625140] %v3513_v51  ;;  %v2629_v17 = vrot.slane %v2290_v6, 9  ;;  %2503 = vmatpush.msrb.mxu1 %v2401_v9  ;;  %2530 = vmatpush.msrb.mxu2 %v2410_v2 }
0x1099   :  { %2333 = vst [vmem:[#allocation3 + $0x7] sm:$0x1] %v2290_v6  ;;  %2495 = vmatpush.msra.mxu0 %v2373_v4  ;;  %v2408_v6 = vld [vmem:[%s3114_s19 + $0x218] sm:$0xff]  ;;  %s2965_s19 = smov [#allocation13]  }
0x109a   :  { %2338 = vst [vmem:[#allocation3 + $0x9] sm:$0x1] %v2629_v17  ;;  %2504 = vmatpush.msrb.mxu1 %v2400_v22  ;;  %2531 = vmatpush.msrb.mxu2 %v2409_v33  ;;  %s2547_s20 = sshll.u32 %s2965_s19, 4  ;;  %s2548_s20 = int_to_ptr.vmem [resolvable:$true] %s2547_s20 }
0x109c   :  { %2505 = vmatpush.msrb.mxu1 %v2399_v12  ;;  %2532 = vmatpush.msrb.mxu2 %v2408_v6 }
0x109e   :  { %2506 = vmatpush.msrb.mxu1 %v2398_v27  ;;  %2533 = vmatpush.msrb.mxu2 %v2407_v49 }
0x109f   :  { %v2304_v29 = vld [vmem:[#allocation1 + $0x1] ss:$4 sm:$0xff] }
0x10a0   :  { %v2626_v35 = vrot.slane %v2304_v29, 9  ;;  %2309 = vst.sshfl [vmem:[#allocation1] sm:$0xff pattern:$0x73625140] %v3513_v51  ;;  %2507 = vmatpush.msrb.mxu1 %v2397_v37  ;;  %2534 = vmatpush.msrb.mxu2 %v2406_v63 }
0x10a2   :  { %2308 = vst [vmem:[#allocation3 + $0x6] sm:$0x1] %v2626_v35  ;;  %2508 = vmatpush.msrb.mxu1 %v2396_v61  ;;  %2535 = vmatpush.msrb.mxu2 %v2405_v11 }
0x10a4   :  { %2509 = vmatpush.msrb.mxu1 %v2395_v44 }
0x10a6   :  { %2510 = vmatpush.msrb.mxu1 %v2394_v47 }
0x10a7   :  { %v2311_v50 = vld [vmem:[#allocation1 + $0x2] ss:$4 sm:$0xff] }
0x10a8   :  { %2313 = vst [vmem:[#allocation3 + $0x8] sm:$0x1] %v2311_v50  ;;  %2511 = vmatpush.msrb.mxu1 %v2393_v55 }
0x10a9   :  { %2314 = vst.sshfl [vmem:[#allocation1] sm:$0xff pattern:$0x73625140] %v3513_v51 }
0x10aa   :  { %2512 = vmatpush.msrb.mxu1 %v2392_v16 }
0x10ac   :  { %2513 = vmatpush.msrb.mxu1 %v2391_v59 }
0x10ae   :  { %2514 = vmatpush.msrb.mxu1 %v2390_v1 }
0x10af   :  { %v2340_v7 = vld [vmem:[#allocation3 + $0x8] sm:$0x3] }
0x10b0   :  { %v2316_v5 = vld [vmem:[#allocation1 + $0x2] ss:$4 sm:$0xff]  ;;  %2429 = vst [vmem:[#allocation1 + $0x20] ss:$4 sm:$0xff] %v2340_v7  ;;  %2515 = vmatpush.msrb.mxu1 %v2389_v32 }
0x10b1   :  { %v2627_v62 = vrot.slane %v2316_v5, 9  ;;  %2321 = vst.sshfl [vmem:[#allocation1] sm:$0xff pattern:$0x73625140] %v3513_v51 }
0x10b3   :  { %2320 = vst [vmem:[#allocation3 + $0x1] sm:$0x1] %v2627_v62 }
0x10b7   :  { %v2434_v36 = vld.sshfl [vmem:[#allocation1 + $0x20] sm:$0xff pattern:$0x73625140] }
0x10b8   :  { %v2323_v8 = vld [vmem:[#allocation1 + $0x3] ss:$4 sm:$0xff] }
0x10b9   :  { %2325 = vst [vmem:[#allocation3 + $0x3] sm:$0x1] %v2323_v8 }
0x10ba   :  { %2326 = vst.sshfl [vmem:[#allocation1] sm:$0xff pattern:$0x73625140] %v3513_v51  ;;  %v2687_v51 = vld [vmem:[%s3119_s4] ss:$0 sm:$0xff]  ;;  %s2902_s4 = sshra.s32 %s2550_s11, 4  ;;  %s2903_s4 = int_to_ptr.hbm [resolvable:$true] %s2902_s4 }
0x10bb   :  { %s2904_s22 = scalar_lea.hbm %s2903_s4, 2  ;;  %p2907_p12 = scmp.lt.s32.totalorder %s2903_s4, %s3124_s30 }
0x10bc   :  { %p2905_p11 = scmp.ne.s32.totalorder %s2903_s4, %s2904_s22  ;;  %p2908_p13 = scmp.lt.s32.totalorder %s2906_s7, %s2904_s22 }
0x10be   :  { %p2909_p0 = por %p2908_p13, %p2907_p12 }
0x10c0   :  { %p2910_p1 = pnand %p2909_p0, %p2905_p11 }
0x10c1   :  { %v2328_v13 = vld [vmem:[#allocation1 + $0x3] ss:$4 sm:$0xff] }
0x10c2   :  { %v2628_v17 = vrot.slane %v2328_v13, 9 }
0x10c4   :  { %2332 = vst [vmem:[#allocation3 + $0x5] sm:$0x1] %v2628_v17 }
0x10cb   :  { %v2339_v9 = vld [vmem:[#allocation3] sm:$0xff] }
0x10cc   :  { %2427 = vst [vmem:[#allocation1] ss:$4 sm:$0xff] %v2339_v9 }
0x10d3   :  { %v2430_v18 = vld.sshfl [vmem:[#allocation1] sm:$0xff pattern:$0x73625140]  ;;  %v2431_v20 = vld.sshfl [vmem:[#allocation1 + $0x8] sm:$0xff pattern:$0x73625140] }
0x10d4   :  { %2456 = vmatmul.f32.vlgmr.msra.gmra.mxu2 %v2430_v18  ;;  %2476 = vmatmul.f32.vlgmr.msra.gmra.mxu3 %v2431_v20  ;;  %v2432_v21 = vld.sshfl [vmem:[#allocation1 + $0x10] sm:$0xff pattern:$0x73625140]  ;;  %v2433_v22 = vld.sshfl [vmem:[#allocation1 + $0x18] sm:$0xff pattern:$0x73625140] }
0x10d5   :  { %2496 = vmatmul.f32.vlgmr.msra.gmra.mxu0 %v2432_v21  ;;  %2516 = vmatmul.f32.vlgmr.msrb.gmra.mxu1 %v2433_v22 }
0x10dc   :  { %2536 = vmatmul.f32.vlgmr.msrb.gmra.mxu2 %v2434_v36 }
0x1152   :  { %v2497_v31 = vpop.f32.mrf.mxu0  ;;  %v2517_v27 = vpop.f32.mrf.mxu1 }
0x1157   :  { %v2457_v23 = vpop.f32.mrf.mxu2  ;;  %v2477_v12 = vpop.f32.mrf.mxu3 }
0x1158   :  { %v2458_v14 = vadd.f32 %v2687_v51, %v2457_v23 }
0x115a   :  { %v2478_v24 = vadd.f32 %v2477_v12, %v2458_v14 }
0x115c   :  { %v2498_v26 = vadd.f32 %v2497_v31, %v2478_v24 }
0x115e   :  { %v2518_v30 = vadd.f32 %v2517_v27, %v2498_v26 }
0x115f   :  { %v2537_v29 = vpop.f32.mrf.mxu2 }
0x1160   :  { %v2538_v34 = vadd.f32 %v2537_v29, %v2518_v30 }
0x1162   :  { %2541 = vst.msk [vmem:[#allocation13] sm:$0x3] %vm2540_vm6, %v2538_v34 }
0x1163   :  { %2913 = shalt.err (!%p2910_p1)
}
0x1164   :  { %2552 = dma.vmem_to_hbm [thread:$0]  %s2548_s20, 32, %s2550_s11, [#allocation6]  }
0x1165   :  { %2920 = dma.done.wait [#allocation6], 32  }
0x1166   :  { %2921 = vsyncadd [#allocation6], 4294967264 }
0x1167   :  { %2557 = vsyncpa [#allocation5], 1 }
0x1168   :  { %2558 = vsyncpa [#allocation8], 1 }
0x1169   :  { %2559 = vsyncpa [#allocation11], 1 }
0x116a   :  { %2560 = vsyncpa [#allocation6], 1 }

</bundles_post_ra>
